<compile_context>
chip_gen: v7x
topology: tpu7x:2x2x1
jax: 0.10.0
libtpu: 0.0.40
codegen_flags: <defaults>
</compile_context>

<pallas_src>
import jax
import jax.numpy as jnp
from jax.experimental import pallas as pl
from jax.experimental.pallas import tpu as pltpu


def _beats_head_kernel(x_ref, w1_ref, b1_ref, s1_ref, t1_ref, w2_ref,
                       s2a_ref, t2a_ref, s2b_ref, t2b_ref,
                       wea_ref, web_ref, be_ref, o_ref):
    bb, T, C = x_ref.shape
    x = x_ref[...]                                    # (bb, T, C) f32, lane-dense in C
    x2d = x.reshape(bb * T, C)                        # merge leading dims (T % 8 == 0)

    # attention[0..3]: Conv1d(C->256, k=1) -> ReLU -> BatchNorm1d(256, eval,
    # folded to scale/shift) -> Tanh.   bf16 MXU, f32 accumulation.
    h = jnp.dot(x2d.astype(jnp.bfloat16), w1_ref[...],
                preferred_element_type=jnp.float32) + b1_ref[...]
    h = jnp.maximum(h, 0.0) * s1_ref[...] + t1_ref[...]
    h = jnp.tanh(h)

    # attention[4]: Conv1d(256->C, k=1).  Bias dropped: the softmax over time
    # is invariant to a per-channel constant.
    s = jnp.dot(h.astype(jnp.bfloat16), w2_ref[...],
                preferred_element_type=jnp.float32).reshape(bb, T, C)

    # attention[5]: Softmax over time (PyTorch dim=2 == axis 1 here), then
    # attentive statistics pooling — all batched, no per-batch loop.
    s = s - jnp.max(s, axis=1, keepdims=True)
    e = jnp.exp(s)
    inv = 1.0 / jnp.sum(e, axis=1)                    # (bb, C), exact; tiny op
    t = e * x                                         # reused for both moments
    mu = jnp.sum(t, axis=1) * inv                     # (bb, C)
    ex2 = jnp.sum(t * x, axis=1) * inv                # (bb, C)
    var = jnp.maximum(ex2 - mu * mu, 1e-4)            # clamp(min=1e-4)
    sg = var * jax.lax.rsqrt(var)                     # sqrt via EUP rsqrt

    # asp.bn (eval, folded; split into mu-/sg-halves) -> ReLU ->
    # Linear(2C -> emb).  The 2C concatenation is eliminated algebraically.
    fa = jnp.maximum(mu * s2a_ref[...] + t2a_ref[...], 0.0)
    fb = jnp.maximum(sg * s2b_ref[...] + t2b_ref[...], 0.0)
    out = (jnp.dot(fa.astype(jnp.bfloat16), wea_ref[...],
                   preferred_element_type=jnp.float32)
           + jnp.dot(fb.astype(jnp.bfloat16), web_ref[...],
                     preferred_element_type=jnp.float32)
           + be_ref[...])

    # F.normalize (p=2, dim=1, eps=1e-12): out / max(||out||, 1e-12)
    ssq = jnp.sum(out * out, axis=1, keepdims=True)
    out = out * jax.lax.rsqrt(jnp.maximum(ssq, 1e-24))
    o_ref[...] = out                                  # (bb, emb), lane-dense store


@jax.jit
def beats_custom_forward(x_btc, kparams):
    """x_btc: BEATs feature map, (B, T, C) float32 (lane-dense in channels)."""
    B, T, C = x_btc.shape
    emb = kparams[-1].shape[1]
    assert T % 8 == 0, "time dim must be sublane-aligned (T % 8 == 0)"

    # Batch blocking: single block for small batches; 8-row blocks otherwise
    # (M = b_blk*T >= 256 fills the 256-row MXU; output block stays (8,128)-legal).
    b_blk = B if B <= 8 else 8
    nb = pl.cdiv(B, b_blk)
    B_pad = nb * b_blk
    if B_pad != B:
        x_btc = jnp.pad(x_btc, ((0, B_pad - B), (0, 0), (0, 0)))

    def _full(a):
        return pl.BlockSpec(a.shape, lambda i, _nd=a.ndim: (0,) * _nd)

    # Tight VMEM bound computed from the block size (leave pipelining headroom).
    xblk_bytes = b_blk * T * C * 4
    param_bytes = sum(int(p.size) * p.dtype.itemsize for p in kparams)
    vmem_limit = int(min(max(12 * xblk_bytes + 6 * param_bytes, 8 << 20), 64 << 20))

    out = pl.pallas_call(
        _beats_head_kernel,
        out_shape=jax.ShapeDtypeStruct((B_pad, emb), jnp.float32),
        grid_spec=pltpu.PrefetchScalarGridSpec(
            num_scalar_prefetch=0,
            grid=(nb,),
            in_specs=[pl.BlockSpec((b_blk, T, C), lambda i: (i, 0, 0))]
                     + [_full(p) for p in kparams],   # constant index -> resident
            out_specs=pl.BlockSpec((b_blk, emb), lambda i: (i, 0)),
        ),
        compiler_params=pltpu.CompilerParams(
            dimension_semantics=("parallel",),
            vmem_limit_bytes=vmem_limit),
    )(x_btc, *kparams)
    return out[:B]


def make_params(key, C, hidden, emb):
    """Deterministic synthetic f32 parameters mirroring the module's shapes.

    Conv1d(C, 256, 1).weight  : (256, C, 1)  -> stored transposed (C, 256)
    Conv1d(256, C, 1).weight  : (C, 256, 1)  -> stored transposed (256, C)
    BatchNorm1d folded (eval): scale = gamma/sqrt(var+eps), shift = beta - mean*scale
    Linear(2C, emb).weight    : (emb, 2C)    -> stored transposed (2C, emb)
    """
    ks = jax.random.split(key, 8)
    eps = 1e-5

    w1t = 0.02 * jax.random.normal(ks[0], (C, hidden), jnp.float32)
    b1 = 0.01 * jax.random.normal(ks[1], (1, hidden), jnp.float32)
    g1 = 1.0 + 0.05 * jax.random.normal(ks[2], (1, hidden), jnp.float32)
    be1 = 0.01 * jax.random.normal(ks[3], (1, hidden), jnp.float32)
    # running_mean = 0, running_var = 1 (freshly initialized BN, eval mode)
    s1 = g1 / jnp.sqrt(1.0 + eps)
    t1 = be1

    w2t = 0.02 * jax.random.normal(ks[4], (hidden, C), jnp.float32)
    b2 = 0.01 * jax.random.normal(ks[5], (1, C), jnp.float32)

    g2 = 1.0 + 0.05 * jax.random.normal(ks[6], (1, 2 * C), jnp.float32)
    be2 = 0.01 * jax.random.normal(ks[7], (1, 2 * C), jnp.float32)
    s2 = g2 / jnp.sqrt(1.0 + eps)
    t2 = be2

    k8, k9 = jax.random.split(jax.random.fold_in(key, 123))
    wet = 0.02 * jax.random.normal(k8, (2 * C, emb), jnp.float32)
    beb = 0.01 * jax.random.normal(k9, (1, emb), jnp.float32)

    return (w1t, b1, s1, t1, w2t, b2, s2, t2, wet, beb)


def prepare_kernel_params(params):
    """One-time (outside jit) packing of module params for the kernel.

    * matmul weights cast to bf16 (f32 accumulation in-kernel).
    * b2 dropped: the softmax over time is invariant to a per-channel bias.
    * asp.bn scale/shift and the Linear weight split into mu-/sg-halves so the
      kernel never materialises the (B, 2C) concatenation.
    """
    (w1t, b1, s1, t1, w2t, b2, s2, t2, wet, be) = params
    del b2
    C = w1t.shape[0]
    s2a, s2b = s2[:, :C], s2[:, C:]
    t2a, t2b = t2[:, :C], t2[:, C:]
    wea, web = wet[:C, :], wet[C:, :]
    return (w1t.astype(jnp.bfloat16), b1, s1, t1,
            w2t.astype(jnp.bfloat16),
            s2a, t2a, s2b, t2b,
            wea.astype(jnp.bfloat16), web.astype(jnp.bfloat16), be)


def reference_forward(x_btc, params):
    """Plain-JAX f32 reference of the full module math (incl. b2)."""
    (w1t, b1, s1, t1, w2t, b2, s2, t2, wet, be) = params
    h = jnp.einsum("btc,ch->bth", x_btc, w1t) + b1
    h = jnp.maximum(h, 0.0) * s1 + t1
    h = jnp.tanh(h)
    s = jnp.einsum("bth,hc->btc", h, w2t) + b2
    w = jax.nn.softmax(s, axis=1)                           # softmax over time
    mu = jnp.sum(w * x_btc, axis=1)                         # (B, C)
    sg = jnp.sqrt(jnp.maximum(jnp.sum(x_btc * x_btc * w, axis=1) - mu * mu, 1e-4))
    feat = jnp.concatenate([mu, sg], axis=1) * s2[0] + t2[0]
    feat = jnp.maximum(feat, 0.0)
    out = feat @ wet + be
    nrm = jnp.maximum(jnp.linalg.norm(out, axis=1, keepdims=True), 1e-12)
    return out / nrm


if __name__ == "__main__":
    # input_size=10 branch of AttentiveStatisticsPooling: C=496, num_features=992
    B, C, T = 2, 496, 64
    HIDDEN, EMB = 256, 128

    key = jax.random.PRNGKey(0)
    kx, kp = jax.random.split(key)

    # Stand-in for beats.extract_features(x)[0] features in (B, T, C) layout
    # (see TODO at top of file).
    x_btc = jax.random.normal(kx, (B, T, C), jnp.float32)
    params = make_params(kp, C, HIDDEN, EMB)
    kparams = prepare_kernel_params(params)

    out = jax.block_until_ready(beats_custom_forward(x_btc, kparams))
    ref = reference_forward(x_btc, params)

    assert out.shape == (B, EMB)
    assert bool(jnp.all(jnp.isfinite(out)))
    # bf16 matmuls vs. pure-f32 reference.
    assert bool(jnp.allclose(out, ref, rtol=5e-2, atol=1e-2)), "mismatch vs reference"

    print("KERNEL_OK")
</pallas_src>

<mosaic_0001>
module attributes {stable_mosaic.version = 11 : i64} {
  func.func @_beats_head_kernel(%arg0: i32, %arg1: memref<2x64x496xf32, #tpu.memory_space<vmem>>, %arg2: memref<496x256xbf16, #tpu.memory_space<vmem>>, %arg3: memref<1x256xf32, #tpu.memory_space<vmem>>, %arg4: memref<1x256xf32, #tpu.memory_space<vmem>>, %arg5: memref<1x256xf32, #tpu.memory_space<vmem>>, %arg6: memref<256x496xbf16, #tpu.memory_space<vmem>>, %arg7: memref<1x496xf32, #tpu.memory_space<vmem>>, %arg8: memref<1x496xf32, #tpu.memory_space<vmem>>, %arg9: memref<1x496xf32, #tpu.memory_space<vmem>>, %arg10: memref<1x496xf32, #tpu.memory_space<vmem>>, %arg11: memref<496x128xbf16, #tpu.memory_space<vmem>>, %arg12: memref<496x128xbf16, #tpu.memory_space<vmem>>, %arg13: memref<1x128xf32, #tpu.memory_space<vmem>>, %arg14: memref<2x128xf32, #tpu.memory_space<vmem>>) attributes {dimension_semantics = [#tpu.dimension_semantics<parallel>], iteration_bounds = array<i64: 1>, scalar_prefetch = 0 : i64, scratch_operands = 0 : i64, tpu.core_type = #tpu.core_type<tc>, window_params = [{transform_indices = @transform_0, window_bounds = array<i64: 2, 64, 496>}, {pipeline_mode = #tpu.pipeline_mode<synchronous>, transform_indices = @transform_1, window_bounds = array<i64: 496, 256>}, {pipeline_mode = #tpu.pipeline_mode<synchronous>, transform_indices = @transform_2, window_bounds = array<i64: 1, 256>}, {pipeline_mode = #tpu.pipeline_mode<synchronous>, transform_indices = @transform_3, window_bounds = array<i64: 1, 256>}, {pipeline_mode = #tpu.pipeline_mode<synchronous>, transform_indices = @transform_4, window_bounds = array<i64: 1, 256>}, {pipeline_mode = #tpu.pipeline_mode<synchronous>, transform_indices = @transform_5, window_bounds = array<i64: 256, 496>}, {pipeline_mode = #tpu.pipeline_mode<synchronous>, transform_indices = @transform_6, window_bounds = array<i64: 1, 496>}, {pipeline_mode = #tpu.pipeline_mode<synchronous>, transform_indices = @transform_7, window_bounds = array<i64: 1, 496>}, {pipeline_mode = #tpu.pipeline_mode<synchronous>, transform_indices = @transform_8, window_bounds = array<i64: 1, 496>}, {pipeline_mode = #tpu.pipeline_mode<synchronous>, transform_indices = @transform_9, window_bounds = array<i64: 1, 496>}, {pipeline_mode = #tpu.pipeline_mode<synchronous>, transform_indices = @transform_10, window_bounds = array<i64: 496, 128>}, {pipeline_mode = #tpu.pipeline_mode<synchronous>, transform_indices = @transform_11, window_bounds = array<i64: 496, 128>}, {pipeline_mode = #tpu.pipeline_mode<synchronous>, transform_indices = @transform_12, window_bounds = array<i64: 1, 128>}, {transform_indices = @transform_13, window_bounds = array<i64: 2, 128>}]} {
    %c0 = arith.constant 0 : index
    %c0_0 = arith.constant 0 : index
    %c0_1 = arith.constant 0 : index
    %0 = vector.load %arg1[%c0, %c0_0, %c0_1] : memref<2x64x496xf32, #tpu.memory_space<vmem>>, vector<2x64x496xf32>
    %1 = vector.shape_cast %0 : vector<2x64x496xf32> to vector<128x496xf32>
    %2 = arith.truncf %1 : vector<128x496xf32> to vector<128x496xbf16>
    %c0_2 = arith.constant 0 : index
    %c0_3 = arith.constant 0 : index
    %3 = vector.load %arg2[%c0_2, %c0_3] : memref<496x256xbf16, #tpu.memory_space<vmem>>, vector<496x256xbf16>
    %cst = arith.constant dense<0.000000e+00> : vector<128x256xf32>
    %4 = tpu.matmul %2, %3, %cst {dimension_numbers = #tpu.dot_dimension_numbers<[1], [0], [0], [1], [0, 0, 1, 1], [], []>} : vector<128x496xbf16>, vector<496x256xbf16>, vector<128x256xf32> -> vector<128x256xf32>
    %c0_4 = arith.constant 0 : index
    %c0_5 = arith.constant 0 : index
    %5 = vector.load %arg3[%c0_4, %c0_5] : memref<1x256xf32, #tpu.memory_space<vmem>>, vector<1x256xf32>
    %6 = vector.broadcast %5 : vector<1x256xf32> to vector<128x256xf32>
    %7 = arith.addf %4, %6 : vector<128x256xf32>
    %cst_6 = arith.constant 0.000000e+00 : f32
    %8 = vector.broadcast %cst_6 : f32 to vector<128x256xf32>
    %9 = arith.maximumf %7, %8 : vector<128x256xf32>
    %c0_7 = arith.constant 0 : index
    %c0_8 = arith.constant 0 : index
    %10 = vector.load %arg4[%c0_7, %c0_8] : memref<1x256xf32, #tpu.memory_space<vmem>>, vector<1x256xf32>
    %11 = vector.broadcast %10 : vector<1x256xf32> to vector<128x256xf32>
    %12 = arith.mulf %9, %11 : vector<128x256xf32>
    %c0_9 = arith.constant 0 : index
    %c0_10 = arith.constant 0 : index
    %13 = vector.load %arg5[%c0_9, %c0_10] : memref<1x256xf32, #tpu.memory_space<vmem>>, vector<1x256xf32>
    %14 = vector.broadcast %13 : vector<1x256xf32> to vector<128x256xf32>
    %15 = arith.addf %12, %14 : vector<128x256xf32>
    %16 = math.tanh %15 : vector<128x256xf32>
    %17 = arith.truncf %16 : vector<128x256xf32> to vector<128x256xbf16>
    %c0_11 = arith.constant 0 : index
    %c0_12 = arith.constant 0 : index
    %18 = vector.load %arg6[%c0_11, %c0_12] : memref<256x496xbf16, #tpu.memory_space<vmem>>, vector<256x496xbf16>
    %cst_13 = arith.constant dense<0.000000e+00> : vector<128x496xf32>
    %19 = tpu.matmul %17, %18, %cst_13 {dimension_numbers = #tpu.dot_dimension_numbers<[1], [0], [0], [1], [0, 0, 1, 1], [], []>} : vector<128x256xbf16>, vector<256x496xbf16>, vector<128x496xf32> -> vector<128x496xf32>
    %20 = vector.shape_cast %19 : vector<128x496xf32> to vector<2x64x496xf32>
    %cst_14 = arith.constant dense<0xFF800000> : vector<2x496xf32>
    %21 = vector.multi_reduction <maximumf>, %20, %cst_14 [1] : vector<2x64x496xf32> to vector<2x496xf32>
    %22 = vector.shape_cast %21 : vector<2x496xf32> to vector<2x1x496xf32>
    %23 = vector.broadcast %22 : vector<2x1x496xf32> to vector<2x64x496xf32>
    %24 = arith.subf %20, %23 : vector<2x64x496xf32>
    %25 = math.exp %24 : vector<2x64x496xf32>
    %cst_15 = arith.constant dense<0.000000e+00> : vector<2x496xf32>
    %26 = vector.multi_reduction <add>, %25, %cst_15 [1] : vector<2x64x496xf32> to vector<2x496xf32>
    %cst_16 = arith.constant 1.000000e+00 : f32
    %27 = vector.broadcast %cst_16 : f32 to vector<2x496xf32>
    %28 = arith.divf %27, %26 : vector<2x496xf32>
    %29 = arith.mulf %25, %0 : vector<2x64x496xf32>
    %cst_17 = arith.constant dense<0.000000e+00> : vector<2x496xf32>
    %30 = vector.multi_reduction <add>, %29, %cst_17 [1] : vector<2x64x496xf32> to vector<2x496xf32>
    %31 = arith.mulf %30, %28 : vector<2x496xf32>
    %32 = arith.mulf %29, %0 : vector<2x64x496xf32>
    %cst_18 = arith.constant dense<0.000000e+00> : vector<2x496xf32>
    %33 = vector.multi_reduction <add>, %32, %cst_18 [1] : vector<2x64x496xf32> to vector<2x496xf32>
    %34 = arith.mulf %33, %28 : vector<2x496xf32>
    %35 = arith.mulf %31, %31 : vector<2x496xf32>
    %36 = arith.subf %34, %35 : vector<2x496xf32>
    %cst_19 = arith.constant 9.99999974E-5 : f32
    %37 = vector.broadcast %cst_19 : f32 to vector<2x496xf32>
    %38 = arith.maximumf %36, %37 : vector<2x496xf32>
    %39 = math.rsqrt %38 : vector<2x496xf32>
    %40 = arith.mulf %38, %39 : vector<2x496xf32>
    %c0_20 = arith.constant 0 : index
    %c0_21 = arith.constant 0 : index
    %41 = vector.load %arg7[%c0_20, %c0_21] : memref<1x496xf32, #tpu.memory_space<vmem>>, vector<1x496xf32>
    %42 = vector.broadcast %41 : vector<1x496xf32> to vector<2x496xf32>
    %43 = arith.mulf %31, %42 : vector<2x496xf32>
    %c0_22 = arith.constant 0 : index
    %c0_23 = arith.constant 0 : index
    %44 = vector.load %arg8[%c0_22, %c0_23] : memref<1x496xf32, #tpu.memory_space<vmem>>, vector<1x496xf32>
    %45 = vector.broadcast %44 : vector<1x496xf32> to vector<2x496xf32>
    %46 = arith.addf %43, %45 : vector<2x496xf32>
    %cst_24 = arith.constant 0.000000e+00 : f32
    %47 = vector.broadcast %cst_24 : f32 to vector<2x496xf32>
    %48 = arith.maximumf %46, %47 : vector<2x496xf32>
    %c0_25 = arith.constant 0 : index
    %c0_26 = arith.constant 0 : index
    %49 = vector.load %arg9[%c0_25, %c0_26] : memref<1x496xf32, #tpu.memory_space<vmem>>, vector<1x496xf32>
    %50 = vector.broadcast %49 : vector<1x496xf32> to vector<2x496xf32>
    %51 = arith.mulf %40, %50 : vector<2x496xf32>
    %c0_27 = arith.constant 0 : index
    %c0_28 = arith.constant 0 : index
    %52 = vector.load %arg10[%c0_27, %c0_28] : memref<1x496xf32, #tpu.memory_space<vmem>>, vector<1x496xf32>
    %53 = vector.broadcast %52 : vector<1x496xf32> to vector<2x496xf32>
    %54 = arith.addf %51, %53 : vector<2x496xf32>
    %cst_29 = arith.constant 0.000000e+00 : f32
    %55 = vector.broadcast %cst_29 : f32 to vector<2x496xf32>
    %56 = arith.maximumf %54, %55 : vector<2x496xf32>
    %57 = arith.truncf %48 : vector<2x496xf32> to vector<2x496xbf16>
    %c0_30 = arith.constant 0 : index
    %c0_31 = arith.constant 0 : index
    %58 = vector.load %arg11[%c0_30, %c0_31] : memref<496x128xbf16, #tpu.memory_space<vmem>>, vector<496x128xbf16>
    %cst_32 = arith.constant dense<0.000000e+00> : vector<2x128xf32>
    %59 = tpu.matmul %57, %58, %cst_32 {dimension_numbers = #tpu.dot_dimension_numbers<[1], [0], [0], [1], [0, 0, 1, 1], [], []>} : vector<2x496xbf16>, vector<496x128xbf16>, vector<2x128xf32> -> vector<2x128xf32>
    %60 = arith.truncf %56 : vector<2x496xf32> to vector<2x496xbf16>
    %c0_33 = arith.constant 0 : index
    %c0_34 = arith.constant 0 : index
    %61 = vector.load %arg12[%c0_33, %c0_34] : memref<496x128xbf16, #tpu.memory_space<vmem>>, vector<496x128xbf16>
    %cst_35 = arith.constant dense<0.000000e+00> : vector<2x128xf32>
    %62 = tpu.matmul %60, %61, %cst_35 {dimension_numbers = #tpu.dot_dimension_numbers<[1], [0], [0], [1], [0, 0, 1, 1], [], []>} : vector<2x496xbf16>, vector<496x128xbf16>, vector<2x128xf32> -> vector<2x128xf32>
    %63 = arith.addf %59, %62 : vector<2x128xf32>
    %c0_36 = arith.constant 0 : index
    %c0_37 = arith.constant 0 : index
    %64 = vector.load %arg13[%c0_36, %c0_37] : memref<1x128xf32, #tpu.memory_space<vmem>>, vector<1x128xf32>
    %65 = vector.broadcast %64 : vector<1x128xf32> to vector<2x128xf32>
    %66 = arith.addf %63, %65 : vector<2x128xf32>
    %67 = arith.mulf %66, %66 : vector<2x128xf32>
    %cst_38 = arith.constant dense<0.000000e+00> : vector<2xf32>
    %68 = vector.multi_reduction <add>, %67, %cst_38 [1] : vector<2x128xf32> to vector<2xf32>
    %69 = vector.shape_cast %68 : vector<2xf32> to vector<2x1xf32>
    %cst_39 = arith.constant 1.000000e-24 : f32
    %70 = vector.broadcast %cst_39 : f32 to vector<2x1xf32>
    %71 = arith.maximumf %69, %70 : vector<2x1xf32>
    %72 = math.rsqrt %71 : vector<2x1xf32>
    %73 = vector.broadcast %72 : vector<2x1xf32> to vector<2x128xf32>
    %74 = arith.mulf %66, %73 : vector<2x128xf32>
    %c0_40 = arith.constant 0 : index
    %c0_41 = arith.constant 0 : index
    %75 = vector.load %arg14[%c0_40, %c0_41] : memref<2x128xf32, #tpu.memory_space<vmem>>, vector<2x128xf32>
    tpu.vector_store %arg14[%c0_40, %c0_41], %74 {strides = array<i32>} : memref<2x128xf32, #tpu.memory_space<vmem>>, vector<2x128xf32>,
    return
  }
  func.func @transform_0(%arg0: i32) -> (i32, i32, i32) {
    %c0_i32 = arith.constant 0 : i32
    %c0_i32_0 = arith.constant 0 : i32
    %c0_i32_1 = arith.constant 0 : i32
    return %arg0, %c0_i32, %c0_i32_0 : i32, i32, i32
  }
  func.func @transform_1(%arg0: i32) -> (i32, i32) {
    %c0_i32 = arith.constant 0 : i32
    %c0_i32_0 = arith.constant 0 : i32
    %c0_i32_1 = arith.constant 0 : i32
    return %c0_i32, %c0_i32_0 : i32, i32
  }
  func.func @transform_2(%arg0: i32) -> (i32, i32) {
    %c0_i32 = arith.constant 0 : i32
    %c0_i32_0 = arith.constant 0 : i32
    %c0_i32_1 = arith.constant 0 : i32
    return %c0_i32, %c0_i32_0 : i32, i32
  }
  func.func @transform_3(%arg0: i32) -> (i32, i32) {
    %c0_i32 = arith.constant 0 : i32
    %c0_i32_0 = arith.constant 0 : i32
    %c0_i32_1 = arith.constant 0 : i32
    return %c0_i32, %c0_i32_0 : i32, i32
  }
  func.func @transform_4(%arg0: i32) -> (i32, i32) {
    %c0_i32 = arith.constant 0 : i32
    %c0_i32_0 = arith.constant 0 : i32
    %c0_i32_1 = arith.constant 0 : i32
    return %c0_i32, %c0_i32_0 : i32, i32
  }
  func.func @transform_5(%arg0: i32) -> (i32, i32) {
    %c0_i32 = arith.constant 0 : i32
    %c0_i32_0 = arith.constant 0 : i32
    %c0_i32_1 = arith.constant 0 : i32
    return %c0_i32, %c0_i32_0 : i32, i32
  }
  func.func @transform_6(%arg0: i32) -> (i32, i32) {
    %c0_i32 = arith.constant 0 : i32
    %c0_i32_0 = arith.constant 0 : i32
    %c0_i32_1 = arith.constant 0 : i32
    return %c0_i32, %c0_i32_0 : i32, i32
  }
  func.func @transform_7(%arg0: i32) -> (i32, i32) {
    %c0_i32 = arith.constant 0 : i32
    %c0_i32_0 = arith.constant 0 : i32
    %c0_i32_1 = arith.constant 0 : i32
    return %c0_i32, %c0_i32_0 : i32, i32
  }
  func.func @transform_8(%arg0: i32) -> (i32, i32) {
    %c0_i32 = arith.constant 0 : i32
    %c0_i32_0 = arith.constant 0 : i32
    %c0_i32_1 = arith.constant 0 : i32
    return %c0_i32, %c0_i32_0 : i32, i32
  }
  func.func @transform_9(%arg0: i32) -> (i32, i32) {
    %c0_i32 = arith.constant 0 : i32
    %c0_i32_0 = arith.constant 0 : i32
    %c0_i32_1 = arith.constant 0 : i32
    return %c0_i32, %c0_i32_0 : i32, i32
  }
  func.func @transform_10(%arg0: i32) -> (i32, i32) {
    %c0_i32 = arith.constant 0 : i32
    %c0_i32_0 = arith.constant 0 : i32
    %c0_i32_1 = arith.constant 0 : i32
    return %c0_i32, %c0_i32_0 : i32, i32
  }
  func.func @transform_11(%arg0: i32) -> (i32, i32) {
    %c0_i32 = arith.constant 0 : i32
    %c0_i32_0 = arith.constant 0 : i32
    %c0_i32_1 = arith.constant 0 : i32
    return %c0_i32, %c0_i32_0 : i32, i32
  }
  func.func @transform_12(%arg0: i32) -> (i32, i32) {
    %c0_i32 = arith.constant 0 : i32
    %c0_i32_0 = arith.constant 0 : i32
    %c0_i32_1 = arith.constant 0 : i32
    return %c0_i32, %c0_i32_0 : i32, i32
  }
  func.func @transform_13(%arg0: i32) -> (i32, i32) {
    %c0_i32 = arith.constant 0 : i32
    %c0_i32_0 = arith.constant 0 : i32
    return %arg0, %c0_i32 : i32, i32
  }
}

</mosaic_0001>

<bundles_post_ra>
// kernel: beats_custom_forward.1
= control target key start
LH: loop header
LB: loop body
LE: loop exit
PB: predicated region body
PF: predicated region fallthrough
CT: control target
= control target key end

     0   :  { %18 = vsyncpa [#allocation3], 0  ;;  %s6044_s0 = inlined_call_operand.vmem [shape: f32[2,64,496], index: 0, kind: input, shape index: {}]   ;;  %s6045_s1 = inlined_call_operand.vmem [shape: bf16[496,256], index: 1, kind: input, shape index: {}]   ;;  %s6046_s2 = inlined_call_operand.hbm [shape: f32[1,256], index: 2, kind: input, shape index: {}]   ;;  %s6047_s3 = inlined_call_operand.vmem [shape: f32[1,256], index: 3, kind: input, shape index: {}]   ;;  %s6048_s4 = inlined_call_operand.hbm [shape: f32[1,256], index: 4, kind: input, shape index: {}]   ;;  %s6049_s5 = inlined_call_operand.vmem [shape: bf16[256,496], index: 5, kind: input, shape index: {}]   ;;  %s6050_s6 = inlined_call_operand.vmem [shape: f32[1,496], index: 6, kind: input, shape index: {}]   ;;  %s6051_s7 = inlined_call_operand.vmem [shape: f32[1,496], index: 7, kind: input, shape index: {}]   ;;  %s6052_s8 = inlined_call_operand.vmem [shape: f32[1,496], index: 8, kind: input, shape index: {}]   ;;  %s6053_s9 = inlined_call_operand.vmem [shape: f32[1,496], index: 9, kind: input, shape index: {}]   ;;  %s6054_s10 = inlined_call_operand.hbm [shape: bf16[496,128], index: 10, kind: input, shape index: {}]   ;;  %s6055_s11 = inlined_call_operand.hbm [shape: bf16[496,128], index: 11, kind: input, shape index: {}]   ;;  %s6056_s12 = inlined_call_operand.vmem [shape: f32[1,128], index: 12, kind: input, shape index: {}]   ;;  %s6057_s13 = inlined_call_operand.hbm [shape: f32[2,128], index: 13, kind: output, shape index: {}]  }
   0x1   :  { %19 = vsyncpa [#allocation6], 0 }
   0x2   :  { %20 = vsyncpa [#allocation9], 0 }
   0x3   :  { %21 = vsyncpa [#allocation4], 0  ;;  %s4363_s25 = smov [#allocation5]   ;;  %s4364_s27 = smov [#allocation2]  }
   0x4   :  { %s44_s26 = sshll.u32 %s4363_s25, 4  ;;  %s32_s28 = sshll.u32 %s4364_s27, 4  ;;  %s45_s26 = int_to_ptr.vmem [resolvable:$true] %s44_s26  ;;  %s33_s28 = int_to_ptr.vmem [resolvable:$true] %s32_s28 }
   0x5   :  { %s4245_s14 = scalar_lea.hbm %s6048_s4, 32 }
   0x6   :  { %p4246_p0 = scmp.ne.s32.totalorder %s6048_s4, %s4245_s14  ;;  %p4249_p1 = scmp.lt.u32.totalorder %s4245_s14, %s6048_s4 }
   0x8   :  { %p4251_p2 = pnand %p4249_p1, %p4246_p0 }
   0xa   :  { %4254 = shalt.err (!%p4251_p2)
}
   0xb   :  { %s4255_s19 = scalar_lea.vmem %s45_s26, 32  ;;  %p4260_p4 = scmp.lt.s32.totalorder %s45_s26, %s45_s26 }
   0xc   :  { %p4256_p3 = scmp.ne.s32.totalorder %s45_s26, %s4255_s19  ;;  %p4261_p5 = scmp.lt.s32.totalorder %s4255_s19, %s4255_s19 }
   0xe   :  { %p4262_p6 = por %p4261_p5, %p4260_p4 }
  0x10   :  { %p4263_p7 = pnand %p4262_p6, %p4256_p3 }
  0x12   :  { %4266 = shalt.err (!%p4263_p7)
}
  0x13   :  { %47 = dma.hbm_to_vmem [thread:$0]  %s6048_s4, 32, %s45_s26, [#allocation6]  }
  0x14   :  { %s4267_s24 = scalar_lea.hbm %s6046_s2, 32 }
  0x15   :  { %p4268_p8 = scmp.ne.s32.totalorder %s6046_s2, %s4267_s24  ;;  %p4271_p9 = scmp.lt.u32.totalorder %s4267_s24, %s6046_s2 }
  0x17   :  { %p4273_p10 = pnand %p4271_p9, %p4268_p8 }
  0x19   :  { %4276 = shalt.err (!%p4273_p10)
}
  0x1a   :  { %s4277_s14 = scalar_lea.vmem %s33_s28, 32  ;;  %p4282_p12 = scmp.lt.s32.totalorder %s33_s28, %s33_s28 }
  0x1b   :  { %p4278_p11 = scmp.ne.s32.totalorder %s33_s28, %s4277_s14  ;;  %p4283_p13 = scmp.lt.s32.totalorder %s4277_s14, %s4277_s14 }
  0x1d   :  { %p4284_p0 = por %p4283_p13, %p4282_p12 }
  0x1f   :  { %p4285_p1 = pnand %p4284_p0, %p4278_p11 }
  0x21   :  { %4288 = shalt.err (!%p4285_p1)
}
  0x22   :  { %35 = dma.hbm_to_vmem [thread:$0]  %s6046_s2, 32, %s33_s28, [#allocation3]  }
  0x23   :  { %s4365_s15 = smov [#allocation7]   ;;  %s4289_s19 = scalar_lea.hbm %s6054_s10, 3968 }
  0x24   :  { %s63_s16 = sshll.u32 %s4365_s15, 4  ;;  %p4290_p2 = scmp.ne.s32.totalorder %s6054_s10, %s4289_s19  ;;  %s64_s16 = int_to_ptr.vmem [resolvable:$true] %s63_s16 }
  0x25   :  { %p4293_p3 = scmp.lt.u32.totalorder %s4289_s19, %s6054_s10 }
  0x27   :  { %p4295_p4 = pnand %p4293_p3, %p4290_p2 }
  0x29   :  { %4298 = shalt.err (!%p4295_p4)
}
  0x2a   :  { %s4299_s24 = scalar_lea.vmem %s64_s16, 3968  ;;  %p4304_p6 = scmp.lt.s32.totalorder %s64_s16, %s64_s16 }
  0x2b   :  { %p4300_p5 = scmp.ne.s32.totalorder %s64_s16, %s4299_s24  ;;  %p4305_p7 = scmp.lt.s32.totalorder %s4299_s24, %s4299_s24 }
  0x2d   :  { %p4306_p8 = por %p4305_p7, %p4304_p6 }
  0x2f   :  { %p4307_p9 = pnand %p4306_p8, %p4300_p5 }
  0x31   :  { %4310 = shalt.err (!%p4307_p9)
}
  0x32   :  { %s4366_s2 = smov 64   ;;  %s4367_s28 = smov 4  }
  0x33   :  { %69 = dma.hbm_to_vmem [thread:$0]  %s6054_s10, 3968, %s64_s16, [#allocation6], %s4366_s2, %s4366_s2, %s4367_s28  }
  0x34   :  { %s4368_s29 = smov [#allocation8]   ;;  %s4311_s26 = scalar_lea.hbm %s6055_s11, 3968 }
  0x35   :  { %s75_s30 = sshll.u32 %s4368_s29, 4  ;;  %p4312_p10 = scmp.ne.s32.totalorder %s6055_s11, %s4311_s26  ;;  %s76_s30 = int_to_ptr.vmem [resolvable:$true] %s75_s30 }
  0x36   :  { %p4315_p11 = scmp.lt.u32.totalorder %s4311_s26, %s6055_s11 }
  0x38   :  { %p4317_p12 = pnand %p4315_p11, %p4312_p10 }
  0x3a   :  { %4320 = shalt.err (!%p4317_p12)
}
  0x3b   :  { %s4321_s20 = scalar_lea.vmem %s76_s30, 3968  ;;  %p4326_p0 = scmp.lt.s32.totalorder %s76_s30, %s76_s30 }
  0x3c   :  { %p4322_p13 = scmp.ne.s32.totalorder %s76_s30, %s4321_s20  ;;  %p4327_p1 = scmp.lt.s32.totalorder %s4321_s20, %s4321_s20 }
  0x3e   :  { %p4328_p2 = por %p4327_p1, %p4326_p0 }
  0x40   :  { %p4329_p3 = pnand %p4328_p2, %p4322_p13 }
  0x42   :  { %4332 = shalt.err (!%p4329_p3)
}
  0x43   :  { %81 = dma.hbm_to_vmem [thread:$0]  %s6055_s11, 3968, %s76_s30, [#allocation9], %s4366_s2, %s4366_s2, %s4367_s28  }
  0x44   :  { %4355 = dma.done.wait [#allocation3], 32  }
  0x45   :  { %4356 = vsyncadd [#allocation3], 4294967264 }
  0x46   :  { %4357 = dma.done.wait [#allocation6], 4000  }
  0x47   :  { %4358 = vsyncadd [#allocation6], 4294963296 }
  0x48   :  { %4359 = dma.done.wait [#allocation9], 3968  }
  0x49   :  { %4360 = vsyncadd [#allocation9], 4294963328  ;;  %v3704_v0 = vld [vmem:[%s6045_s1 + $0x4] ss:$8 sps:$4 sm:$0xff]   ;;  %v3706_v1 = vld [vmem:[%s6045_s1] ss:$8 sps:$4 sm:$0xff]  }
  0x4a   :  { %602 = vmatprep.subr.bf16.mxu0 %v3704_v0  ;;  %v3707_v2 = vld [vmem:[%s6045_s1 + $0x14] ss:$8 sps:$4 sm:$0xff]   ;;  %v3709_v3 = vld [vmem:[%s6045_s1 + $0x10] ss:$8 sps:$4 sm:$0xff]   ;;  %v3710_v4 = vld [vmem:[%s6045_s1 + $0x24] ss:$8 sps:$4 sm:$0xff]  }
  0x4b   :  { %603 = vmatpush1.bf16.msra.mxu0 %v3706_v1  ;;  %v3712_v5 = vld [vmem:[%s6045_s1 + $0x20] ss:$8 sps:$4 sm:$0xff]   ;;  %v3713_v6 = vld [vmem:[%s6045_s1 + $0x34] ss:$8 sps:$4 sm:$0xff]   ;;  %v3715_v7 = vld [vmem:[%s6045_s1 + $0x30] ss:$8 sps:$4 sm:$0xff]  }
  0x4c   :  { %604 = vmatprep.subr.bf16.mxu0 %v3707_v2  ;;  %v3716_v8 = vld [vmem:[%s6045_s1 + $0x44] ss:$8 sps:$4 sm:$0xff]   ;;  %v3718_v9 = vld [vmem:[%s6045_s1 + $0x40] ss:$8 sps:$4 sm:$0xff]   ;;  %v3719_v10 = vld [vmem:[%s6045_s1 + $0x54] ss:$8 sps:$4 sm:$0xff]  }
  0x4d   :  { %v3721_v11 = vld [vmem:[%s6045_s1 + $0x50] ss:$8 sps:$4 sm:$0xff]   ;;  %v3722_v12 = vld [vmem:[%s6045_s1 + $0x64] ss:$8 sps:$4 sm:$0xff]   ;;  %v3724_v16 = vld [vmem:[%s6045_s1 + $0x60] ss:$8 sps:$4 sm:$0xff]  }
  0x4e   :  { %v98_v13 = vld [vmem:[%s6044_s0 + $0x8] sm:$0xff]  ;;  %v3725_v17 = vld [vmem:[%s6045_s1 + $0x74] ss:$8 sps:$4 sm:$0xff]   ;;  %v3727_v18 = vld [vmem:[%s6045_s1 + $0x70] ss:$8 sps:$4 sm:$0xff]   ;;  %vm577_vm0 = vcmask 916480  }
  0x4f   :  { %605 = vmatpush1.bf16.msra.mxu0 %v3709_v3  ;;  %v102_v14 = vld [vmem:[%s6044_s0 + $0x28] sm:$0xff]  ;;  %v3731_v21 = vld [vmem:[%s6045_s1 + $0x94] ss:$8 sps:$4 sm:$0xff]   ;;  %v3733_v22 = vld [vmem:[%s6045_s1 + $0x90] ss:$8 sps:$4 sm:$0xff]   ;;  %vm2771_vm1 = vcmask 1041409  }
  0x50   :  { %606 = vmatprep.subr.bf16.mxu0 %v3710_v4  ;;  %v162_v15 = vpack.c.bf16 %v102_v14, %v98_v13  ;;  %v3728_v19 = vld [vmem:[%s6045_s1 + $0x84] ss:$8 sps:$4 sm:$0xff]   ;;  %v3730_v20 = vld [vmem:[%s6045_s1 + $0x80] ss:$8 sps:$4 sm:$0xff]   ;;  %v3737_v25 = vld [vmem:[%s6045_s1 + $0xb4] ss:$8 sps:$4 sm:$0xff]  }
  0x51   :  { %v3734_v23 = vld [vmem:[%s6045_s1 + $0xa4] ss:$8 sps:$4 sm:$0xff]   ;;  %v3736_v24 = vld [vmem:[%s6045_s1 + $0xa0] ss:$8 sps:$4 sm:$0xff]   ;;  %v3739_v26 = vld [vmem:[%s6045_s1 + $0xb0] ss:$8 sps:$4 sm:$0xff]  }
  0x52   :  { %634 = vmatprep.mubr.bf16.mxu0 %v162_v15  ;;  %v3740_v27 = vld [vmem:[%s6045_s1 + $0xc4] ss:$8 sps:$4 sm:$0xff]   ;;  %v3742_v28 = vld [vmem:[%s6045_s1 + $0xc0] ss:$8 sps:$4 sm:$0xff]   ;;  %v3743_v29 = vld [vmem:[%s6045_s1 + $0xd4] ss:$8 sps:$4 sm:$0xff]  }
  0x53   :  { %607 = vmatpush1.bf16.msra.mxu0 %v3712_v5  ;;  %v3745_v30 = vld [vmem:[%s6045_s1 + $0xd0] ss:$8 sps:$4 sm:$0xff]   ;;  %v3746_v31 = vld [vmem:[%s6045_s1 + $0xe4] ss:$8 sps:$4 sm:$0xff]   ;;  %v3748_v32 = vld [vmem:[%s6045_s1 + $0xe0] ss:$8 sps:$4 sm:$0xff]  }
  0x54   :  { %608 = vmatprep.subr.bf16.mxu0 %v3713_v6  ;;  %v3749_v33 = vld [vmem:[%s6045_s1 + $0xf4] ss:$8 sps:$4 sm:$0xff]   ;;  %v3751_v34 = vld [vmem:[%s6045_s1 + $0xf0] ss:$8 sps:$4 sm:$0xff]   ;;  %v97_v35 = vld [vmem:[%s6044_s0] sm:$0xff]  ;;  %vm3364_vm2 = vcmask 1041408  }
  0x55   :  { %v101_v36 = vld [vmem:[%s6044_s0 + $0x20] sm:$0xff]  ;;  %v106_v38 = vld [vmem:[%s6044_s0 + $0x48] sm:$0xff]  ;;  %v3757_v42 = vld [vmem:[%s6045_s1 + $0x114] ss:$8 sps:$4 sm:$0xff]   ;;  %s4370_s24 = smov [#allocation10]  }
  0x56   :  { %v3754_v37 = vld [vmem:[%s6045_s1 + $0x104] ss:$8 sps:$4 sm:$0xff]   ;;  %v161_v40 = vpack.c.bf16 %v101_v36, %v97_v35  ;;  %v3752_v41 = vld [vmem:[%s6045_s1 + $0x100] ss:$8 sps:$4 sm:$0xff]   ;;  %v3755_v47 = vld [vmem:[%s6045_s1 + $0x110] ss:$8 sps:$4 sm:$0xff]  }
  0x57   :  { %609 = vmatpush1.bf16.msra.mxu0 %v3715_v7  ;;  %v110_v39 = vld [vmem:[%s6044_s0 + $0x68] sm:$0xff]  ;;  %v3797_v44 = vld [vmem:[%s6049_s5 + $0x4] ss:$16 sps:$4 sm:$0xff]   ;;  %v3799_v45 = vld [vmem:[%s6049_s5] ss:$16 sps:$4 sm:$0xff]   ;;  %s3378_s25 = sshll.u32 %s4370_s24, 4  ;;  %s3379_s25 = int_to_ptr.vmem [resolvable:$true] %s3378_s25 }
  0x58   :  { %610 = vmatprep.subr.bf16.mxu0 %v3716_v8  ;;  %v166_v43 = vpack.c.bf16 %v110_v39, %v106_v38  ;;  %v3800_v46 = vld [vmem:[%s6049_s5 + $0x24] ss:$16 sps:$4 sm:$0xff]   ;;  %1380 = vmatprep.subr.bf16.mxu1 %v3797_v44  ;;  %v3802_v51 = vld [vmem:[%s6049_s5 + $0x20] ss:$16 sps:$4 sm:$0xff]   ;;  %v114_v52 = vld [vmem:[%s6044_s0 + $0x88] sm:$0xff]  ;;  %s4333_s27 = scalar_lea.vmem %s3379_s25, 32  ;;  %p4338_p5 = scmp.lt.s32.totalorder %s3379_s25, %s3379_s25 }
  0x59   :  { %v105_v48 = vld [vmem:[%s6044_s0 + $0x40] sm:$0xff]  ;;  %1381 = vmatpush1.bf16.msra.mxu1 %v3799_v45  ;;  %v118_v54 = vld [vmem:[%s6044_s0 + $0xa8] sm:$0xff]  ;;  %v3763_v58 = vld [vmem:[%s6045_s1 + $0x134] ss:$8 sps:$4 sm:$0xff]   ;;  %p4334_p4 = scmp.ne.s32.totalorder %s3379_s25, %s4333_s27  ;;  %p4339_p6 = scmp.lt.s32.totalorder %s4333_s27, %s4333_s27 }
  0x5a   :  { %v109_v49 = vld [vmem:[%s6044_s0 + $0x60] sm:$0xff]  ;;  %1382 = vmatprep.subr.bf16.mxu1 %v3800_v46  ;;  %v170_v59 = vpack.c.bf16 %v118_v54, %v114_v52  ;;  %v3761_v61 = vld [vmem:[%s6045_s1 + $0x130] ss:$8 sps:$4 sm:$0xff]   ;;  %v122_v1 = vld [vmem:[%s6044_s0 + $0xc8] sm:$0xff] }
  0x5b   :  { %611 = vmatpush1.bf16.msra.mxu0 %v3718_v9  ;;  %v3760_v50 = vld [vmem:[%s6045_s1 + $0x124] ss:$8 sps:$4 sm:$0xff]   ;;  %v165_v55 = vpack.c.bf16 %v109_v49, %v105_v48  ;;  %v3805_v56 = vld [vmem:[%s6049_s5 + $0x40] ss:$16 sps:$4 sm:$0xff]   ;;  %v3769_v8 = vld [vmem:[%s6045_s1 + $0x154] ss:$8 sps:$4 sm:$0xff]   ;;  %p4340_p7 = por %p4339_p6, %p4338_p5 }
  0x5c   :  { %612 = vmatprep.subr.bf16.mxu0 %v3719_v10  ;;  %v3803_v53 = vld [vmem:[%s6049_s5 + $0x44] ss:$16 sps:$4 sm:$0xff]   ;;  %v3758_v57 = vld [vmem:[%s6045_s1 + $0x120] ss:$8 sps:$4 sm:$0xff]  }
  0x5d   :  { %1383 = vmatpush1.bf16.msra.mxu1 %v3802_v51  ;;  %v3806_v60 = vld [vmem:[%s6049_s5 + $0x64] ss:$16 sps:$4 sm:$0xff]   ;;  %v3808_v2 = vld [vmem:[%s6049_s5 + $0x60] ss:$16 sps:$4 sm:$0xff]   ;;  %v126_v3 = vld [vmem:[%s6044_s0 + $0xe8] sm:$0xff]  ;;  %p4341_p8 = pnand %p4340_p7, %p4334_p4 }
  0x5e   :  { %1384 = vmatprep.subr.bf16.mxu1 %v3803_v53  ;;  %v113_v62 = vld [vmem:[%s6044_s0 + $0x80] sm:$0xff]  ;;  %v174_v10 = vpack.c.bf16 %v126_v3, %v122_v1  ;;  %v3781_v36 = vld [vmem:[%s6045_s1 + $0x194] ss:$8 sps:$4 sm:$0xff]   ;;  %v146_v44 = vld [vmem:[%s6044_s0 + $0x188] sm:$0xff] }
  0x5f   :  { %613 = vmatpush1.bf16.msra.mxu0 %v3721_v11  ;;  %v117_v63 = vld [vmem:[%s6044_s0 + $0xa0] sm:$0xff]  ;;  %v150_v45 = vld [vmem:[%s6044_s0 + $0x1a8] sm:$0xff]  ;;  %v3787_v48 = vld [vmem:[%s6045_s1 + $0x1b4] ss:$8 sps:$4 sm:$0xff]  }
  0x60   :  { %614 = vmatprep.subr.bf16.mxu0 %v3722_v12  ;;  %v3766_v0 = vld [vmem:[%s6045_s1 + $0x144] ss:$8 sps:$4 sm:$0xff]   ;;  %v3811_v5 = vld [vmem:[%s6049_s5 + $0x80] ss:$16 sps:$4 sm:$0xff]   ;;  %v169_v7 = vpack.c.bf16 %v117_v63, %v113_v62  ;;  %v186_v49 = vpack.c.bf16 %v150_v45, %v146_v44  ;;  %v104_v1 = vld [vmem:[%s6044_s0 + $0x38] sm:$0xff] }
  0x61   :  { %1385 = vmatpush1.bf16.msra.mxu1 %v3805_v56  ;;  %v3809_v4 = vld [vmem:[%s6049_s5 + $0x84] ss:$16 sps:$4 sm:$0xff]   ;;  %v3764_v6 = vld [vmem:[%s6045_s1 + $0x140] ss:$8 sps:$4 sm:$0xff]   ;;  %v3767_v12 = vld [vmem:[%s6045_s1 + $0x150] ss:$8 sps:$4 sm:$0xff]  }
  0x62   :  { %1386 = vmatprep.subr.bf16.mxu1 %v3806_v60  ;;  %v3812_v9 = vld [vmem:[%s6049_s5 + $0xa4] ss:$16 sps:$4 sm:$0xff]   ;;  %v3814_v11 = vld [vmem:[%s6049_s5 + $0xa0] ss:$16 sps:$4 sm:$0xff]   ;;  %v154_v54 = vld [vmem:[%s6044_s0 + $0x1c8] sm:$0xff] }
  0x63   :  { %615 = vmatpush1.bf16.msra.mxu0 %v3724_v16  ;;  %v121_v13 = vld [vmem:[%s6044_s0 + $0xc0] sm:$0xff]  ;;  %v3791_v62 = vld [vmem:[%s6045_s1 + $0x1d0] ss:$8 sps:$4 sm:$0xff]  }
  0x64   :  { %616 = vmatprep.subr.bf16.mxu0 %v3725_v17  ;;  %v125_v14 = vld [vmem:[%s6044_s0 + $0xe0] sm:$0xff]  ;;  %v130_v17 = vld [vmem:[%s6044_s0 + $0x108] sm:$0xff]  ;;  %v160_v44 = vld [vmem:[%s6044_s0 + $0x1f8] sm:$0xff] }
  0x65   :  { %1387 = vmatpush1.bf16.msra.mxu1 %v3808_v2  ;;  %v3815_v15 = vld [vmem:[%s6049_s5 + $0xc4] ss:$16 sps:$4 sm:$0xff]   ;;  %v3826_v39 = vld [vmem:[%s6049_s5 + $0x120] ss:$16 sps:$4 sm:$0xff]  }
  0x66   :  { %1388 = vmatprep.subr.bf16.mxu1 %v3809_v4  ;;  %v3772_v16 = vld [vmem:[%s6045_s1 + $0x164] ss:$8 sps:$4 sm:$0xff]   ;;  %v3782_v46 = vld [vmem:[%s6045_s1 + $0x1a0] ss:$8 sps:$4 sm:$0xff]  }
  0x67   :  { %617 = vmatpush1.bf16.msra.mxu0 %v3727_v18  ;;  %v134_v18 = vld [vmem:[%s6044_s0 + $0x128] sm:$0xff]  ;;  %v145_v51 = vld [vmem:[%s6044_s0 + $0x180] sm:$0xff] }
  0x68   :  { %618 = vmatprep.subr.bf16.mxu0 %v3728_v19  ;;  %v3817_v19 = vld [vmem:[%s6049_s5 + $0xc0] ss:$16 sps:$4 sm:$0xff]   ;;  %v3790_v53 = vld [vmem:[%s6045_s1 + $0x1c4] ss:$8 sps:$4 sm:$0xff]  }
  0x69   :  { %1389 = vmatpush1.bf16.msra.mxu1 %v3811_v5  ;;  %v149_v52 = vld [vmem:[%s6044_s0 + $0x1a0] sm:$0xff]  ;;  %v99_v5 = vld [vmem:[%s6044_s0 + $0x10] sm:$0xff] }
  0x6a   :  { %1390 = vmatprep.subr.bf16.mxu1 %v3812_v9  ;;  %v3788_v56 = vld [vmem:[%s6045_s1 + $0x1c0] ss:$8 sps:$4 sm:$0xff]   ;;  %v3796_v63 = vld [vmem:[%s6045_s1 + $0x1e4] ss:$8 sps:$4 sm:$0xff]  }
  0x6b   :  { %619 = vmatpush1.bf16.msra.mxu0 %v3730_v20  ;;  %v3770_v20 = vld [vmem:[%s6045_s1 + $0x160] ss:$8 sps:$4 sm:$0xff]  }
  0x6c   :  { %620 = vmatprep.subr.bf16.mxu0 %v3731_v21  ;;  %v173_v21 = vpack.c.bf16 %v125_v14, %v121_v13  ;;  %v153_v60 = vld [vmem:[%s6044_s0 + $0x1c0] sm:$0xff]  ;;  %v116_v13 = vld [vmem:[%s6044_s0 + $0x98] sm:$0xff] }
  0x6d   :  { %1391 = vmatpush1.bf16.msra.mxu1 %v3814_v11  ;;  %v3794_v2 = vld [vmem:[%s6045_s1 + $0x1e0] ss:$8 sps:$4 sm:$0xff]   ;;  %v107_v11 = vld [vmem:[%s6044_s0 + $0x50] sm:$0xff]  ;;  %v120_v14 = vld [vmem:[%s6044_s0 + $0xb8] sm:$0xff] }
  0x6e   :  { %1392 = vmatprep.subr.bf16.mxu1 %v3815_v15 }
  0x6f   :  { %621 = vmatpush1.bf16.msra.mxu0 %v3733_v22  ;;  %v3775_v22 = vld [vmem:[%s6045_s1 + $0x174] ss:$8 sps:$4 sm:$0xff]  }
  0x70   :  { %622 = vmatprep.subr.bf16.mxu0 %v3734_v23  ;;  %v3818_v23 = vld [vmem:[%s6049_s5 + $0xe4] ss:$16 sps:$4 sm:$0xff]  }
  0x71   :  { %1393 = vmatpush1.bf16.msra.mxu1 %v3817_v19  ;;  %v124_v19 = vld [vmem:[%s6044_s0 + $0xd8] sm:$0xff] }
  0x72   :  { %1394 = vmatprep.subr.bf16.mxu1 %v3818_v23  ;;  %v123_v23 = vld [vmem:[%s6044_s0 + $0xd0] sm:$0xff] }
  0x73   :  { %623 = vmatpush1.bf16.msra.mxu0 %v3736_v24  ;;  %v178_v24 = vpack.c.bf16 %v134_v18, %v130_v17  ;;  %v115_v17 = vld [vmem:[%s6044_s0 + $0x90] sm:$0xff] }
  0x74   :  { %624 = vmatprep.subr.bf16.mxu0 %v3737_v25  ;;  %v3820_v25 = vld [vmem:[%s6049_s5 + $0xe0] ss:$16 sps:$4 sm:$0xff]  }
  0x75   :  { %1395 = vmatpush1.bf16.msra.mxu1 %v3820_v25  ;;  %v119_v18 = vld [vmem:[%s6044_s0 + $0xb0] sm:$0xff]  ;;  %v132_v25 = vld [vmem:[%s6044_s0 + $0x118] sm:$0xff] }
  0x77   :  { %625 = vmatpush1.bf16.msra.mxu0 %v3739_v26  ;;  %v3773_v26 = vld [vmem:[%s6045_s1 + $0x170] ss:$8 sps:$4 sm:$0xff]  }
  0x78   :  { %626 = vmatprep.subr.bf16.mxu0 %v3740_v27  ;;  %v129_v27 = vld [vmem:[%s6044_s0 + $0x100] sm:$0xff] }
  0x7b   :  { %627 = vmatpush1.bf16.msra.mxu0 %v3742_v28  ;;  %v133_v28 = vld [vmem:[%s6044_s0 + $0x120] sm:$0xff] }
  0x7c   :  { %628 = vmatprep.subr.bf16.mxu0 %v3743_v29  ;;  %v3821_v29 = vld [vmem:[%s6049_s5 + $0x104] ss:$16 sps:$4 sm:$0xff]   ;;  %v177_v35 = vpack.c.bf16 %v133_v28, %v129_v27 }
  0x7d   :  { %1396 = vmatprep.subr.bf16.mxu1 %v3821_v29  ;;  %v131_v29 = vld [vmem:[%s6044_s0 + $0x110] sm:$0xff] }
  0x7f   :  { %629 = vmatpush1.bf16.msra.mxu0 %v3745_v30  ;;  %v3778_v30 = vld [vmem:[%s6045_s1 + $0x184] ss:$8 sps:$4 sm:$0xff]  }
  0x80   :  { %630 = vmatprep.subr.bf16.mxu0 %v3746_v31  ;;  %v138_v31 = vld [vmem:[%s6044_s0 + $0x148] sm:$0xff] }
  0x83   :  { %631 = vmatpush1.bf16.msra.mxu0 %v3748_v32  ;;  %v142_v32 = vld [vmem:[%s6044_s0 + $0x168] sm:$0xff] }
  0x84   :  { %632 = vmatprep.subr.bf16.mxu0 %v3749_v33  ;;  %v3823_v33 = vld [vmem:[%s6049_s5 + $0x100] ss:$16 sps:$4 sm:$0xff]   ;;  %v182_v38 = vpack.c.bf16 %v142_v32, %v138_v31  ;;  %v140_v31 = vld [vmem:[%s6044_s0 + $0x158] sm:$0xff] }
  0x85   :  { %1397 = vmatpush1.bf16.msra.mxu1 %v3823_v33  ;;  %v144_v32 = vld [vmem:[%s6044_s0 + $0x178] sm:$0xff] }
  0x87   :  { %633 = vmatpush1.bf16.msra.mxu0 %v3751_v34  ;;  %v3776_v34 = vld [vmem:[%s6045_s1 + $0x180] ss:$8 sps:$4 sm:$0xff]  }
  0x88   :  { %715 = vmatprep.subr.bf16.mxu0 %v3754_v37  ;;  %v3824_v37 = vld [vmem:[%s6049_s5 + $0x124] ss:$16 sps:$4 sm:$0xff]  }
  0x89   :  { %1398 = vmatprep.subr.bf16.mxu1 %v3824_v37  ;;  %v148_v37 = vld [vmem:[%s6044_s0 + $0x198] sm:$0xff] }
  0x8a   :  { %635 = vmatmul.mubr.bf16.vlgmr.msra.gmra.mrb[0].mxu0 %v161_v40  ;;  %v3779_v40 = vld [vmem:[%s6045_s1 + $0x190] ss:$8 sps:$4 sm:$0xff]   ;;  %1399 = vmatpush1.bf16.msra.mxu1 %v3826_v39 }
  0x8b   :  { %716 = vmatpush1.bf16.msra.mxu0 %v3752_v41  ;;  %644 = vmatprep.mubr.bf16.mxu0 %v166_v43  ;;  %v137_v41 = vld [vmem:[%s6044_s0 + $0x140] sm:$0xff] }
  0x8c   :  { %717 = vmatprep.subr.bf16.mxu0 %v3757_v42  ;;  %v141_v42 = vld [vmem:[%s6044_s0 + $0x160] sm:$0xff] }
  0x8d   :  { %v3784_v43 = vld [vmem:[%s6045_s1 + $0x1a4] ss:$8 sps:$4 sm:$0xff]  }
  0x8f   :  { %718 = vmatpush1.bf16.msra.mxu0 %v3755_v47  ;;  %v181_v47 = vpack.c.bf16 %v141_v42, %v137_v41  ;;  %v147_v41 = vld [vmem:[%s6044_s0 + $0x190] sm:$0xff] }
  0x90   :  { %719 = vmatprep.subr.bf16.mxu0 %v3760_v50  ;;  %v3785_v50 = vld [vmem:[%s6045_s1 + $0x1b0] ss:$8 sps:$4 sm:$0xff]  }
  0x91   :  { %v151_v42 = vld [vmem:[%s6044_s0 + $0x1b0] sm:$0xff] }
  0x92   :  { %645 = vmatmul.mubr.bf16.gmra.mrb[4].mxu0 %v165_v55  ;;  %v158_v55 = vld [vmem:[%s6044_s0 + $0x1e8] sm:$0xff]  ;;  %v187_v45 = vpack.c.bf16 %v151_v42, %v147_v41 }
  0x93   :  { %720 = vmatpush1.bf16.msra.mxu0 %v3758_v57  ;;  %654 = vmatprep.mubr.bf16.mxu0 %v170_v59  ;;  %v185_v57 = vpack.c.bf16 %v149_v52, %v145_v51  ;;  %v190_v59 = vpack.c.bf16 %v158_v55, %v154_v54  ;;  %v3829_v51 = vld [vmem:[%s6049_s5 + $0x140] ss:$16 sps:$4 sm:$0xff]   ;;  %v3830_v52 = vld [vmem:[%s6049_s5 + $0x164] ss:$16 sps:$4 sm:$0xff]  }
  0x94   :  { %721 = vmatprep.subr.bf16.mxu0 %v3763_v58  ;;  %v3793_v58 = vld [vmem:[%s6045_s1 + $0x1d4] ss:$8 sps:$4 sm:$0xff]   ;;  %v3835_v55 = vld [vmem:[%s6049_s5 + $0x180] ss:$16 sps:$4 sm:$0xff]  }
  0x95   :  { %v3833_v54 = vld [vmem:[%s6049_s5 + $0x184] ss:$16 sps:$4 sm:$0xff]  }
  0x97   :  { %722 = vmatpush1.bf16.msra.mxu0 %v3761_v61  ;;  %v157_v61 = vld [vmem:[%s6044_s0 + $0x1e0] sm:$0xff] }
  0x98   :  { %723 = vmatprep.subr.bf16.mxu0 %v3766_v0  ;;  %v100_v0 = vld [vmem:[%s6044_s0 + $0x18] sm:$0xff]  ;;  %v189_v3 = vpack.c.bf16 %v157_v61, %v153_v60  ;;  %v3842_v60 = vld [vmem:[%s6049_s5 + $0x1e4] ss:$16 sps:$4 sm:$0xff]   ;;  %v3844_v61 = vld [vmem:[%s6049_s5 + $0x1e0] ss:$16 sps:$4 sm:$0xff]  }
  0x99   :  { %v164_v4 = vpack.c.bf16 %v104_v1, %v100_v0 }
  0x9a   :  { %655 = vmatmul.mubr.bf16.gmra.mrb[8].mxu0 %v169_v7  ;;  %v108_v7 = vld [vmem:[%s6044_s0 + $0x58] sm:$0xff] }
  0x9b   :  { %724 = vmatpush1.bf16.msra.mxu0 %v3764_v6  ;;  %664 = vmatprep.mubr.bf16.mxu0 %v174_v10  ;;  %v103_v6 = vld [vmem:[%s6044_s0 + $0x30] sm:$0xff] }
  0x9c   :  { %725 = vmatprep.subr.bf16.mxu0 %v3769_v8  ;;  %v112_v8 = vld [vmem:[%s6044_s0 + $0x78] sm:$0xff]  ;;  %v163_v9 = vpack.c.bf16 %v103_v6, %v99_v5  ;;  %v860_v5 = vld [vmem:[%s6047_s3] sm:$0x3] }
  0x9d   :  { %v168_v10 = vpack.c.bf16 %v112_v8, %v108_v7  ;;  %v904_v8 = vld [vmem:[#allocation5] sm:$0x3] }
  0x9f   :  { %726 = vmatpush1.bf16.msra.mxu0 %v3767_v12  ;;  %v111_v12 = vld [vmem:[%s6044_s0 + $0x70] sm:$0xff] }
  0xa0   :  { %727 = vmatprep.subr.bf16.mxu0 %v3772_v16  ;;  %v167_v15 = vpack.c.bf16 %v111_v12, %v107_v11  ;;  %v172_v16 = vpack.c.bf16 %v120_v14, %v116_v13 }
  0xa2   :  { %665 = vmatmul.mubr.bf16.gmra.mrb[12].mxu0 %v173_v21  ;;  %v171_v21 = vpack.c.bf16 %v119_v18, %v115_v17 }
  0xa3   :  { %728 = vmatpush1.bf16.msra.mxu0 %v3770_v20  ;;  %674 = vmatprep.mubr.bf16.mxu0 %v178_v24  ;;  %v128_v20 = vld [vmem:[%s6044_s0 + $0xf8] sm:$0xff]  ;;  %v127_v24 = vld [vmem:[%s6044_s0 + $0xf0] sm:$0xff] }
  0xa4   :  { %729 = vmatprep.subr.bf16.mxu0 %v3775_v22  ;;  %v176_v22 = vpack.c.bf16 %v128_v20, %v124_v19  ;;  %v175_v27 = vpack.c.bf16 %v127_v24, %v123_v23 }
  0xa7   :  { %730 = vmatpush1.bf16.msra.mxu0 %v3773_v26  ;;  %v136_v26 = vld [vmem:[%s6044_s0 + $0x138] sm:$0xff] }
  0xa8   :  { %731 = vmatprep.subr.bf16.mxu0 %v3778_v30  ;;  %v180_v28 = vpack.c.bf16 %v136_v26, %v132_v25  ;;  %v135_v30 = vld [vmem:[%s6044_s0 + $0x130] sm:$0xff] }
  0xa9   :  { %v179_v33 = vpack.c.bf16 %v135_v30, %v131_v29 }
  0xaa   :  { %675 = vmatmul.mubr.bf16.gmra.mrb[16].mxu0 %v177_v35  ;;  %v139_v35 = vld [vmem:[%s6044_s0 + $0x150] sm:$0xff] }
  0xab   :  { %732 = vmatpush1.bf16.msra.mxu0 %v3776_v34  ;;  %684 = vmatprep.mubr.bf16.mxu0 %v182_v38  ;;  %v184_v34 = vpack.c.bf16 %v144_v32, %v140_v31  ;;  %v152_v38 = vld [vmem:[%s6044_s0 + $0x1b8] sm:$0xff] }
  0xac   :  { %733 = vmatprep.subr.bf16.mxu0 %v3781_v36  ;;  %v143_v36 = vld [vmem:[%s6044_s0 + $0x170] sm:$0xff] }
  0xad   :  { %v183_v39 = vpack.c.bf16 %v143_v36, %v139_v35 }
  0xaf   :  { %734 = vmatpush1.bf16.msra.mxu0 %v3779_v40  ;;  %v188_v40 = vpack.c.bf16 %v152_v38, %v148_v37 }
  0xb0   :  { %735 = vmatprep.subr.bf16.mxu0 %v3784_v43  ;;  %v156_v43 = vld [vmem:[%s6044_s0 + $0x1d8] sm:$0xff] }
  0xb2   :  { %685 = vmatmul.mubr.bf16.gmra.mrb[20].mxu0 %v181_v47  ;;  %v155_v47 = vld [vmem:[%s6044_s0 + $0x1d0] sm:$0xff] }
  0xb3   :  { %736 = vmatpush1.bf16.msra.mxu0 %v3782_v46  ;;  %694 = vmatprep.mubr.bf16.mxu0 %v186_v49  ;;  %v192_v46 = vpack.c.bf16 %v160_v44, %v156_v43 }
  0xb4   :  { %737 = vmatprep.subr.bf16.mxu0 %v3787_v48  ;;  %v159_v48 = vld [vmem:[%s6044_s0 + $0x1f0] sm:$0xff] }
  0xb5   :  { %v191_v49 = vpack.c.bf16 %v159_v48, %v155_v47 }
  0xb7   :  { %738 = vmatpush1.bf16.msra.mxu0 %v3785_v50  ;;  %v3827_v50 = vld [vmem:[%s6049_s5 + $0x144] ss:$16 sps:$4 sm:$0xff]  }
  0xb8   :  { %739 = vmatprep.subr.bf16.mxu0 %v3790_v53  ;;  %1400 = vmatprep.subr.bf16.mxu1 %v3827_v50  ;;  %v3832_v53 = vld [vmem:[%s6049_s5 + $0x160] ss:$16 sps:$4 sm:$0xff]  }
  0xb9   :  { %1401 = vmatpush1.bf16.msra.mxu1 %v3829_v51 }
  0xba   :  { %695 = vmatmul.mubr.bf16.gmra.mrb[24].mxu0 %v185_v57  ;;  %1402 = vmatprep.subr.bf16.mxu1 %v3830_v52  ;;  %v3838_v57 = vld [vmem:[%s6049_s5 + $0x1a0] ss:$16 sps:$4 sm:$0xff]  }
  0xbb   :  { %740 = vmatpush1.bf16.msra.mxu0 %v3788_v56  ;;  %704 = vmatprep.mubr.bf16.mxu0 %v190_v59  ;;  %v3836_v56 = vld [vmem:[%s6049_s5 + $0x1a4] ss:$16 sps:$4 sm:$0xff]   ;;  %v3841_v59 = vld [vmem:[%s6049_s5 + $0x1c0] ss:$16 sps:$4 sm:$0xff]  }
  0xbc   :  { %741 = vmatprep.subr.bf16.mxu0 %v3793_v58  ;;  %v3839_v58 = vld [vmem:[%s6049_s5 + $0x1c4] ss:$16 sps:$4 sm:$0xff]  }
  0xbd   :  { %1403 = vmatpush1.bf16.msra.mxu1 %v3832_v53 }
  0xbe   :  { %1404 = vmatprep.subr.bf16.mxu1 %v3833_v54 }
  0xbf   :  { %742 = vmatpush1.bf16.msra.mxu0 %v3791_v62  ;;  %v3847_v62 = vld [vmem:[%s6049_s5 + $0xc] ss:$16 sps:$4 sm:$0xff]  }
  0xc0   :  { %743 = vmatprep.subr.bf16.mxu0 %v3796_v63  ;;  %v257_v63 = vlaneseq }
  0xc1   :  { %1405 = vmatpush1.bf16.msra.mxu1 %v3835_v55 }
  0xc2   :  { %705 = vmatmul.mubr.bf16.gmra.mrb[28].mxu0 %v189_v3  ;;  %1406 = vmatprep.subr.bf16.mxu1 %v3836_v56  ;;  %v4974_v0 = vshrl.u32 %v257_v63, 7 }
  0xc3   :  { %744 = vmatpush1.bf16.msra.mxu0 %v3794_v2  ;;  %3451 = vmatprep.mubr.msk.bf16.mxu0 %vm577_vm0, %v164_v4  ;;  %v255_v2 = vld [vmem:[#allocation2] sm:$0x3] }
  0xc4   :  { %6080 = vst [vmem:[#allocation15_spill] sm:$0xff] %v4974_v0  ;;  %v4977_v1 = vsub.s32 0, %v4974_v0  ;;  %v4980_v3 = vsub.s32 1, %v4974_v0 }
  0xc5   :  { %1407 = vmatpush1.bf16.msra.mxu1 %v3838_v57 }
  0xc6   :  { %1408 = vmatprep.subr.bf16.mxu1 %v3839_v58  ;;  %6081 = vst [vmem:[#allocation16_spill] sm:$0xff] %v4977_v1  ;;  %6082 = vst [vmem:[#allocation17_spill] sm:$0xff] %v4980_v3  ;;  %v4983_v4 = vrot.slane %v255_v2, %v4977_v1  ;;  %v4989_v6 = vrot.slane %v255_v2, %v4980_v3  ;;  %v4997_v13 = vrot.slane %v860_v5, %v4980_v3 }
  0xc7   :  { %v5004_v20 = vrot.slane %v904_v8, %v4980_v3 }
  0xc9   :  { %1409 = vmatpush1.bf16.msra.mxu1 %v3841_v59 }
  0xca   :  { %748 = vmatmul.mubr.bf16.vlgmr.msra.gmra.mrb[0].mxu0 %v163_v9  ;;  %1410 = vmatprep.subr.bf16.mxu1 %v3842_v60 }
  0xcb   :  { %3452 = vmatprep.mubr.msk.bf16.mxu0 %vm577_vm0, %v168_v10  ;;  %v4993_v10 = vrot.slane %v860_v5, %v4977_v1 }
  0xcd   :  { %1411 = vmatpush1.bf16.msra.mxu1 %v3844_v61 }
  0xce   :  { %1493 = vmatprep.subr.bf16.mxu1 %v3847_v62 }
  0xd2   :  { %758 = vmatmul.mubr.bf16.gmra.mrb[4].mxu0 %v167_v15 }
  0xd3   :  { %3453 = vmatprep.mubr.msk.bf16.mxu0 %vm577_vm0, %v172_v16  ;;  %v5000_v16 = vrot.slane %v904_v8, %v4977_v1 }
  0xda   :  { %768 = vmatmul.mubr.bf16.gmra.mrb[8].mxu0 %v171_v21 }
  0xdb   :  { %3454 = vmatprep.mubr.msk.bf16.mxu0 %vm577_vm0, %v176_v22 }
  0xe2   :  { %778 = vmatmul.mubr.bf16.gmra.mrb[12].mxu0 %v175_v27 }
  0xe3   :  { %3455 = vmatprep.mubr.msk.bf16.mxu0 %vm577_vm0, %v180_v28 }
  0xea   :  { %788 = vmatmul.mubr.bf16.gmra.mrb[16].mxu0 %v179_v33 }
  0xeb   :  { %3456 = vmatprep.mubr.msk.bf16.mxu0 %vm577_vm0, %v184_v34 }
  0xf2   :  { %798 = vmatmul.mubr.bf16.gmra.mrb[20].mxu0 %v183_v39 }
  0xf3   :  { %3457 = vmatprep.mubr.msk.bf16.mxu0 %vm577_vm0, %v188_v40 }
  0xfa   :  { %808 = vmatmul.mubr.bf16.gmra.mrb[24].mxu0 %v187_v45 }
  0xfb   :  { %3458 = vmatprep.mubr.msk.bf16.mxu0 %vm577_vm0, %v192_v46 }
 0x102   :  { %818 = vmatmul.mubr.bf16.gmra.mrb[28].mxu0 %v191_v49 }
 0x19d   :  { %v749_v7 = vpop.f32.mrb[0].mxu0 }
 0x19e   :  { %v3632_v9 = vadd.f32 %v749_v7, %v4983_v4  ;;  %v751_v11 = vpop.f32.mrb[1].mxu0 }
 0x19f   :  { %v3633_v12 = vadd.f32 %v751_v11, %v4989_v6  ;;  %v753_v14 = vpop.f32.mrb[2].mxu0 }
 0x1a0   :  { %v828_v15 = vmax.f32 %v3632_v9, 0.0  ;;  %v3634_v17 = vadd.f32 %v753_v14, %v4983_v4  ;;  %v755_v18 = vpop.f32.mrb[3].mxu0 }
 0x1a1   :  { %v829_v19 = vmax.f32 %v3633_v12, 0.0  ;;  %v3635_v21 = vadd.f32 %v755_v18, %v4989_v6  ;;  %v3845_v18 = vld [vmem:[%s6049_s5 + $0x8] ss:$16 sps:$4 sm:$0xff]  }
 0x1a2   :  { %v872_v22 = vmul.f32 %v4993_v10, %v828_v15  ;;  %v830_v23 = vmax.f32 %v3634_v17, 0.0 }
 0x1a3   :  { %v873_v24 = vmul.f32 %v4997_v13, %v829_v19  ;;  %v831_v25 = vmax.f32 %v3635_v21, 0.0 }
 0x1a4   :  { %v916_v26 = vadd.f32 %v5000_v16, %v872_v22  ;;  %v874_v27 = vmul.f32 %v4993_v10, %v830_v23  ;;  %v3850_v23 = vld [vmem:[%s6049_s5 + $0x2c] ss:$16 sps:$4 sm:$0xff]  }
 0x1a5   :  { %v917_v28 = vadd.f32 %v5004_v20, %v873_v24  ;;  %v875_v29 = vmul.f32 %v4997_v13, %v831_v25  ;;  %v759_v30 = vpop.f32.mrb[4].mxu0 }
 0x1a6   :  { %3955 = vtanh.f32 %v916_v26  ;;  %v918_v31 = vadd.f32 %v5000_v16, %v874_v27  ;;  %v3636_v32 = vadd.f32 %v759_v30, %v4983_v4  ;;  %v761_v33 = vpop.f32.mrb[5].mxu0 }
 0x1a7   :  { %3957 = vtanh.f32 %v917_v28  ;;  %v919_v34 = vadd.f32 %v5004_v20, %v875_v29  ;;  %v3637_v35 = vadd.f32 %v761_v33, %v4989_v6  ;;  %v763_v36 = vpop.f32.mrb[6].mxu0 }
 0x1a8   :  { %3959 = vtanh.f32 %v918_v31  ;;  %v832_v37 = vmax.f32 %v3636_v32, 0.0  ;;  %v3638_v38 = vadd.f32 %v763_v36, %v4983_v4  ;;  %v765_v39 = vpop.f32.mrb[7].mxu0 }
 0x1a9   :  { %3961 = vtanh.f32 %v919_v34  ;;  %v833_v40 = vmax.f32 %v3637_v35, 0.0  ;;  %v3639_v41 = vadd.f32 %v765_v39, %v4989_v6  ;;  %v3848_v34 = vld [vmem:[%s6049_s5 + $0x28] ss:$16 sps:$4 sm:$0xff]  }
 0x1aa   :  { %v876_v42 = vmul.f32 %v4993_v10, %v832_v37  ;;  %v834_v43 = vmax.f32 %v3638_v38, 0.0  ;;  %v3853_v38 = vld [vmem:[%s6049_s5 + $0x4c] ss:$16 sps:$4 sm:$0xff]  }
 0x1ab   :  { %v877_v44 = vmul.f32 %v4997_v13, %v833_v40  ;;  %v835_v45 = vmax.f32 %v3639_v41, 0.0 }
 0x1ac   :  { %v920_v46 = vadd.f32 %v5000_v16, %v876_v42  ;;  %v878_v47 = vmul.f32 %v4993_v10, %v834_v43 }
 0x1ad   :  { %v921_v48 = vadd.f32 %v5004_v20, %v877_v44  ;;  %v879_v49 = vmul.f32 %v4997_v13, %v835_v45  ;;  %v769_v50 = vpop.f32.mrb[8].mxu0 }
 0x1ae   :  { %3963 = vtanh.f32 %v920_v46  ;;  %v922_v51 = vadd.f32 %v5000_v16, %v878_v47  ;;  %v3640_v52 = vadd.f32 %v769_v50, %v4983_v4  ;;  %v771_v53 = vpop.f32.mrb[9].mxu0 }
 0x1af   :  { %3965 = vtanh.f32 %v921_v48  ;;  %v923_v54 = vadd.f32 %v5004_v20, %v879_v49  ;;  %v3641_v55 = vadd.f32 %v771_v53, %v4989_v6  ;;  %v773_v56 = vpop.f32.mrb[10].mxu0  ;;  %v3851_v49 = vld [vmem:[%s6049_s5 + $0x48] ss:$16 sps:$4 sm:$0xff]   ;;  %v3856_v53 = vld [vmem:[%s6049_s5 + $0x6c] ss:$16 sps:$4 sm:$0xff]  }
 0x1b0   :  { %v3956_v57 = vpop.eup %3955  ;;  %3967 = vtanh.f32 %v922_v51  ;;  %v836_v58 = vmax.f32 %v3640_v52, 0.0  ;;  %v3642_v59 = vadd.f32 %v773_v56, %v4983_v4  ;;  %v775_v60 = vpop.f32.mrb[11].mxu0 }
 0x1b1   :  { %v3958_v61 = vpop.eup %3957  ;;  %3969 = vtanh.f32 %v923_v54  ;;  %v837_v62 = vmax.f32 %v3641_v55, 0.0  ;;  %v3643_v63 = vadd.f32 %v775_v60, %v4989_v6 }
 0x1b2   :  { %v3960_v2 = vpop.eup %3959  ;;  %v880_v5 = vmul.f32 %v4993_v10, %v836_v58  ;;  %v838_v7 = vmax.f32 %v3642_v59, 0.0 }
 0x1b3   :  { %v3962_v8 = vpop.eup %3961  ;;  %v881_v9 = vmul.f32 %v4997_v13, %v837_v62  ;;  %v839_v11 = vmax.f32 %v3643_v63, 0.0  ;;  %v5033_v12 = vpack.c.bf16 %v3960_v2, %v3956_v57  ;;  %v3854_v2 = vld [vmem:[%s6049_s5 + $0x68] ss:$16 sps:$4 sm:$0xff]  }
 0x1b4   :  { %v924_v14 = vadd.f32 %v5000_v16, %v880_v5  ;;  %v882_v15 = vmul.f32 %v4993_v10, %v838_v7  ;;  %v5037_v17 = vpack.c.bf16 %v3962_v8, %v3958_v61 }
 0x1b5   :  { %v925_v19 = vadd.f32 %v5004_v20, %v881_v9  ;;  %v883_v21 = vmul.f32 %v4997_v13, %v839_v11  ;;  %v779_v22 = vpop.f32.mrb[12].mxu0  ;;  %v3859_v9 = vld [vmem:[%s6049_s5 + $0x8c] ss:$16 sps:$4 sm:$0xff]  }
 0x1b6   :  { %3971 = vtanh.f32 %v924_v14  ;;  %v926_v24 = vadd.f32 %v5000_v16, %v882_v15  ;;  %v3644_v25 = vadd.f32 %v779_v22, %v4983_v4  ;;  %v781_v26 = vpop.f32.mrb[13].mxu0  ;;  %1412 = vmatprep.mubr.bf16.mxu1 %v5037_v17 }
 0x1b7   :  { %3973 = vtanh.f32 %v925_v19  ;;  %v927_v27 = vadd.f32 %v5004_v20, %v883_v21  ;;  %v3645_v28 = vadd.f32 %v781_v26, %v4989_v6  ;;  %v783_v29 = vpop.f32.mrb[14].mxu0  ;;  %1413 = vmatmul.mubr.bf16.vlgmr.msra.gmra.mrb[0].mxu1 %v5033_v12  ;;  %v3857_v26 = vld [vmem:[%s6049_s5 + $0x88] ss:$16 sps:$4 sm:$0xff]  }
 0x1b8   :  { %v3964_v30 = vpop.eup %3963  ;;  %3975 = vtanh.f32 %v926_v24  ;;  %v840_v31 = vmax.f32 %v3644_v25, 0.0  ;;  %v3646_v32 = vadd.f32 %v783_v29, %v4983_v4  ;;  %v785_v33 = vpop.f32.mrb[15].mxu0  ;;  %1494 = vmatpush1.bf16.msra.mxu1 %v3845_v18 }
 0x1b9   :  { %v3966_v35 = vpop.eup %3965  ;;  %3977 = vtanh.f32 %v927_v27  ;;  %v841_v36 = vmax.f32 %v3645_v28, 0.0  ;;  %v3647_v37 = vadd.f32 %v785_v33, %v4989_v6  ;;  %1495 = vmatprep.subr.bf16.mxu1 %v3850_v23 }
 0x1ba   :  { %v3968_v39 = vpop.eup %3967  ;;  %v884_v40 = vmul.f32 %v4993_v10, %v840_v31  ;;  %v842_v41 = vmax.f32 %v3646_v32, 0.0 }
 0x1bb   :  { %v3970_v42 = vpop.eup %3969  ;;  %v885_v43 = vmul.f32 %v4997_v13, %v841_v36  ;;  %v843_v44 = vmax.f32 %v3647_v37, 0.0  ;;  %v5063_v45 = vpack.c.bf16 %v3968_v39, %v3964_v30  ;;  %v3862_v30 = vld [vmem:[%s6049_s5 + $0xac] ss:$16 sps:$4 sm:$0xff]  }
 0x1bc   :  { %v928_v46 = vadd.f32 %v5000_v16, %v884_v40  ;;  %v886_v47 = vmul.f32 %v4993_v10, %v842_v41  ;;  %1496 = vmatpush1.bf16.msra.mxu1 %v3848_v34  ;;  %v5067_v48 = vpack.c.bf16 %v3970_v42, %v3966_v35  ;;  %v3860_v41 = vld [vmem:[%s6049_s5 + $0xa8] ss:$16 sps:$4 sm:$0xff]  }
 0x1bd   :  { %v929_v50 = vadd.f32 %v5004_v20, %v885_v43  ;;  %v887_v51 = vmul.f32 %v4997_v13, %v843_v44  ;;  %v789_v52 = vpop.f32.mrb[16].mxu0  ;;  %1497 = vmatprep.subr.bf16.mxu1 %v3853_v38 }
 0x1be   :  { %3979 = vtanh.f32 %v928_v46  ;;  %v930_v54 = vadd.f32 %v5000_v16, %v886_v47  ;;  %v3648_v55 = vadd.f32 %v789_v52, %v4983_v4  ;;  %v791_v56 = vpop.f32.mrb[17].mxu0  ;;  %1422 = vmatprep.mubr.bf16.mxu1 %v5067_v48  ;;  %v3865_v46 = vld [vmem:[%s6049_s5 + $0xcc] ss:$16 sps:$4 sm:$0xff]  }
 0x1bf   :  { %3981 = vtanh.f32 %v929_v50  ;;  %v931_v57 = vadd.f32 %v5004_v20, %v887_v51  ;;  %v3649_v58 = vadd.f32 %v791_v56, %v4989_v6  ;;  %v793_v59 = vpop.f32.mrb[18].mxu0  ;;  %1423 = vmatmul.mubr.bf16.gmra.mrb[4].mxu1 %v5063_v45 }
 0x1c0   :  { %v3972_v60 = vpop.eup %3971  ;;  %3983 = vtanh.f32 %v930_v54  ;;  %v844_v61 = vmax.f32 %v3648_v55, 0.0  ;;  %v3650_v62 = vadd.f32 %v793_v59, %v4983_v4  ;;  %v795_v63 = vpop.f32.mrb[19].mxu0  ;;  %1498 = vmatpush1.bf16.msra.mxu1 %v3851_v49 }
 0x1c1   :  { %v3974_v5 = vpop.eup %3973  ;;  %3985 = vtanh.f32 %v931_v57  ;;  %v845_v7 = vmax.f32 %v3649_v58, 0.0  ;;  %v3651_v8 = vadd.f32 %v795_v63, %v4989_v6  ;;  %1499 = vmatprep.subr.bf16.mxu1 %v3856_v53  ;;  %v3863_v58 = vld [vmem:[%s6049_s5 + $0xc8] ss:$16 sps:$4 sm:$0xff]  }
 0x1c2   :  { %v3976_v11 = vpop.eup %3975  ;;  %v888_v14 = vmul.f32 %v4993_v10, %v844_v61  ;;  %v846_v15 = vmax.f32 %v3650_v62, 0.0  ;;  %v3868_v62 = vld [vmem:[%s6049_s5 + $0xec] ss:$16 sps:$4 sm:$0xff]  }
 0x1c3   :  { %v3978_v18 = vpop.eup %3977  ;;  %v889_v19 = vmul.f32 %v4997_v13, %v845_v7  ;;  %v847_v21 = vmax.f32 %v3651_v8, 0.0  ;;  %v5093_v22 = vpack.c.bf16 %v3976_v11, %v3972_v60 }
 0x1c4   :  { %v932_v23 = vadd.f32 %v5000_v16, %v888_v14  ;;  %v890_v24 = vmul.f32 %v4993_v10, %v846_v15  ;;  %1500 = vmatpush1.bf16.msra.mxu1 %v3854_v2  ;;  %v5097_v25 = vpack.c.bf16 %v3978_v18, %v3974_v5 }
 0x1c5   :  { %v933_v27 = vadd.f32 %v5004_v20, %v889_v19  ;;  %v891_v28 = vmul.f32 %v4997_v13, %v847_v21  ;;  %v799_v29 = vpop.f32.mrb[20].mxu0  ;;  %1501 = vmatprep.subr.bf16.mxu1 %v3859_v9  ;;  %v3866_v19 = vld [vmem:[%s6049_s5 + $0xe8] ss:$16 sps:$4 sm:$0xff]  }
 0x1c6   :  { %3987 = vtanh.f32 %v932_v23  ;;  %v934_v31 = vadd.f32 %v5000_v16, %v890_v24  ;;  %v3652_v32 = vadd.f32 %v799_v29, %v4983_v4  ;;  %v801_v33 = vpop.f32.mrb[21].mxu0  ;;  %1432 = vmatprep.mubr.bf16.mxu1 %v5097_v25 }
 0x1c7   :  { %3989 = vtanh.f32 %v933_v27  ;;  %v935_v34 = vadd.f32 %v5004_v20, %v891_v28  ;;  %v3653_v35 = vadd.f32 %v801_v33, %v4989_v6  ;;  %v803_v36 = vpop.f32.mrb[22].mxu0  ;;  %1433 = vmatmul.mubr.bf16.gmra.mrb[8].mxu1 %v5093_v22 }
 0x1c8   :  { %v3980_v37 = vpop.eup %3979  ;;  %3991 = vtanh.f32 %v934_v31  ;;  %v848_v38 = vmax.f32 %v3652_v32, 0.0  ;;  %v3654_v39 = vadd.f32 %v803_v36, %v4983_v4  ;;  %v805_v40 = vpop.f32.mrb[23].mxu0  ;;  %1502 = vmatpush1.bf16.msra.mxu1 %v3857_v26  ;;  %v3871_v26 = vld [vmem:[%s6049_s5 + $0x10c] ss:$16 sps:$4 sm:$0xff]  }
 0x1c9   :  { %v3982_v42 = vpop.eup %3981  ;;  %3993 = vtanh.f32 %v935_v34  ;;  %v849_v43 = vmax.f32 %v3653_v35, 0.0  ;;  %v3655_v44 = vadd.f32 %v805_v40, %v4989_v6  ;;  %1503 = vmatprep.subr.bf16.mxu1 %v3862_v30 }
 0x1ca   :  { %v3984_v47 = vpop.eup %3983  ;;  %v892_v49 = vmul.f32 %v4993_v10, %v848_v38  ;;  %v850_v50 = vmax.f32 %v3654_v39, 0.0 }
 0x1cb   :  { %v3986_v51 = vpop.eup %3985  ;;  %v893_v52 = vmul.f32 %v4997_v13, %v849_v43  ;;  %v851_v53 = vmax.f32 %v3655_v44, 0.0  ;;  %v5123_v54 = vpack.c.bf16 %v3984_v47, %v3980_v37  ;;  %v3869_v37 = vld [vmem:[%s6049_s5 + $0x108] ss:$16 sps:$4 sm:$0xff]  }
 0x1cc   :  { %v936_v55 = vadd.f32 %v5000_v16, %v892_v49  ;;  %v894_v56 = vmul.f32 %v4993_v10, %v850_v50  ;;  %1504 = vmatpush1.bf16.msra.mxu1 %v3860_v41  ;;  %v5127_v57 = vpack.c.bf16 %v3986_v51, %v3982_v42  ;;  %v3874_v41 = vld [vmem:[%s6049_s5 + $0x12c] ss:$16 sps:$4 sm:$0xff]  }
 0x1cd   :  { %v937_v59 = vadd.f32 %v5004_v20, %v893_v52  ;;  %v895_v60 = vmul.f32 %v4997_v13, %v851_v53  ;;  %v809_v61 = vpop.f32.mrb[24].mxu0  ;;  %1505 = vmatprep.subr.bf16.mxu1 %v3865_v46 }
 0x1ce   :  { %3995 = vtanh.f32 %v936_v55  ;;  %v938_v63 = vadd.f32 %v5000_v16, %v894_v56  ;;  %v3656_v2 = vadd.f32 %v809_v61, %v4983_v4  ;;  %v811_v5 = vpop.f32.mrb[25].mxu0  ;;  %1442 = vmatprep.mubr.bf16.mxu1 %v5127_v57  ;;  %v3872_v55 = vld [vmem:[%s6049_s5 + $0x128] ss:$16 sps:$4 sm:$0xff]  }
 0x1cf   :  { %3997 = vtanh.f32 %v937_v59  ;;  %v939_v7 = vadd.f32 %v5004_v20, %v895_v60  ;;  %v3657_v8 = vadd.f32 %v811_v5, %v4989_v6  ;;  %v813_v9 = vpop.f32.mrb[26].mxu0  ;;  %1443 = vmatmul.mubr.bf16.gmra.mrb[12].mxu1 %v5123_v54  ;;  %v3877_v60 = vld [vmem:[%s6049_s5 + $0x14c] ss:$16 sps:$4 sm:$0xff]  }
 0x1d0   :  { %v3988_v11 = vpop.eup %3987  ;;  %3999 = vtanh.f32 %v938_v63  ;;  %v852_v14 = vmax.f32 %v3656_v2, 0.0  ;;  %v3658_v15 = vadd.f32 %v813_v9, %v4983_v4  ;;  %v815_v18 = vpop.f32.mrb[27].mxu0  ;;  %1506 = vmatpush1.bf16.msra.mxu1 %v3863_v58 }
 0x1d1   :  { %v3990_v21 = vpop.eup %3989  ;;  %4001 = vtanh.f32 %v939_v7  ;;  %v853_v23 = vmax.f32 %v3657_v8, 0.0  ;;  %v3659_v24 = vadd.f32 %v815_v18, %v4989_v6  ;;  %1507 = vmatprep.subr.bf16.mxu1 %v3868_v62  ;;  %v3880_v18 = vld [vmem:[%s6049_s5 + $0x16c] ss:$16 sps:$4 sm:$0xff]  }
 0x1d2   :  { %v3992_v27 = vpop.eup %3991  ;;  %v896_v28 = vmul.f32 %v4993_v10, %v852_v14  ;;  %v854_v29 = vmax.f32 %v3658_v15, 0.0 }
 0x1d3   :  { %v3994_v30 = vpop.eup %3993  ;;  %v897_v31 = vmul.f32 %v4997_v13, %v853_v23  ;;  %v855_v32 = vmax.f32 %v3659_v24, 0.0  ;;  %v5153_v33 = vpack.c.bf16 %v3992_v27, %v3988_v11  ;;  %v3875_v11 = vld [vmem:[%s6049_s5 + $0x148] ss:$16 sps:$4 sm:$0xff]  }
 0x1d4   :  { %v940_v34 = vadd.f32 %v5000_v16, %v896_v28  ;;  %v898_v35 = vmul.f32 %v4993_v10, %v854_v29  ;;  %1508 = vmatpush1.bf16.msra.mxu1 %v3866_v19  ;;  %v5157_v36 = vpack.c.bf16 %v3994_v30, %v3990_v21  ;;  %v3881_v28 = vld [vmem:[%s6049_s5 + $0x188] ss:$16 sps:$4 sm:$0xff]   ;;  %v3886_v29 = vld [vmem:[%s6049_s5 + $0x1ac] ss:$16 sps:$4 sm:$0xff]  }
 0x1d5   :  { %v941_v38 = vadd.f32 %v5004_v20, %v897_v31  ;;  %v899_v39 = vmul.f32 %v4997_v13, %v855_v32  ;;  %v819_v40 = vpop.f32.mrb[28].mxu0  ;;  %1509 = vmatprep.subr.bf16.mxu1 %v3871_v26  ;;  %v3884_v31 = vld [vmem:[%s6049_s5 + $0x1a8] ss:$16 sps:$4 sm:$0xff]  }
 0x1d6   :  { %4003 = vtanh.f32 %v940_v34  ;;  %v942_v42 = vadd.f32 %v5000_v16, %v898_v35  ;;  %v3660_v43 = vadd.f32 %v819_v40, %v4983_v4  ;;  %v821_v44 = vpop.f32.mrb[29].mxu0  ;;  %1452 = vmatprep.mubr.bf16.mxu1 %v5157_v36  ;;  %v3889_v34 = vld [vmem:[%s6049_s5 + $0x1cc] ss:$16 sps:$4 sm:$0xff]   ;;  %v3887_v40 = vld [vmem:[%s6049_s5 + $0x1c8] ss:$16 sps:$4 sm:$0xff]  }
 0x1d7   :  { %4005 = vtanh.f32 %v941_v38  ;;  %v943_v46 = vadd.f32 %v5004_v20, %v899_v39  ;;  %v3661_v47 = vadd.f32 %v821_v44, %v4989_v6  ;;  %v823_v49 = vpop.f32.mrb[30].mxu0  ;;  %1453 = vmatmul.mubr.bf16.gmra.mrb[16].mxu1 %v5153_v33 }
 0x1d8   :  { %v3996_v50 = vpop.eup %3995  ;;  %4007 = vtanh.f32 %v942_v42  ;;  %v856_v51 = vmax.f32 %v3660_v43, 0.0  ;;  %v3662_v52 = vadd.f32 %v823_v49, %v4983_v4  ;;  %v825_v53 = vpop.f32.mrb[31].mxu0  ;;  %1510 = vmatpush1.bf16.msra.mxu1 %v3869_v37  ;;  %v3890_v42 = vld [vmem:[%s6049_s5 + $0x1e8] ss:$16 sps:$4 sm:$0xff]  }
 0x1d9   :  { %v3998_v56 = vpop.eup %3997  ;;  %4009 = vtanh.f32 %v943_v46  ;;  %v857_v58 = vmax.f32 %v3661_v47, 0.0  ;;  %v3663_v59 = vadd.f32 %v825_v53, %v4989_v6  ;;  %1511 = vmatprep.subr.bf16.mxu1 %v3874_v41  ;;  %v3892_v41 = vld [vmem:[%s6049_s5 + $0x1ec] ss:$16 sps:$4 sm:$0xff]  }
 0x1da   :  { %v4000_v61 = vpop.eup %3999  ;;  %v900_v62 = vmul.f32 %v4993_v10, %v856_v51  ;;  %v858_v4 = vmax.f32 %v3662_v52, 0.0 }
 0x1db   :  { %v4002_v63 = vpop.eup %4001  ;;  %v901_v2 = vmul.f32 %v4997_v13, %v857_v58  ;;  %v859_v5 = vmax.f32 %v3663_v59, 0.0  ;;  %v5183_v7 = vpack.c.bf16 %v4000_v61, %v3996_v50 }
 0x1dc   :  { %v944_v8 = vadd.f32 %v5000_v16, %v900_v62  ;;  %v902_v9 = vmul.f32 %v4993_v10, %v858_v4  ;;  %1512 = vmatpush1.bf16.msra.mxu1 %v3872_v55  ;;  %v991_v6 = vpack.c.bf16 %v4002_v63, %v3998_v56 }
 0x1dd   :  { %v945_v14 = vadd.f32 %v5004_v20, %v901_v2  ;;  %v903_v15 = vmul.f32 %v4997_v13, %v859_v5  ;;  %1513 = vmatprep.subr.bf16.mxu1 %v3877_v60  ;;  %v3878_v13 = vld [vmem:[%s6049_s5 + $0x168] ss:$16 sps:$4 sm:$0xff]  }
 0x1de   :  { %4011 = vtanh.f32 %v944_v8  ;;  %v946_v19 = vadd.f32 %v5000_v16, %v902_v9  ;;  %1462 = vmatprep.mubr.bf16.mxu1 %v991_v6  ;;  %v3883_v16 = vld [vmem:[%s6049_s5 + $0x18c] ss:$16 sps:$4 sm:$0xff]  }
 0x1df   :  { %4013 = vtanh.f32 %v945_v14  ;;  %v947_v10 = vadd.f32 %v5004_v20, %v903_v15  ;;  %1463 = vmatmul.mubr.bf16.gmra.mrb[20].mxu1 %v5183_v7 }
 0x1e0   :  { %v4004_v21 = vpop.eup %4003  ;;  %4015 = vtanh.f32 %v946_v19  ;;  %1514 = vmatpush1.bf16.msra.mxu1 %v3875_v11 }
 0x1e1   :  { %v4006_v23 = vpop.eup %4005  ;;  %4017 = vtanh.f32 %v947_v10  ;;  %1515 = vmatprep.subr.bf16.mxu1 %v3880_v18 }
 0x1e2   :  { %v4008_v24 = vpop.eup %4007 }
 0x1e3   :  { %v4010_v26 = vpop.eup %4009  ;;  %v992_v27 = vpack.c.bf16 %v4008_v24, %v4004_v21 }
 0x1e4   :  { %1516 = vmatpush1.bf16.msra.mxu1 %v3878_v13  ;;  %v993_v20 = vpack.c.bf16 %v4010_v26, %v4006_v23 }
 0x1e5   :  { %1517 = vmatprep.subr.bf16.mxu1 %v3883_v16 }
 0x1e6   :  { %1472 = vmatprep.mubr.bf16.mxu1 %v993_v20 }
 0x1e7   :  { %1473 = vmatmul.mubr.bf16.gmra.mrb[24].mxu1 %v992_v27 }
 0x1e8   :  { %v4012_v30 = vpop.eup %4011  ;;  %1518 = vmatpush1.bf16.msra.mxu1 %v3881_v28 }
 0x1e9   :  { %v4014_v32 = vpop.eup %4013  ;;  %1519 = vmatprep.subr.bf16.mxu1 %v3886_v29 }
 0x1ea   :  { %v4016_v35 = vpop.eup %4015 }
 0x1eb   :  { %v4018_v37 = vpop.eup %4017  ;;  %v994_v38 = vpack.c.bf16 %v4016_v35, %v4012_v30 }
 0x1ec   :  { %1520 = vmatpush1.bf16.msra.mxu1 %v3884_v31  ;;  %v995_v39 = vpack.c.bf16 %v4018_v37, %v4014_v32 }
 0x1ed   :  { %1521 = vmatprep.subr.bf16.mxu1 %v3889_v34 }
 0x1ee   :  { %1482 = vmatprep.mubr.bf16.mxu1 %v995_v39 }
 0x1ef   :  { %1483 = vmatmul.mubr.bf16.gmra.mrb[28].mxu1 %v994_v38 }
 0x1f0   :  { %1522 = vmatpush1.bf16.msra.mxu1 %v3887_v40  ;;  %1525 = vmatprep.mubr.bf16.mxu1 %v5037_v17 }
 0x1f1   :  { %1523 = vmatprep.subr.bf16.mxu1 %v3892_v41 }
 0x1f4   :  { %1524 = vmatpush1.bf16.msra.mxu1 %v3890_v42 }
 0x1f7   :  { %1526 = vmatmul.mubr.bf16.vlgmr.msra.gmra.mrb[32].mxu1 %v5033_v12 }
 0x1f8   :  { %1535 = vmatprep.mubr.bf16.mxu1 %v5067_v48 }
 0x1ff   :  { %1536 = vmatmul.mubr.bf16.gmra.mrb[36].mxu1 %v5063_v45 }
 0x200   :  { %1545 = vmatprep.mubr.bf16.mxu1 %v5097_v25 }
 0x207   :  { %1546 = vmatmul.mubr.bf16.gmra.mrb[40].mxu1 %v5093_v22 }
 0x208   :  { %1555 = vmatprep.mubr.bf16.mxu1 %v5127_v57 }
 0x20f   :  { %1556 = vmatmul.mubr.bf16.gmra.mrb[44].mxu1 %v5123_v54 }
 0x210   :  { %1565 = vmatprep.mubr.bf16.mxu1 %v5157_v36 }
 0x217   :  { %1566 = vmatmul.mubr.bf16.gmra.mrb[48].mxu1 %v5153_v33 }
 0x218   :  { %1575 = vmatprep.mubr.bf16.mxu1 %v991_v6 }
 0x21f   :  { %1576 = vmatmul.mubr.bf16.gmra.mrb[52].mxu1 %v5183_v7 }
 0x220   :  { %1585 = vmatprep.mubr.bf16.mxu1 %v993_v20 }
 0x227   :  { %1586 = vmatmul.mubr.bf16.gmra.mrb[56].mxu1 %v992_v27 }
 0x228   :  { %1595 = vmatprep.mubr.bf16.mxu1 %v995_v39 }
 0x22f   :  { %1596 = vmatmul.mubr.bf16.gmra.mrb[60].mxu1 %v994_v38 }
 0x28a   :  { %v1414_v12 = vpop.f32.mrb[0].mxu1 }
 0x28b   :  { %v5236_v17 = vpop.f32.mrb[1].mxu1 }
 0x28c   :  { %v1418_v45 = vpop.f32.mrb[2].mxu1 }
 0x28d   :  { %v1606_v48 = vmax.f32 %v1414_v12, %v1418_v45  ;;  %v5238_v22 = vpop.f32.mrb[3].mxu1 }
 0x28e   :  { %v1619_v25 = vmax.f32 %v5236_v17, %v5238_v22 }
 0x292   :  { %v1424_v54 = vpop.f32.mrb[4].mxu1 }
 0x293   :  { %v1607_v57 = vmax.f32 %v1606_v48, %v1424_v54  ;;  %v5242_v33 = vpop.f32.mrb[5].mxu1 }
 0x294   :  { %v1620_v36 = vmax.f32 %v1619_v25, %v5242_v33  ;;  %v1428_v43 = vpop.f32.mrb[6].mxu1 }
 0x295   :  { %v1608_v44 = vmax.f32 %v1607_v57, %v1428_v43  ;;  %v5245_v46 = vpop.f32.mrb[7].mxu1 }
 0x296   :  { %v1621_v47 = vmax.f32 %v1620_v36, %v5245_v46 }
 0x29a   :  { %v1434_v49 = vpop.f32.mrb[8].mxu1 }
 0x29b   :  { %v1609_v50 = vmax.f32 %v1608_v44, %v1434_v49  ;;  %v5248_v51 = vpop.f32.mrb[9].mxu1 }
 0x29c   :  { %v1622_v52 = vmax.f32 %v1621_v47, %v5248_v51  ;;  %v1438_v53 = vpop.f32.mrb[10].mxu1 }
 0x29d   :  { %v1610_v55 = vmax.f32 %v1609_v50, %v1438_v53  ;;  %v5251_v56 = vpop.f32.mrb[11].mxu1 }
 0x29e   :  { %v1623_v58 = vmax.f32 %v1622_v52, %v5251_v56 }
 0x2a2   :  { %v1444_v59 = vpop.f32.mrb[12].mxu1 }
 0x2a3   :  { %v1611_v60 = vmax.f32 %v1610_v55, %v1444_v59  ;;  %v5254_v61 = vpop.f32.mrb[13].mxu1 }
 0x2a4   :  { %v1624_v62 = vmax.f32 %v1623_v58, %v5254_v61  ;;  %v1448_v4 = vpop.f32.mrb[14].mxu1 }
 0x2a5   :  { %v1612_v63 = vmax.f32 %v1611_v60, %v1448_v4  ;;  %v5257_v2 = vpop.f32.mrb[15].mxu1 }
 0x2a6   :  { %v1625_v5 = vmax.f32 %v1624_v62, %v5257_v2 }
 0x2a7   :  { %v1613_v7 = vrot.slane %v1612_v63, 4 }
 0x2a8   :  { %v1626_v8 = vrot.slane %v1625_v5, 4 }
 0x2a9   :  { %v1614_v9 = vmax.f32 %v1612_v63, %v1613_v7 }
 0x2aa   :  { %v1627_v6 = vmax.f32 %v1625_v5, %v1626_v8  ;;  %v5260_v11 = vpop.f32.mrb[16].mxu1 }
 0x2ab   :  { %v1615_v14 = vrot.slane %v1614_v9, 2  ;;  %v5262_v15 = vpop.f32.mrb[17].mxu1 }
 0x2ac   :  { %v1628_v18 = vrot.slane %v1627_v6, 2  ;;  %v5264_v19 = vpop.f32.mrb[18].mxu1 }
 0x2ad   :  { %v1616_v10 = vmax.f32 %v1614_v9, %v1615_v14  ;;  %v1666_v21 = vmax.f32 %v5260_v11, %v5264_v19  ;;  %v5268_v13 = vpop.f32.mrb[19].mxu1  ;;  %v4181_v14 = vld [vmem:[%s6044_s0] sm:$0xff] }
 0x2ae   :  { %v1629_v23 = vmax.f32 %v1627_v6, %v1628_v18  ;;  %v1679_v16 = vmax.f32 %v5262_v15, %v5268_v13 }
 0x2af   :  { %v1617_v24 = vrot.slane %v1616_v10, 1 }
 0x2b0   :  { %v1630_v26 = vrot.slane %v1629_v23, 1 }
 0x2b1   :  { %v1618_v27 = vmax.f32 %v1616_v10, %v1617_v24 }
 0x2b2   :  { %v5272_v20 = vmax.f32 %v1629_v23, %v1630_v26  ;;  %v5274_v28 = vpop.f32.mrb[20].mxu1  ;;  %v4182_v26 = vld [vmem:[%s6044_s0 + $0x20] sm:$0xff] }
 0x2b3   :  { %v1726_v29 = vsub.f32 %v1414_v12, %v1618_v27  ;;  %v1730_v30 = vsub.f32 %v1418_v45, %v1618_v27  ;;  %v1734_v31 = vsub.f32 %v1424_v54, %v1618_v27  ;;  %v1738_v32 = vsub.f32 %v1428_v43, %v1618_v27  ;;  %v5276_v34 = vpop.f32.mrb[21].mxu1 }
 0x2b4   :  { %v1742_v35 = vsub.f32 %v1434_v49, %v1618_v27  ;;  %v1746_v37 = vsub.f32 %v1438_v53, %v1618_v27  ;;  %v1750_v38 = vsub.f32 %v1444_v59, %v1618_v27  ;;  %v1754_v39 = vsub.f32 %v1448_v4, %v1618_v27  ;;  %v5278_v40 = vpop.f32.mrb[22].mxu1 }
 0x2b5   :  { %v1790_v41 = vmul.f32 1.442695, %v1726_v29  ;;  %v1798_v42 = vmul.f32 1.442695, %v1730_v30  ;;  %v1806_v48 = vmul.f32 1.442695, %v1734_v31  ;;  %v1727_v25 = vsub.f32 %v5236_v17, %v5272_v20 }
 0x2b6   :  { %v1814_v57 = vmul.f32 1.442695, %v1738_v32  ;;  %v1731_v12 = vsub.f32 %v5238_v22, %v5272_v20  ;;  %v1822_v45 = vmul.f32 1.442695, %v1742_v35  ;;  %v1830_v54 = vmul.f32 1.442695, %v1746_v37 }
 0x2b7   :  { %4019 = vpow2.f32 %v1790_v41  ;;  %v1735_v36 = vsub.f32 %v5242_v33, %v5272_v20  ;;  %v5286_v43 = vpop.f32.mrb[23].mxu1  ;;  %v1739_v44 = vsub.f32 %v5245_v46, %v5272_v20  ;;  %v1743_v47 = vsub.f32 %v5248_v51, %v5272_v20  ;;  %v4183_v31 = vld [vmem:[%s6044_s0 + $0x40] sm:$0xff] }
 0x2b8   :  { %4021 = vpow2.f32 %v1798_v42  ;;  %v1747_v17 = vsub.f32 %v5251_v56, %v5272_v20  ;;  %v1838_v22 = vmul.f32 1.442695, %v1750_v38  ;;  %v1751_v49 = vsub.f32 %v5254_v61, %v5272_v20  ;;  %v4184_v42 = vld [vmem:[%s6044_s0 + $0x60] sm:$0xff] }
 0x2b9   :  { %4023 = vpow2.f32 %v1806_v48  ;;  %v1755_v33 = vsub.f32 %v5257_v2, %v5272_v20  ;;  %v1846_v50 = vmul.f32 1.442695, %v1754_v39  ;;  %v1792_v52 = vmul.f32 1.442695, %v1727_v25 }
 0x2ba   :  { %4025 = vpow2.f32 %v1814_v57  ;;  %v1800_v46 = vmul.f32 1.442695, %v1731_v12  ;;  %v1667_v53 = vmax.f32 %v1666_v21, %v5274_v28  ;;  %v1680_v51 = vmax.f32 %v1679_v16, %v5276_v34  ;;  %v5300_v55 = vpop.f32.mrb[24].mxu1 }
 0x2bb   :  { %4027 = vpow2.f32 %v1822_v45  ;;  %v1808_v56 = vmul.f32 1.442695, %v1735_v36  ;;  %v5302_v58 = vpop.f32.mrb[25].mxu1  ;;  %v1816_v59 = vmul.f32 1.442695, %v1739_v44 }
 0x2bc   :  { %4029 = vpow2.f32 %v1830_v54  ;;  %v1668_v60 = vmax.f32 %v1667_v53, %v5278_v40  ;;  %v1681_v61 = vmax.f32 %v1680_v51, %v5286_v43  ;;  %v5306_v62 = vpop.f32.mrb[26].mxu1  ;;  %v1824_v4 = vmul.f32 1.442695, %v1743_v47  ;;  %v4185_v54 = vld [vmem:[%s6044_s0 + $0x80] sm:$0xff] }
 0x2bd   :  { %4031 = vpow2.f32 %v1838_v22  ;;  %v5308_v63 = vpop.f32.mrb[27].mxu1  ;;  %v1832_v2 = vmul.f32 1.442695, %v1747_v17  ;;  %v1840_v9 = vmul.f32 1.442695, %v1751_v49  ;;  %v4186_v22 = vld [vmem:[%s6044_s0 + $0xa0] sm:$0xff] }
 0x2be   :  { %4033 = vpow2.f32 %v1846_v50  ;;  %v1669_v5 = vmax.f32 %v1668_v60, %v5300_v55  ;;  %v1682_v7 = vmax.f32 %v1681_v61, %v5302_v58  ;;  %v1848_v20 = vmul.f32 1.442695, %v1755_v33  ;;  %v4188_v61 = vld [vmem:[%s6044_s0 + $0xe0] sm:$0xff] }
 0x2bf   :  { %4035 = vpow2.f32 %v1792_v52 }
 0x2c0   :  { %4037 = vpow2.f32 %v1800_v46  ;;  %v1670_v10 = vmax.f32 %v1669_v5, %v5306_v62  ;;  %v1683_v21 = vmax.f32 %v1682_v7, %v5308_v63  ;;  %v4187_v46 = vld [vmem:[%s6044_s0 + $0xc0] sm:$0xff] }
 0x2c1   :  { %v4020_v8 = vpop.eup %4019  ;;  %4039 = vpow2.f32 %v1808_v56 }
 0x2c2   :  { %v4022_v6 = vpop.eup %4021  ;;  %v2054_v18 = vmul.f32 %v4181_v14, %v4020_v8  ;;  %4041 = vpow2.f32 %v1816_v59  ;;  %v5317_v23 = vpop.f32.mrb[28].mxu1 }
 0x2c3   :  { %v4024_v16 = vpop.eup %4023  ;;  %v1918_v24 = vadd.f32 %v4022_v6, %v4020_v8  ;;  %v2058_v27 = vmul.f32 %v4182_v26, %v4022_v6  ;;  %4043 = vpow2.f32 %v1824_v4  ;;  %v5322_v29 = vpop.f32.mrb[29].mxu1  ;;  %v1671_v37 = vmax.f32 %v1670_v10, %v5317_v23  ;;  %v4189_v6 = vld [vmem:[%s6044_s0 + $0x8] sm:$0xff] }
 0x2c4   :  { %v4026_v30 = vpop.eup %4025  ;;  %v2062_v32 = vmul.f32 %v4183_v31, %v4024_v16  ;;  %v2246_v35 = vmul.f32 %v4181_v14, %v2054_v18  ;;  %4045 = vpow2.f32 %v1832_v2  ;;  %v5328_v38 = vpop.f32.mrb[30].mxu1  ;;  %v5339_v44 = vmax.f32 %v1683_v21, %v5322_v29 }
 0x2c5   :  { %v4028_v39 = vpop.eup %4027  ;;  %v1919_v41 = vadd.f32 %v4024_v16, %v1918_v24  ;;  %v2066_v48 = vmul.f32 %v4184_v42, %v4026_v30  ;;  %v2118_v25 = vadd.f32 %v2058_v27, %v2054_v18  ;;  %v2250_v57 = vmul.f32 %v4182_v26, %v2058_v27  ;;  %v5333_v12 = vpop.f32.mrb[31].mxu1 }
 0x2c6   :  { %v4030_v45 = vpop.eup %4029  ;;  %v2070_v36 = vmul.f32 %v4185_v54, %v4028_v39  ;;  %4047 = vpow2.f32 %v1840_v9  ;;  %v2254_v50 = vmul.f32 %v4183_v31, %v2062_v32  ;;  %v5354_v18 = vmax.f32 %v1671_v37, %v5328_v38  ;;  %v4191_v37 = vld [vmem:[%s6044_s0 + $0x48] sm:$0xff] }
 0x2c7   :  { %v4032_v47 = vpop.eup %4031  ;;  %v1920_v17 = vadd.f32 %v4026_v30, %v1919_v41  ;;  %v2074_v49 = vmul.f32 %v4186_v22, %v4030_v45  ;;  %v2119_v33 = vadd.f32 %v2118_v25, %v2062_v32  ;;  %v2258_v51 = vmul.f32 %v4184_v42, %v2066_v48 }
 0x2c8   :  { %v4034_v52 = vpop.eup %4033  ;;  %v2078_v53 = vmul.f32 %v4187_v46, %v4032_v47  ;;  %v2310_v56 = vadd.f32 %v2250_v57, %v2246_v35  ;;  %4049 = vpow2.f32 %v1848_v20  ;;  %v2262_v5 = vmul.f32 %v4185_v54, %v2070_v36  ;;  %v4190_v35 = vld [vmem:[%s6044_s0 + $0x28] sm:$0xff] }
 0x2c9   :  { %v4036_v59 = vpop.eup %4035  ;;  %v1921_v60 = vadd.f32 %v4028_v39, %v1920_v17  ;;  %v2082_v4 = vmul.f32 %v4188_v61, %v4034_v52  ;;  %v2120_v2 = vadd.f32 %v2119_v33, %v2066_v48  ;;  %v2266_v8 = vmul.f32 %v4186_v22, %v2074_v49  ;;  %v4192_v33 = vld [vmem:[%s6044_s0 + $0x68] sm:$0xff] }
 0x2ca   :  { %v4038_v7 = vpop.eup %4037  ;;  %v2311_v9 = vadd.f32 %v2310_v56, %v2254_v50  ;;  %v2055_v14 = vmul.f32 %v4189_v6, %v4036_v59  ;;  %v5356_v10 = vpop.f32.mrb[32].mxu1  ;;  %v2270_v26 = vmul.f32 %v4187_v46, %v2078_v53  ;;  %v4193_v46 = vld [vmem:[%s6044_s0 + $0x88] sm:$0xff] }
 0x2cb   :  { %v4040_v21 = vpop.eup %4039  ;;  %v1922_v16 = vadd.f32 %v4030_v45, %v1921_v60  ;;  %v2121_v24 = vadd.f32 %v2120_v2, %v2070_v36  ;;  %v1931_v27 = vadd.f32 %v4038_v7, %v4036_v59  ;;  %v5358_v20 = vpop.f32.mrb[33].mxu1  ;;  %v2274_v31 = vmul.f32 %v4188_v61, %v2082_v4  ;;  %v4194_v60 = vld [vmem:[%s6044_s0 + $0xa8] sm:$0xff] }
 0x2cc   :  { %v4042_v30 = vpop.eup %4041  ;;  %v2312_v32 = vadd.f32 %v2311_v9, %v2258_v51  ;;  %v2059_v39 = vmul.f32 %v4190_v35, %v4038_v7  ;;  %v2063_v41 = vmul.f32 %v4191_v37, %v4040_v21  ;;  %v5366_v42 = vpop.f32.mrb[34].mxu1  ;;  %v2247_v54 = vmul.f32 %v4189_v6, %v2055_v14 }
 0x2cd   :  { %v4044_v48 = vpop.eup %4043  ;;  %v1923_v25 = vadd.f32 %v4032_v47, %v1922_v16  ;;  %v2122_v57 = vadd.f32 %v2121_v24, %v2074_v49  ;;  %v1932_v45 = vadd.f32 %v4040_v21, %v1931_v27  ;;  %v5368_v36 = vpop.f32.mrb[35].mxu1  ;;  %v2067_v50 = vmul.f32 %v4192_v33, %v4042_v30 }
 0x2ce   :  { %v4046_v17 = vpop.eup %4045  ;;  %v2313_v22 = vadd.f32 %v2312_v32, %v2262_v5  ;;  %v2071_v51 = vmul.f32 %v4193_v46, %v4044_v48  ;;  %v2131_v56 = vadd.f32 %v2059_v39, %v2055_v14  ;;  %v2251_v9 = vmul.f32 %v4190_v35, %v2059_v39  ;;  %v4195_v14 = vld [vmem:[%s6044_s0 + $0xc8] sm:$0xff] }
 0x2cf   :  { %v1924_v59 = vadd.f32 %v4034_v52, %v1923_v25  ;;  %v2123_v47 = vadd.f32 %v2122_v57, %v2078_v53  ;;  %v1933_v49 = vadd.f32 %v4042_v30, %v1932_v45  ;;  %v2075_v61 = vmul.f32 %v4194_v60, %v4046_v17 }
 0x2d0   :  { %v4048_v2 = vpop.eup %4047  ;;  %v2314_v5 = vadd.f32 %v2313_v22, %v2266_v8  ;;  %v2132_v7 = vadd.f32 %v2131_v56, %v2063_v41  ;;  %v2255_v6 = vmul.f32 %v4191_v37, %v2063_v41  ;;  %v2259_v32 = vmul.f32 %v4192_v33, %v2067_v50  ;;  %v4196_v37 = vld [vmem:[%s6044_s0 + $0xe8] sm:$0xff] }
 0x2d1   :  { %v1925_v21 = vrot.slane %v1924_v59, 4  ;;  %v2124_v16 = vadd.f32 %v2123_v47, %v2082_v4  ;;  %v1934_v24 = vadd.f32 %v4044_v48, %v1933_v49  ;;  %v2079_v52 = vmul.f32 %v4195_v14, %v4048_v2 }
 0x2d2   :  { %v4050_v53 = vpop.eup %4049  ;;  %v2315_v27 = vadd.f32 %v2314_v5, %v2270_v26  ;;  %v2133_v30 = vadd.f32 %v2132_v7, %v2067_v50  ;;  %v2263_v25 = vmul.f32 %v4193_v46, %v2071_v51  ;;  %v5382_v57 = vpop.f32.mrb[36].mxu1  ;;  %v2267_v35 = vmul.f32 %v4194_v60, %v2075_v61 }
 0x2d3   :  { %v1926_v45 = vadd.f32 %v1925_v21, %v1924_v59  ;;  %v2125_v8 = vrot.slane %v2124_v16, 4  ;;  %v1935_v22 = vadd.f32 %v4046_v17, %v1934_v24  ;;  %v5384_v39 = vpop.f32.mrb[37].mxu1  ;;  %v2083_v41 = vmul.f32 %v4196_v37, %v4050_v53 }
 0x2d4   :  { %v2316_v4 = vadd.f32 %v2315_v27, %v2274_v31  ;;  %v2134_v48 = vadd.f32 %v2133_v30, %v2071_v51  ;;  %v2323_v56 = vadd.f32 %v2251_v9, %v2247_v54  ;;  %v5389_v26 = vpop.f32.mrb[38].mxu1  ;;  %v2271_v47 = vmul.f32 %v4195_v14, %v2079_v52 }
 0x2d5   :  { %v1927_v33 = vrot.slane %v1926_v45, 2  ;;  %v2126_v50 = vadd.f32 %v2125_v8, %v2124_v16  ;;  %v1936_v46 = vadd.f32 %v4048_v2, %v1935_v22  ;;  %v5391_v59 = vpop.f32.mrb[39].mxu1  ;;  %v1673_v31 = vrot.slane %v5354_v18, 4 }
 0x2d6   :  { %6083 = vst [vmem:[#allocation18_spill] sm:$0xff] %v5391_v59  ;;  %v2317_v17 = vrot.slane %v2316_v4, 4  ;;  %v2135_v49 = vadd.f32 %v2134_v48, %v2075_v61  ;;  %v2324_v60 = vadd.f32 %v2323_v56, %v2255_v6  ;;  %v1685_v51 = vmax.f32 %v5339_v44, %v5333_v12 }
 0x2d7   :  { %v1928_v5 = vadd.f32 %v1927_v33, %v1926_v45  ;;  %v2127_v7 = vrot.slane %v2126_v50, 2  ;;  %v1937_v21 = vadd.f32 %v4050_v53, %v1936_v46  ;;  %v1674_v16 = vmax.f32 %v5354_v18, %v1673_v31 }
 0x2d8   :  { %v2318_v54 = vadd.f32 %v2317_v17, %v2316_v4  ;;  %v2136_v9 = vadd.f32 %v2135_v49, %v2079_v52  ;;  %v2325_v24 = vadd.f32 %v2324_v60, %v2259_v32  ;;  %v1686_v30 = vrot.slane %v1685_v51, 4 }
 0x2d9   :  { %v1929_v2 = vrot.slane %v1928_v5, 1  ;;  %v2128_v14 = vadd.f32 %v2127_v7, %v2126_v50  ;;  %v1938_v27 = vrot.slane %v1937_v21, 4  ;;  %v1675_v22 = vrot.slane %v1674_v16, 2 }
 0x2da   :  { %v2319_v8 = vrot.slane %v2318_v54, 2  ;;  %v2137_v61 = vadd.f32 %v2136_v9, %v2083_v41  ;;  %v2326_v6 = vadd.f32 %v2325_v24, %v2263_v25  ;;  %v5397_v48 = vpop.f32.mrb[40].mxu1  ;;  %v1687_v33 = vmax.f32 %v1685_v51, %v1686_v30 }
 0x2db   :  { %v1930_v45 = vadd.f32 %v1929_v2, %v1928_v5  ;;  %v2129_v53 = vrot.slane %v2128_v14, 1  ;;  %v1939_v56 = vadd.f32 %v1938_v27, %v1937_v21  ;;  %v5399_v44 = vpop.f32.mrb[41].mxu1  ;;  %v1676_v18 = vmax.f32 %v1674_v16, %v1675_v22  ;;  %v3894_v2 = vld [vmem:[#allocation8] sm:$0xff]  }
 0x2dc   :  { %6084 = vst [vmem:[#allocation19_spill] sm:$0xff] %v5399_v44  ;;  %v2320_v52 = vadd.f32 %v2319_v8, %v2318_v54  ;;  %v2138_v32 = vrot.slane %v2137_v61, 4  ;;  %v2327_v4 = vadd.f32 %v2326_v6, %v2267_v35  ;;  %v5401_v46 = vpop.f32.mrb[42].mxu1  ;;  %v1688_v17 = vrot.slane %v1687_v33, 2  ;;  %v3893_v54 = vld [vmem:[#allocation8 + $0x40] sm:$0xff]  }
 0x2dd   :  { %4051 = vrcp.f32 %v1930_v45  ;;  %v1940_v50 = vrot.slane %v1939_v56, 2  ;;  %v5403_v49 = vpop.f32.mrb[43].mxu1  ;;  %v2275_v60 = vmul.f32 %v4196_v37, %v2083_v41  ;;  %v1677_v5 = vrot.slane %v1676_v18, 1  ;;  %3588 = vmatprep.subr.bf16.mxu0 %v3893_v54 }
 0x2de   :  { %6085 = vst [vmem:[#allocation20_spill] sm:$0xff] %v5403_v49  ;;  %v2139_v25 = vadd.f32 %v2138_v32, %v2137_v61  ;;  %v2328_v31 = vadd.f32 %v2327_v4, %v2271_v47  ;;  %v2130_v7 = vadd.f32 %v2129_v53, %v2128_v14  ;;  %v1632_v51 = vmax.f32 %v5356_v10, %v5366_v42  ;;  %v3895_v32 = vld [vmem:[#allocation8 + $0x48] sm:$0xff]  }
 0x2df   :  { %v1941_v21 = vadd.f32 %v1940_v50, %v1939_v56  ;;  %v2321_v9 = vrot.slane %v2320_v52, 1  ;;  %v1678_v16 = vmax.f32 %v1676_v18, %v1677_v5  ;;  %v1689_v30 = vmax.f32 %v1687_v33, %v1688_v17  ;;  %3589 = vmatpush3.bf16.msra.mxu0 %v3894_v2  ;;  %v3896_v17 = vld [vmem:[#allocation8 + $0x8] sm:$0xff]  }
 0x2e0   :  { %v2140_v35 = vrot.slane %v2139_v25, 2  ;;  %v2329_v24 = vadd.f32 %v2328_v31, %v2275_v60  ;;  %v5409_v8 = vsel %vm577_vm0, %v5358_v20, -inf  ;;  %v5412_v37 = vmax.f32 %v1632_v51, %v5382_v57  ;;  %3590 = vmatprep.subr.bf16.mxu0 %v3895_v32 }
 0x2e1   :  { %v1942_v27 = vrot.slane %v1941_v21, 1  ;;  %v1758_v14 = vsub.f32 %v5260_v11, %v1678_v16  ;;  %v1762_v61 = vsub.f32 %v5264_v19, %v1678_v16  ;;  %v1766_v45 = vsub.f32 %v5274_v28, %v1678_v16 }
 0x2e2   :  { %v2141_v41 = vadd.f32 %v2140_v35, %v2139_v25  ;;  %v2330_v47 = vrot.slane %v2329_v24, 4  ;;  %v5416_v6 = vpop.f32.mrb[44].mxu1  ;;  %v1770_v53 = vsub.f32 %v5278_v40, %v1678_v16  ;;  %v1774_v56 = vsub.f32 %v5300_v55, %v1678_v16  ;;  %v3897_v35 = vld [vmem:[#allocation8 + $0x50] sm:$0xff]  }
 0x2e3   :  { %v1943_v22 = vadd.f32 %v1942_v27, %v1941_v21  ;;  %v5421_v33 = vpop.f32.mrb[45].mxu1  ;;  %v2322_v4 = vadd.f32 %v2321_v9, %v2320_v52  ;;  %v1778_v50 = vsub.f32 %v5306_v62, %v1678_v16  ;;  %v1782_v11 = vsub.f32 %v5317_v23, %v1678_v16  ;;  %3591 = vmatpush3.bf16.msra.mxu0 %v3896_v17 }
 0x2e4   :  { %6086 = vst [vmem:[#allocation21_spill] sm:$0xff] %v5421_v33  ;;  %v2142_v18 = vrot.slane %v2141_v41, 1  ;;  %v5425_v19 = vpop.f32.mrb[46].mxu1  ;;  %v1786_v25 = vsub.f32 %v5328_v38, %v1678_v16  ;;  %v1854_v60 = vmul.f32 1.442695, %v1758_v14  ;;  %v1690_v31 = vrot.slane %v1689_v30, 1  ;;  %3592 = vmatprep.subr.bf16.mxu0 %v3897_v35 }
 0x2e5   :  { %v1862_v28 = vmul.f32 1.442695, %v1762_v61  ;;  %v5428_v40 = vpop.f32.mrb[47].mxu1  ;;  %4053 = vrcp.f32 %v1943_v22  ;;  %v1870_v55 = vmul.f32 1.442695, %v1766_v45  ;;  %v1646_v52 = vsel %vm577_vm0, %v5368_v36, -inf }
 0x2e6   :  { %v1878_v5 = vmul.f32 1.442695, %v1770_v53  ;;  %v5432_v23 = vadd.f32 %v2142_v18, %v2141_v41  ;;  %v5434_v21 = vadd.f32 %v2330_v47, %v2329_v24  ;;  %4055 = vpow2.f32 %v1854_v60  ;;  %v3898_v16 = vld [vmem:[#allocation8 + $0x10] sm:$0xff]  }
 0x2e7   :  { %v4052_v62 = vpop.eup %4051  ;;  %v1886_v38 = vmul.f32 1.442695, %v1774_v56  ;;  %4057 = vpow2.f32 %v1862_v28  ;;  %v1894_v9 = vmul.f32 1.442695, %v1778_v50  ;;  %v1902_v2 = vmul.f32 1.442695, %v1782_v11  ;;  %3593 = vmatpush3.bf16.msra.mxu0 %v3898_v16 }
 0x2e8   :  { %6087 = vst [vmem:[#allocation22_spill] sm:$0xff] %v5432_v23  ;;  %v5436_v51 = vmul.f32 %v4052_v62, %v2130_v7  ;;  %v5438_v54 = vmul.f32 %v4052_v62, %v2322_v4  ;;  %4059 = vpow2.f32 %v1870_v55  ;;  %v1691_v27 = vmax.f32 %v1689_v30, %v1690_v31  ;;  %v3900_v4 = vld [vmem:[#allocation8 + $0x18] sm:$0xff]   ;;  %v3901_v28 = vld [vmem:[#allocation8 + $0x60] sm:$0xff]  }
 0x2e9   :  { %v1647_v14 = vmax.f32 %v5409_v8, %v1646_v52  ;;  %4061 = vpow2.f32 %v1878_v5  ;;  %v1910_v41 = vmul.f32 1.442695, %v1786_v25  ;;  %v1648_v24 = vsel %vm577_vm0, %v5384_v39, -inf  ;;  %v3899_v8 = vld [vmem:[#allocation8 + $0x58] sm:$0xff]   ;;  %v3902_v31 = vld [vmem:[#allocation8 + $0x20] sm:$0xff]  }
 0x2ea   :  { %6088 = vst [vmem:[#allocation23_spill] sm:$0xff] %v5436_v51  ;;  %6089 = vst [vmem:[#allocation24_spill] sm:$0xff] %v5438_v54  ;;  %v1634_v7 = vmax.f32 %v5412_v37, %v5389_v26  ;;  %v5445_v47 = vpop.f32.mrb[48].mxu1  ;;  %4063 = vpow2.f32 %v1886_v38  ;;  %v1759_v61 = vsub.f32 %v5262_v15, %v1691_v27  ;;  %v1763_v22 = vsub.f32 %v5268_v13, %v1691_v27  ;;  %v3908_v23 = vld [vmem:[#allocation8 + $0x38] sm:$0xff]  }
 0x2eb   :  { %v1767_v30 = vsub.f32 %v5276_v34, %v1691_v27  ;;  %v5450_v45 = vpop.f32.mrb[49].mxu1  ;;  %4065 = vpow2.f32 %v1894_v9  ;;  %v1771_v53 = vsub.f32 %v5286_v43, %v1691_v27  ;;  %v1775_v56 = vsub.f32 %v5302_v58, %v1691_v27  ;;  %3594 = vmatprep.subr.bf16.mxu0 %v3899_v8  ;;  %v4197_v9 = vld [vmem:[%s6044_s0 + $0x100] sm:$0xff] }
 0x2ec   :  { %6090 = vst [vmem:[#allocation25_spill] sm:$0xff] %v5450_v45  ;;  %v1779_v37 = vsub.f32 %v5308_v63, %v1691_v27  ;;  %v5455_v32 = vpop.f32.mrb[50].mxu1  ;;  %4067 = vpow2.f32 %v1902_v2  ;;  %v1783_v15 = vsub.f32 %v5322_v29, %v1691_v27  ;;  %v1787_v13 = vsub.f32 %v5333_v12, %v1691_v27  ;;  %3595 = vmatpush3.bf16.msra.mxu0 %v3900_v4 }
 0x2ed   :  { %v1856_v34 = vmul.f32 1.442695, %v1759_v61  ;;  %v5459_v18 = vpop.f32.mrb[51].mxu1  ;;  %4069 = vpow2.f32 %v1910_v41  ;;  %v1864_v50 = vmul.f32 1.442695, %v1763_v22  ;;  %v2332_v58 = vrot.slane %v5434_v21, 2  ;;  %3596 = vmatprep.subr.bf16.mxu0 %v3901_v28 }
 0x2ee   :  { %6091 = vst [vmem:[#allocation26_spill] sm:$0xff] %v5459_v18  ;;  %v1872_v11 = vmul.f32 1.442695, %v1767_v30  ;;  %v1880_v43 = vmul.f32 1.442695, %v1771_v53  ;;  %v1649_v60 = vmax.f32 %v1647_v14, %v1648_v24  ;;  %v1650_v12 = vsel %vm577_vm0, %v5391_v59, -inf }
 0x2ef   :  { %4071 = vpow2.f32 %v1856_v34  ;;  %v1888_v63 = vmul.f32 1.442695, %v1775_v56  ;;  %v1896_v17 = vmul.f32 1.442695, %v1779_v37  ;;  %v5462_v25 = vpop.eup %4053  ;;  %v1904_v29 = vmul.f32 1.442695, %v1783_v15 }
 0x2f0   :  { %6092 = vst [vmem:[#allocation27_spill] sm:$0xff] %v5462_v25  ;;  %4073 = vpow2.f32 %v1864_v50  ;;  %v4056_v55 = vpop.eup %4055  ;;  %v1912_v5 = vmul.f32 1.442695, %v1787_v13  ;;  %v5467_v52 = vmax.f32 %v1634_v7, %v5397_v48  ;;  %v1652_v62 = vsel %vm577_vm0, %v5399_v44, -inf  ;;  %v4198_v24 = vld [vmem:[%s6044_s0 + $0x120] sm:$0xff]  ;;  %3597 = vmatpush3.bf16.msra.mxu0 %v3902_v31 }
 0x2f1   :  { %4075 = vpow2.f32 %v1872_v11  ;;  %v4058_v38 = vpop.eup %4057  ;;  %v2086_v35 = vmul.f32 %v4197_v9, %v4056_v55  ;;  %v1651_v16 = vmax.f32 %v1649_v60, %v1650_v12  ;;  %v5476_v2 = vsel %vm577_vm0, %v5403_v49, -inf  ;;  %v3903_v30 = vld [vmem:[#allocation8 + $0x68] sm:$0xff]  }
 0x2f2   :  { %4077 = vpow2.f32 %v1880_v43  ;;  %v5478_v27 = vpop.f32.mrb[52].mxu1  ;;  %v4060_v14 = vpop.eup %4059  ;;  %v1978_v41 = vadd.f32 %v4058_v38, %v4056_v55  ;;  %v2090_v7 = vmul.f32 %v4198_v24, %v4058_v38  ;;  %v1636_v61 = vmax.f32 %v5467_v52, %v5401_v46  ;;  %v4199_v53 = vld [vmem:[%s6044_s0 + $0x140] sm:$0xff]  ;;  %3598 = vmatprep.subr.bf16.mxu0 %v3903_v30  ;;  %v3906_v30 = vld [vmem:[#allocation8 + $0x30] sm:$0xff]  }
 0x2f3   :  { %4079 = vpow2.f32 %v1888_v63  ;;  %v5485_v22 = vpop.f32.mrb[53].mxu1  ;;  %v4062_v8 = vpop.eup %4061  ;;  %v2094_v56 = vmul.f32 %v4199_v53, %v4060_v14  ;;  %v2278_v37 = vmul.f32 %v4197_v9, %v2086_v35  ;;  %v5490_v4 = vmax.f32 %v1651_v16, %v1652_v62  ;;  %v3904_v13 = vld [vmem:[#allocation8 + $0x28] sm:$0xff]  }
 0x2f4   :  { %6093 = vst [vmem:[#allocation28_spill] sm:$0xff] %v5485_v22  ;;  %4081 = vpow2.f32 %v1896_v17  ;;  %v5492_v15 = vpop.f32.mrb[54].mxu1  ;;  %v4064_v34 = vpop.eup %4063  ;;  %v1979_v50 = vadd.f32 %v4060_v14, %v1978_v41  ;;  %v4200_v11 = vld [vmem:[%s6044_s0 + $0x160] sm:$0xff]  ;;  %v2178_v63 = vadd.f32 %v2090_v7, %v2086_v35  ;;  %v2282_v60 = vmul.f32 %v4198_v24, %v2090_v7  ;;  %3599 = vmatpush3.bf16.msra.mxu0 %v3904_v13 }
 0x2f5   :  { %v2098_v43 = vmul.f32 %v4200_v11, %v4062_v8  ;;  %v5497_v12 = vpop.f32.mrb[55].mxu1  ;;  %v4066_v28 = vpop.eup %4065  ;;  %v5500_v17 = vadd.f32 %v2332_v58, %v5434_v21  ;;  %v4201_v31 = vld [vmem:[%s6044_s0 + $0x180] sm:$0xff]  ;;  %4083 = vpow2.f32 %v1904_v29  ;;  %v5512_v21 = vsel %vm577_vm0, %v5421_v33, -inf  ;;  %v3905_v58 = vld [vmem:[#allocation8 + $0x70] sm:$0xff]  }
 0x2f6   :  { %6094 = vst [vmem:[#allocation29_spill] sm:$0xff] %v5497_v12  ;;  %v2102_v55 = vmul.f32 %v4201_v31, %v4064_v34  ;;  %v4068_v62 = vpop.eup %4067  ;;  %v1980_v38 = vadd.f32 %v4062_v8, %v1979_v50  ;;  %v4202_v9 = vld [vmem:[%s6044_s0 + $0x1a0] sm:$0xff]  ;;  %v2179_v16 = vadd.f32 %v2178_v63, %v2094_v56  ;;  %v2286_v24 = vmul.f32 %v4199_v53, %v2094_v56  ;;  %v4205_v53 = vld [vmem:[%s6044_s0 + $0x108] sm:$0xff] }
 0x2f7   :  { %6095 = vst [vmem:[#allocation30_spill] sm:$0xff] %v5500_v17  ;;  %v2106_v35 = vmul.f32 %v4202_v9, %v4066_v28  ;;  %v4070_v14 = vpop.eup %4069  ;;  %v4203_v29 = vld [vmem:[%s6044_s0 + $0x1c0] sm:$0xff]  ;;  %v2370_v7 = vadd.f32 %v2282_v60, %v2278_v37  ;;  %4085 = vpow2.f32 %v1912_v5  ;;  %v2290_v13 = vmul.f32 %v4200_v11, %v2098_v43  ;;  %3600 = vmatprep.subr.bf16.mxu0 %v3905_v58 }
 0x2f8   :  { %v2110_v41 = vmul.f32 %v4203_v29, %v4068_v62  ;;  %v1981_v50 = vadd.f32 %v4064_v34, %v1980_v38  ;;  %v4204_v63 = vld [vmem:[%s6044_s0 + $0x1e0] sm:$0xff]  ;;  %v2180_v0 = vadd.f32 %v2179_v16, %v2098_v43  ;;  %v2294_v3 = vmul.f32 %v4201_v31, %v2102_v55  ;;  %3601 = vmatpush3.bf16.msra.mxu0 %v3906_v30  ;;  %v3907_v43 = vld [vmem:[#allocation8 + $0x78] sm:$0xff]   ;;  %v4207_v30 = vld [vmem:[%s6044_s0 + $0x148] sm:$0xff] }
 0x2f9   :  { %v4072_v8 = vpop.eup %4071  ;;  %v2114_v52 = vmul.f32 %v4204_v63, %v4070_v14  ;;  %v2371_v54 = vadd.f32 %v2370_v7, %v2286_v24  ;;  %v5524_v5 = vmax.f32 %v1636_v61, %v5416_v6  ;;  %v2298_v51 = vmul.f32 %v4202_v9, %v2106_v35  ;;  %v4206_v61 = vld [vmem:[%s6044_s0 + $0x128] sm:$0xff]  ;;  %3602 = vmatprep.subr.bf16.mxu0 %v3907_v43 }
 0x2fa   :  { %v4074_v1 = vpop.eup %4073  ;;  %v2087_v56 = vmul.f32 %v4205_v53, %v4072_v8  ;;  %v5526_v37 = vpop.f32.mrb[56].mxu1  ;;  %v1982_v60 = vadd.f32 %v4066_v28, %v1981_v50  ;;  %v2181_v38 = vadd.f32 %v2180_v0, %v2102_v55  ;;  %v2302_v58 = vmul.f32 %v4203_v29, %v2110_v41 }
 0x2fb   :  { %v4076_v34 = vpop.eup %4075  ;;  %v1991_v16 = vadd.f32 %v4074_v1, %v4072_v8  ;;  %v5528_v11 = vpop.f32.mrb[57].mxu1  ;;  %v2306_v24 = vmul.f32 %v4204_v63, %v2114_v52  ;;  %v2372_v7 = vadd.f32 %v2371_v54, %v2290_v13  ;;  %v2091_v17 = vmul.f32 %v4206_v61, %v4074_v1  ;;  %v4208_v1 = vld [vmem:[%s6044_s0 + $0x168] sm:$0xff] }
 0x2fc   :  { %6096 = vst [vmem:[#allocation31_spill] sm:$0xff] %v5528_v11  ;;  %v4078_v31 = vpop.eup %4077  ;;  %v5533_v25 = vpop.f32.mrb[58].mxu1  ;;  %v1983_v0 = vadd.f32 %v4068_v62, %v1982_v60  ;;  %v2182_v55 = vadd.f32 %v2181_v38, %v2106_v35  ;;  %v2095_v8 = vmul.f32 %v4207_v30, %v4076_v34  ;;  %v4209_v38 = vld [vmem:[%s6044_s0 + $0x188] sm:$0xff]  ;;  %3603 = vmatpush3.bf16.msra.mxu0 %v3908_v23 }
 0x2fd   :  { %6097 = vst [vmem:[#allocation32_spill] sm:$0xff] %v5533_v25  ;;  %v4080_v28 = vpop.eup %4079  ;;  %v1992_v9 = vadd.f32 %v4076_v34, %v1991_v16  ;;  %v5538_v29 = vpop.f32.mrb[59].mxu1  ;;  %v2373_v50 = vadd.f32 %v2372_v7, %v2294_v3  ;;  %v2099_v63 = vmul.f32 %v4208_v1, %v4078_v31  ;;  %v2191_v13 = vadd.f32 %v2091_v17, %v2087_v56  ;;  %v4210_v3 = vld [vmem:[%s6044_s0 + $0x1a8] sm:$0xff] }
 0x2fe   :  { %6098 = vst [vmem:[#allocation33_spill] sm:$0xff] %v5538_v29  ;;  %v4082_v54 = vpop.eup %4081  ;;  %v2279_v25 = vmul.f32 %v4205_v53, %v2087_v56  ;;  %v1984_v62 = vadd.f32 %v4070_v14, %v1983_v0  ;;  %v2183_v35 = vadd.f32 %v2182_v55, %v2110_v41  ;;  %v2103_v34 = vmul.f32 %v4209_v38, %v4080_v28  ;;  %v4211_v0 = vld [vmem:[%s6044_s0 + $0x1c8] sm:$0xff] }
 0x2ff   :  { %v1993_v60 = vadd.f32 %v4078_v31, %v1992_v9  ;;  %v4084_v16 = vpop.eup %4083  ;;  %v2374_v43 = vadd.f32 %v2373_v50, %v2298_v51  ;;  %v2107_v7 = vmul.f32 %v4210_v3, %v4082_v54  ;;  %v2192_v29 = vadd.f32 %v2191_v13, %v2095_v8 }
 0x300   :  { %v2283_v33 = vmul.f32 %v4206_v61, %v2091_v17  ;;  %v1985_v49 = vrot.slane %v1984_v62, 4  ;;  %v2184_v53 = vadd.f32 %v2183_v35, %v2114_v52  ;;  %v2287_v41 = vmul.f32 %v4207_v30, %v2095_v8 }
 0x301   :  { %v1994_v14 = vadd.f32 %v4080_v28, %v1993_v60  ;;  %v4086_v56 = vpop.eup %4085  ;;  %v2375_v31 = vadd.f32 %v2374_v43, %v2302_v58  ;;  %v2111_v23 = vmul.f32 %v4211_v0, %v4084_v16  ;;  %v2193_v55 = vadd.f32 %v2192_v29, %v2099_v63  ;;  %v4212_v29 = vld [vmem:[%s6044_s0 + $0x1e8] sm:$0xff] }
 0x302   :  { %v2291_v51 = vmul.f32 %v4208_v1, %v2099_v63  ;;  %v5552_v9 = vpop.f32.mrb[60].mxu1  ;;  %v1986_v50 = vadd.f32 %v1985_v49, %v1984_v62  ;;  %v2185_v44 = vrot.slane %v2184_v53, 4  ;;  %v2295_v13 = vmul.f32 %v4209_v38, %v2103_v34 }
 0x303   :  { %v1995_v59 = vadd.f32 %v4082_v54, %v1994_v14  ;;  %v5554_v17 = vpop.f32.mrb[61].mxu1  ;;  %v2376_v52 = vadd.f32 %v2375_v31, %v2306_v24  ;;  %v2194_v61 = vadd.f32 %v2193_v55, %v2103_v34  ;;  %v2299_v28 = vmul.f32 %v4210_v3, %v2107_v7 }
 0x304   :  { %6099 = vst [vmem:[#allocation34_spill] sm:$0xff] %v5554_v17  ;;  %v2383_v30 = vadd.f32 %v2283_v33, %v2279_v25  ;;  %v5556_v58 = vpop.f32.mrb[62].mxu1  ;;  %v1987_v8 = vrot.slane %v1986_v50, 2  ;;  %v2186_v35 = vadd.f32 %v2185_v44, %v2184_v53  ;;  %v2115_v1 = vmul.f32 %v4212_v29, %v4086_v56 }
 0x305   :  { %v1996_v60 = vadd.f32 %v4084_v16, %v1995_v59  ;;  %v5561_v49 = vpop.f32.mrb[63].mxu1  ;;  %v2377_v54 = vrot.slane %v2376_v52, 4  ;;  %v2195_v63 = vadd.f32 %v2194_v61, %v2107_v7  ;;  %v6101_v24 = vmax.f32 %v5490_v4, %v5476_v2 }
 0x306   :  { %6100 = vst [vmem:[#allocation35_spill] sm:$0xff] %v5561_v49  ;;  %v2384_v62 = vadd.f32 %v2383_v30, %v2287_v41  ;;  %v1988_v25 = vadd.f32 %v1987_v8, %v1986_v50  ;;  %v2187_v38 = vrot.slane %v2186_v35, 2  ;;  %v1638_v59 = vmax.f32 %v5524_v5, %v5425_v19 }
 0x307   :  { %v1657_v33 = vmax.f32 %v6101_v24, %v5512_v21  ;;  %v1997_v34 = vadd.f32 %v4086_v56, %v1996_v60  ;;  %v2378_v44 = vadd.f32 %v2377_v54, %v2376_v52  ;;  %v2196_v16 = vadd.f32 %v2195_v63, %v2111_v23 }
 0x308   :  { %v2385_v43 = vadd.f32 %v2384_v62, %v2291_v51  ;;  %v1658_v3 = vsel %vm577_vm0, %v5428_v40, -inf  ;;  %v1989_v53 = vrot.slane %v1988_v25, 1  ;;  %v2188_v7 = vadd.f32 %v2187_v38, %v2186_v35 }
 0x309   :  { %v1998_v14 = vrot.slane %v1997_v34, 4  ;;  %v1639_v41 = vrot.slane %v1638_v59, 4  ;;  %v2379_v31 = vrot.slane %v2378_v44, 2  ;;  %v2197_v55 = vadd.f32 %v2196_v16, %v2115_v1 }
 0x30a   :  { %v2386_v2 = vadd.f32 %v2385_v43, %v2295_v13  ;;  %v1659_v4 = vmax.f32 %v1657_v33, %v1658_v3  ;;  %v1990_v21 = vadd.f32 %v1989_v53, %v1988_v25  ;;  %v2303_v56 = vmul.f32 %v4211_v0, %v2111_v23 }
 0x30b   :  { %v1999_v50 = vadd.f32 %v1998_v14, %v1997_v34  ;;  %v1640_v61 = vmax.f32 %v1638_v59, %v1639_v41  ;;  %v2380_v30 = vadd.f32 %v2379_v31, %v2378_v44  ;;  %v2198_v5 = vrot.slane %v2197_v55, 4 }
 0x30c   :  { %v2387_v52 = vadd.f32 %v2386_v2, %v2299_v28  ;;  %v1660_v8 = vrot.slane %v1659_v4, 4  ;;  %4087 = vrcp.f32 %v1990_v21  ;;  %v2307_v60 = vmul.f32 %v4212_v29, %v2115_v1 }
 0x30d   :  { %v2000_v51 = vrot.slane %v1999_v50, 2  ;;  %v1641_v54 = vrot.slane %v1640_v61, 2  ;;  %v2189_v63 = vrot.slane %v2188_v7, 1  ;;  %v2199_v35 = vadd.f32 %v2198_v5, %v2197_v55 }
 0x30e   :  { %v2388_v62 = vadd.f32 %v2387_v52, %v2303_v56  ;;  %v1661_v24 = vmax.f32 %v1659_v4, %v1660_v8  ;;  %v2381_v38 = vrot.slane %v2380_v30, 1  ;;  %v1692_v33 = vmax.f32 %v5445_v47, %v5455_v32 }
 0x30f   :  { %v2001_v16 = vadd.f32 %v2000_v51, %v1999_v50  ;;  %v1642_v13 = vmax.f32 %v1640_v61, %v1641_v54  ;;  %v2200_v0 = vrot.slane %v2199_v35, 2  ;;  %v1705_v28 = vsel %vm577_vm0, %v5450_v45, -inf }
 0x310   :  { %v2389_v23 = vadd.f32 %v2388_v62, %v2307_v60  ;;  %v1662_v25 = vrot.slane %v1661_v24, 2  ;;  %v1706_v29 = vsel %vm577_vm0, %v5459_v18, -inf  ;;  %v1693_v1 = vmax.f32 %v1692_v33, %v5478_v27 }
 0x311   :  { %v2002_v34 = vrot.slane %v2001_v16, 1  ;;  %v1643_v59 = vrot.slane %v1642_v13, 1  ;;  %v2201_v44 = vadd.f32 %v2200_v0, %v2199_v35  ;;  %v1707_v53 = vmax.f32 %v1705_v28, %v1706_v29  ;;  %v6103_v29 = vld [vmem:[#allocation18_spill] sm:$0xff] }
 0x312   :  { %v2390_v43 = vrot.slane %v2389_v23, 4  ;;  %v1663_v3 = vmax.f32 %v1661_v24, %v1662_v25  ;;  %v1708_v31 = vsel %vm577_vm0, %v5485_v22, -inf  ;;  %v1694_v55 = vmax.f32 %v1693_v1, %v5492_v15 }
 0x313   :  { %v2003_v14 = vadd.f32 %v2002_v34, %v2001_v16  ;;  %v1644_v41 = vmax.f32 %v1642_v13, %v1643_v59  ;;  %v2190_v2 = vadd.f32 %v2189_v63, %v2188_v7  ;;  %v2382_v4 = vadd.f32 %v2381_v38, %v2380_v30  ;;  %v3909_v13 = vld [vmem:[#allocation7 + $0x40] sm:$0xff]  }
 0x314   :  { %v2202_v21 = vrot.slane %v2201_v44, 1  ;;  %v1709_v50 = vmax.f32 %v1707_v53, %v1708_v31  ;;  %v2391_v56 = vadd.f32 %v2390_v43, %v2389_v23  ;;  %v1664_v60 = vrot.slane %v1663_v3, 1  ;;  %3610 = vmatprep.subr.bf16.mxu0 %v3909_v13 }
 0x315   :  { %v1728_v61 = vsub.f32 %v5356_v10, %v1644_v41  ;;  %v1732_v5 = vsub.f32 %v5366_v42, %v1644_v41  ;;  %v1736_v52 = vsub.f32 %v5382_v57, %v1644_v41  ;;  %4089 = vrcp.f32 %v2003_v14  ;;  %v6106_v14 = vld [vmem:[#allocation21_spill] sm:$0xff] }
 0x316   :  { %v1740_v8 = vsub.f32 %v5389_v26, %v1644_v41  ;;  %v1744_v51 = vsub.f32 %v5397_v48, %v1644_v41  ;;  %v4088_v54 = vpop.eup %4087  ;;  %v1748_v35 = vsub.f32 %v5401_v46, %v1644_v41  ;;  %v1752_v7 = vsub.f32 %v5416_v6, %v1644_v41 }
 0x317   :  { %v1756_v30 = vsub.f32 %v5425_v19, %v1644_v41  ;;  %v1794_v63 = vmul.f32 1.442695, %v1728_v61  ;;  %v5589_v62 = vmul.f32 %v4088_v54, %v2190_v2  ;;  %v5591_v10 = vmul.f32 %v4088_v54, %v2382_v4 }
 0x318   :  { %v5593_v42 = vadd.f32 %v2202_v21, %v2201_v44  ;;  %v1802_v57 = vmul.f32 1.442695, %v1732_v5  ;;  %v1810_v26 = vmul.f32 1.442695, %v1736_v52  ;;  %v1818_v24 = vmul.f32 1.442695, %v1740_v8 }
 0x319   :  { %6102 = vst [vmem:[#allocation36_spill] sm:$0xff] %v5591_v10  ;;  %4091 = vpow2.f32 %v1794_v63  ;;  %v1826_v48 = vmul.f32 1.442695, %v1744_v51  ;;  %v2392_v38 = vrot.slane %v2391_v56, 2  ;;  %v1834_v16 = vmul.f32 1.442695, %v1748_v35 }
 0x31a   :  { %4093 = vpow2.f32 %v1802_v57  ;;  %v1842_v46 = vmul.f32 1.442695, %v1752_v7  ;;  %v1850_v6 = vmul.f32 1.442695, %v1756_v30  ;;  %v1665_v19 = vmax.f32 %v1663_v3, %v1664_v60  ;;  %v6104_v44 = vld [vmem:[#allocation19_spill] sm:$0xff]  ;;  %v6105_v3 = vld [vmem:[#allocation20_spill] sm:$0xff] }
 0x31b   :  { %4095 = vpow2.f32 %v1810_v26  ;;  %v1710_v33 = vsel %vm577_vm0, %v5497_v12, -inf  ;;  %v1695_v23 = vmax.f32 %v1694_v55, %v5526_v37  ;;  %v1712_v25 = vsel %vm577_vm0, %v5528_v11, -inf  ;;  %v6107_v52 = vld [vmem:[#allocation32_spill] sm:$0xff]  ;;  %v6108_v60 = vld [vmem:[#allocation33_spill] sm:$0xff] }
 0x31c   :  { %4097 = vpow2.f32 %v1818_v24  ;;  %v1711_v0 = vmax.f32 %v1709_v50, %v1710_v33  ;;  %v1729_v28 = vsub.f32 %v5358_v20, %v1665_v19  ;;  %v1733_v34 = vsub.f32 %v5368_v36, %v1665_v19 }
 0x31d   :  { %4099 = vpow2.f32 %v1826_v48  ;;  %v1737_v59 = vsub.f32 %v5384_v39, %v1665_v19  ;;  %v1741_v1 = vsub.f32 %v6103_v29, %v1665_v19  ;;  %v1745_v43 = vsub.f32 %v6104_v44, %v1665_v19  ;;  %v4214_v48 = vld [vmem:[%s6044_s0 + $0x30] sm:$0xff] }
 0x31e   :  { %4101 = vpow2.f32 %v1834_v16  ;;  %v1749_v53 = vsub.f32 %v6105_v3, %v1665_v19  ;;  %v1753_v41 = vsub.f32 %v6106_v14, %v1665_v19  ;;  %v1757_v31 = vsub.f32 %v5428_v40, %v1665_v19  ;;  %v6109_v16 = vld [vmem:[#allocation22_spill] sm:$0xff] }
 0x31f   :  { %4103 = vpow2.f32 %v1842_v46  ;;  %v1796_v55 = vmul.f32 1.442695, %v1729_v28  ;;  %v5608_v2 = vpop.eup %4089  ;;  %v1804_v20 = vmul.f32 1.442695, %v1733_v34  ;;  %v1812_v36 = vmul.f32 1.442695, %v1737_v59 }
 0x320   :  { %4105 = vpow2.f32 %v1850_v6  ;;  %v1820_v4 = vmul.f32 1.442695, %v1741_v1  ;;  %v5610_v39 = vadd.f32 %v2392_v38, %v2391_v56  ;;  %v1828_v21 = vmul.f32 1.442695, %v1745_v43  ;;  %v4213_v56 = vld [vmem:[%s6044_s0 + $0x10] sm:$0xff] }
 0x321   :  { %4107 = vpow2.f32 %v1796_v55  ;;  %v1836_v50 = vmul.f32 1.442695, %v1749_v53  ;;  %v1844_v61 = vmul.f32 1.442695, %v1753_v41  ;;  %v1713_v5 = vmax.f32 %v1711_v0, %v1712_v25  ;;  %v6110_v46 = vld [vmem:[#allocation27_spill] sm:$0xff] }
 0x322   :  { %4109 = vpow2.f32 %v1804_v20  ;;  %v1696_v8 = vmax.f32 %v1695_v23, %v6107_v52  ;;  %v1852_v40 = vmul.f32 1.442695, %v1757_v31  ;;  %v1714_v54 = vsel %vm577_vm0, %v6108_v60, -inf  ;;  %v4215_v19 = vld [vmem:[%s6044_s0 + $0x50] sm:$0xff] }
 0x323   :  { %v4092_v51 = vpop.eup %4091  ;;  %4111 = vpow2.f32 %v1812_v36  ;;  %v1716_v35 = vsel %vm577_vm0, %v5554_v17, -inf  ;;  %v1715_v63 = vmax.f32 %v1713_v5, %v1714_v54  ;;  %v5626_v13 = vmul.f32 %v6110_v46, %v6109_v16  ;;  %v4216_v34 = vld [vmem:[%s6044_s0 + $0x70] sm:$0xff] }
 0x324   :  { %v4094_v7 = vpop.eup %4093  ;;  %v2056_v30 = vmul.f32 %v4213_v56, %v4092_v51  ;;  %4113 = vpow2.f32 %v1820_v4  ;;  %v1697_v57 = vmax.f32 %v1696_v8, %v5552_v9  ;;  %v4217_v43 = vld [vmem:[%s6044_s0 + $0x90] sm:$0xff]  ;;  %v5644_v14 = vsel %vm577_vm0, %v5561_v49, -inf }
 0x325   :  { %v4096_v26 = vpop.eup %4095  ;;  %v1944_v24 = vadd.f32 %v4094_v7, %v4092_v51  ;;  %v2060_v38 = vmul.f32 %v4214_v48, %v4094_v7  ;;  %4115 = vpow2.f32 %v1828_v21  ;;  %v5631_v23 = vmax.f32 %v1715_v63, %v1716_v35  ;;  %v4218_v55 = vld [vmem:[%s6044_s0 + $0xb0] sm:$0xff] }
 0x326   :  { %v4098_v6 = vpop.eup %4097  ;;  %v2064_v33 = vmul.f32 %v4215_v19, %v4096_v26  ;;  %v2248_v0 = vmul.f32 %v4213_v56, %v2056_v30  ;;  %4117 = vpow2.f32 %v1836_v50  ;;  %v5640_v53 = vmax.f32 %v1697_v57, %v5556_v58  ;;  %v4219_v50 = vld [vmem:[%s6044_s0 + $0xd0] sm:$0xff] }
 0x327   :  { %v4100_v25 = vpop.eup %4099  ;;  %v1945_v28 = vadd.f32 %v4096_v26, %v1944_v24  ;;  %v2068_v59 = vmul.f32 %v4216_v34, %v4098_v6  ;;  %v2144_v29 = vadd.f32 %v2060_v38, %v2056_v30  ;;  %v2252_v1 = vmul.f32 %v4214_v48, %v2060_v38  ;;  %v4220_v35 = vld [vmem:[%s6044_s0 + $0xf0] sm:$0xff] }
 0x328   :  { %v4102_v44 = vpop.eup %4101  ;;  %v2072_v3 = vmul.f32 %v4217_v43, %v4100_v25  ;;  %4119 = vpow2.f32 %v1844_v61  ;;  %v2256_v4 = vmul.f32 %v4215_v19, %v2064_v33  ;;  %v5660_v19 = vld [vmem:[%s6044_s0 + $0x18] sm:$0xff] }
 0x329   :  { %v4104_v41 = vpop.eup %4103  ;;  %v1946_v31 = vadd.f32 %v4098_v6, %v1945_v28  ;;  %v2076_v20 = vmul.f32 %v4218_v55, %v4102_v44  ;;  %v2145_v36 = vadd.f32 %v2144_v29, %v2064_v33  ;;  %v2260_v5 = vmul.f32 %v4216_v34, %v2068_v59 }
 0x32a   :  { %v4106_v21 = vpop.eup %4105  ;;  %v2080_v61 = vmul.f32 %v4219_v50, %v4104_v41  ;;  %v2336_v8 = vadd.f32 %v2252_v1, %v2248_v0  ;;  %4121 = vpow2.f32 %v1852_v40  ;;  %v2264_v30 = vmul.f32 %v4217_v43, %v2072_v3 }
 0x32b   :  { %v4108_v51 = vpop.eup %4107  ;;  %v1947_v54 = vadd.f32 %v4100_v25, %v1946_v31  ;;  %v2084_v7 = vmul.f32 %v4220_v35, %v4106_v21  ;;  %v2146_v56 = vadd.f32 %v2145_v36, %v2068_v59  ;;  %v2268_v57 = vmul.f32 %v4218_v55, %v2076_v20 }
 0x32c   :  { %v4110_v63 = vpop.eup %4109  ;;  %v2272_v26 = vmul.f32 %v4219_v50, %v2080_v61  ;;  %v2337_v24 = vadd.f32 %v2336_v8, %v2256_v4  ;;  %v1957_v48 = vsel %vm577_vm0, %v4108_v51, 0.0  ;;  %v5663_v33 = vmul.f32 %v5660_v19, %v4108_v51 }
 0x32d   :  { %v4112_v38 = vpop.eup %4111  ;;  %v1948_v16 = vadd.f32 %v4102_v44, %v1947_v54  ;;  %v2147_v6 = vadd.f32 %v2146_v56, %v2072_v3  ;;  %v1958_v40 = vsel %vm577_vm0, %v4110_v63, 0.0  ;;  %v2276_v25 = vmul.f32 %v4220_v35, %v2084_v7  ;;  %v4222_v3 = vld [vmem:[%s6044_s0 + $0x38] sm:$0xff] }
 0x32e   :  { %v4114_v0 = vpop.eup %4113  ;;  %v2338_v28 = vadd.f32 %v2337_v24, %v2260_v5  ;;  %v1959_v34 = vadd.f32 %v1958_v40, %v1957_v48  ;;  %v1960_v59 = vsel %vm577_vm0, %v4112_v38, 0.0  ;;  %v2061_v31 = vmul.f32 %v4222_v3, %v4110_v63  ;;  %v4223_v5 = vld [vmem:[%s6044_s0 + $0x58] sm:$0xff] }
 0x32f   :  { %v4116_v29 = vpop.eup %4115  ;;  %v1949_v1 = vadd.f32 %v4104_v41, %v1948_v16  ;;  %v2148_v44 = vadd.f32 %v2147_v6, %v2076_v20  ;;  %v1962_v43 = vsel %vm577_vm0, %v4114_v0, 0.0  ;;  %v2065_v8 = vmul.f32 %v4223_v5, %v4112_v38  ;;  %v4224_v54 = vld [vmem:[%s6044_s0 + $0x78] sm:$0xff] }
 0x330   :  { %v4118_v55 = vpop.eup %4117  ;;  %v2339_v36 = vadd.f32 %v2338_v28, %v2264_v30  ;;  %v1961_v4 = vadd.f32 %v1960_v59, %v1959_v34  ;;  %v1964_v50 = vsel %vm577_vm0, %v4116_v29, 0.0  ;;  %v2069_v35 = vmul.f32 %v4224_v54, %v4114_v0  ;;  %v4225_v24 = vld [vmem:[%s6044_s0 + $0x98] sm:$0xff] }
 0x331   :  { %v1950_v51 = vadd.f32 %v4106_v21, %v1949_v1  ;;  %v2149_v41 = vadd.f32 %v2148_v44, %v2080_v61  ;;  %v1966_v20 = vsel %vm577_vm0, %v4118_v55, 0.0  ;;  %v2073_v48 = vmul.f32 %v4225_v24, %v4116_v29  ;;  %v4226_v21 = vld [vmem:[%s6044_s0 + $0xb8] sm:$0xff] }
 0x332   :  { %v4120_v56 = vpop.eup %4119  ;;  %v2340_v63 = vadd.f32 %v2339_v36, %v2268_v57  ;;  %v1963_v30 = vadd.f32 %v1962_v43, %v1961_v4  ;;  %v2077_v61 = vmul.f32 %v4226_v21, %v4118_v55  ;;  %v2157_v40 = vsel %vm577_vm0, %v5663_v33, 0.0  ;;  %v4227_v34 = vld [vmem:[%s6044_s0 + $0xd8] sm:$0xff] }
 0x333   :  { %v1951_v38 = vrot.slane %v1950_v51, 4  ;;  %v2150_v16 = vadd.f32 %v2149_v41, %v2084_v7  ;;  %v1968_v6 = vsel %vm577_vm0, %v4120_v56, 0.0  ;;  %v2081_v59 = vmul.f32 %v4227_v34, %v4120_v56  ;;  %v4228_v7 = vld [vmem:[%s6044_s0 + $0xf8] sm:$0xff] }
 0x334   :  { %v4122_v0 = vpop.eup %4121  ;;  %v2341_v57 = vadd.f32 %v2340_v63, %v2272_v26  ;;  %v1965_v28 = vadd.f32 %v1964_v50, %v1963_v30  ;;  %v2158_v29 = vsel %vm577_vm0, %v2061_v31, 0.0  ;;  %v2160_v55 = vsel %vm577_vm0, %v2065_v8, 0.0 }
 0x335   :  { %v1952_v1 = vadd.f32 %v1951_v38, %v1950_v51  ;;  %v2151_v44 = vrot.slane %v2150_v16, 4  ;;  %v2085_v43 = vmul.f32 %v4228_v7, %v4122_v0  ;;  %v1970_v26 = vsel %vm577_vm0, %v4122_v0, 0.0 }
 0x336   :  { %v2342_v36 = vadd.f32 %v2341_v57, %v2276_v25  ;;  %v1967_v4 = vadd.f32 %v1966_v20, %v1965_v28  ;;  %v2159_v50 = vadd.f32 %v2158_v29, %v2157_v40  ;;  %v2162_v56 = vsel %vm577_vm0, %v2069_v35, 0.0 }
 0x337   :  { %v1953_v41 = vrot.slane %v1952_v1, 2  ;;  %v2152_v63 = vadd.f32 %v2151_v44, %v2150_v16  ;;  %v2164_v30 = vsel %vm577_vm0, %v2073_v48, 0.0  ;;  %v2166_v49 = vsel %vm577_vm0, %v2077_v61, 0.0 }
 0x338   :  { %v2343_v51 = vrot.slane %v2342_v36, 4  ;;  %v1969_v38 = vadd.f32 %v1968_v6, %v1967_v4  ;;  %v2161_v10 = vadd.f32 %v2160_v55, %v2159_v50  ;;  %v2168_v11 = vsel %vm577_vm0, %v2081_v59, 0.0 }
 0x339   :  { %v1954_v17 = vadd.f32 %v1953_v41, %v1952_v1  ;;  %v2153_v60 = vrot.slane %v2152_v63, 2  ;;  %v2170_v25 = vsel %vm577_vm0, %v2085_v43, 0.0  ;;  %v2249_v16 = vmul.f32 %v5660_v19, %v5663_v33 }
 0x33a   :  { %v2344_v20 = vadd.f32 %v2343_v51, %v2342_v36  ;;  %v1971_v0 = vadd.f32 %v1970_v26, %v1969_v38  ;;  %v2163_v40 = vadd.f32 %v2162_v56, %v2161_v10  ;;  %v2253_v29 = vmul.f32 %v4222_v3, %v2061_v31 }
 0x33b   :  { %v1955_v57 = vrot.slane %v1954_v17, 1  ;;  %v2154_v28 = vadd.f32 %v2153_v60, %v2152_v63  ;;  %v2257_v44 = vmul.f32 %v4223_v5, %v2065_v8  ;;  %v2261_v50 = vmul.f32 %v4224_v54, %v2069_v35 }
 0x33c   :  { %v2345_v6 = vrot.slane %v2344_v20, 2  ;;  %v1972_v55 = vrot.slane %v1971_v0, 4  ;;  %v2165_v4 = vadd.f32 %v2164_v30, %v2163_v40  ;;  %v2265_v12 = vmul.f32 %v4225_v24, %v2073_v48  ;;  %v6111_v30 = vld [vmem:[#allocation30_spill] sm:$0xff] }
 0x33d   :  { %v1956_v1 = vadd.f32 %v1955_v57, %v1954_v17  ;;  %v2155_v41 = vrot.slane %v2154_v28, 1  ;;  %v2269_v22 = vmul.f32 %v4226_v21, %v2077_v61  ;;  %v2273_v26 = vmul.f32 %v4227_v34, %v2081_v59 }
 0x33e   :  { %v2346_v18 = vadd.f32 %v2345_v6, %v2344_v20  ;;  %v1973_v45 = vadd.f32 %v1972_v55, %v1971_v0  ;;  %v2167_v36 = vadd.f32 %v2166_v49, %v2165_v4  ;;  %v2277_v10 = vmul.f32 %v4228_v7, %v2085_v43 }
 0x33f   :  { %4123 = vrcp.f32 %v1956_v1  ;;  %v2349_v19 = vsel %vm577_vm0, %v2249_v16, 0.0  ;;  %v2350_v60 = vsel %vm577_vm0, %v2253_v29, 0.0  ;;  %v2156_v8 = vadd.f32 %v2155_v41, %v2154_v28 }
 0x340   :  { %v2347_v33 = vrot.slane %v2346_v18, 1  ;;  %v1974_v3 = vrot.slane %v1973_v45, 2  ;;  %v2169_v31 = vadd.f32 %v2168_v11, %v2167_v36  ;;  %v2351_v5 = vadd.f32 %v2350_v60, %v2349_v19  ;;  %v6112_v60 = vld [vmem:[#allocation23_spill] sm:$0xff] }
 0x341   :  { %v2352_v17 = vsel %vm577_vm0, %v2257_v44, 0.0  ;;  %v2354_v54 = vsel %vm577_vm0, %v2261_v50, 0.0  ;;  %v2356_v35 = vsel %vm577_vm0, %v2265_v12, 0.0  ;;  %v2358_v21 = vsel %vm577_vm0, %v2269_v22, 0.0 }
 0x342   :  { %v1975_v24 = vadd.f32 %v1974_v3, %v1973_v45  ;;  %v2171_v49 = vadd.f32 %v2170_v25, %v2169_v31  ;;  %v2353_v48 = vadd.f32 %v2352_v17, %v2351_v5  ;;  %v2348_v61 = vadd.f32 %v2347_v33, %v2346_v18 }
 0x343   :  { %v2360_v34 = vsel %vm577_vm0, %v2273_v26, 0.0  ;;  %v1699_v59 = vrot.slane %v5640_v53, 4  ;;  %v1719_v11 = vmax.f32 %v5631_v23, %v5644_v14  ;;  %v5715_v56 = vmul.f32 %v5608_v2, %v5593_v42 }
 0x344   :  { %v1976_v7 = vrot.slane %v1975_v24, 1  ;;  %v2172_v43 = vrot.slane %v2171_v49, 4  ;;  %v2355_v63 = vadd.f32 %v2354_v54, %v2353_v48  ;;  %v2334_v22 = vrot.slane %v6111_v30, 1 }
 0x345   :  { %v1700_v45 = vmax.f32 %v5640_v53, %v1699_v59  ;;  %v1720_v12 = vrot.slane %v1719_v11, 4  ;;  %v2394_v18 = vrot.slane %v5610_v39, 1  ;;  %v2362_v25 = vsel %vm577_vm0, %v2277_v10, 0.0 }
 0x346   :  { %v2173_v51 = vadd.f32 %v2172_v43, %v2171_v49  ;;  %v2357_v38 = vadd.f32 %v2356_v35, %v2355_v63  ;;  %v2439_v23 = vmul.f32 %v5626_v13, %v5626_v13  ;;  %v2335_v0 = vadd.f32 %v2334_v22, %v6111_v30 }
 0x347   :  { %v1701_v14 = vrot.slane %v1700_v45, 2  ;;  %v1721_v20 = vmax.f32 %v1719_v11, %v1720_v12  ;;  %v2395_v42 = vadd.f32 %v2394_v18, %v5610_v39  ;;  %v1977_v40 = vadd.f32 %v1976_v7, %v1975_v24  ;;  %v6116_v18 = vld [vmem:[#allocation29_spill] sm:$0xff] }
 0x348   :  { %v2174_v53 = vrot.slane %v2173_v51, 2  ;;  %v2359_v16 = vadd.f32 %v2358_v21, %v2357_v38  ;;  %v2443_v57 = vmul.f32 %v5715_v56, %v5715_v56  ;;  %v2431_v6 = vmul.f32 %v6110_v46, %v2335_v0  ;;  %v6117_v38 = vld [vmem:[#allocation31_spill] sm:$0xff]  ;;  %v6119_v0 = vld [vmem:[#allocation34_spill] sm:$0xff] }
 0x349   :  { %v4124_v28 = vpop.eup %4123  ;;  %v1702_v29 = vmax.f32 %v1700_v45, %v1701_v14  ;;  %v1722_v44 = vrot.slane %v1721_v20, 2  ;;  %v2435_v55 = vmul.f32 %v5608_v2, %v2395_v42  ;;  %v5735_v33 = vmul.f32 %v6112_v60, %v6112_v60  ;;  %v6118_v14 = vld [vmem:[#allocation33_spill] sm:$0xff] }
 0x34a   :  { %v5729_v4 = vmul.f32 %v4124_v28, %v2156_v8  ;;  %v5731_v50 = vmul.f32 %v4124_v28, %v2348_v61  ;;  %v2175_v1 = vadd.f32 %v2174_v53, %v2173_v51  ;;  %v2361_v41 = vadd.f32 %v2360_v34, %v2359_v16  ;;  %v6120_v16 = vld [vmem:[#allocation35_spill] sm:$0xff] }
 0x34b   :  { %v1703_v39 = vrot.slane %v1702_v29, 1  ;;  %v1723_v36 = vmax.f32 %v1721_v20, %v1722_v44  ;;  %v2447_v26 = vsub.f32 %v2431_v6, %v2439_v23  ;;  %v2451_v10 = vsub.f32 %v2435_v55, %v2443_v57  ;;  %v5773_v44 = vld [vmem:[%s6051_s7] sm:$0xf] }
 0x34c   :  { %v2363_v19 = vadd.f32 %v2362_v25, %v2361_v41  ;;  %v5739_v46 = vmul.f32 %v5589_v62, %v5589_v62  ;;  %4125 = vrcp.f32 %v1977_v40  ;;  %v2176_v3 = vrot.slane %v2175_v1, 1 }
 0x34d   :  { %v1704_v2 = vmax.f32 %v1702_v29, %v1703_v39  ;;  %v1724_v5 = vrot.slane %v1723_v36, 1  ;;  %v5741_v8 = vmax.f32 %v2447_v26, 0.0001  ;;  %v5768_v29 = vld [vmem:[%s6050_s6] sm:$0xf] }
 0x34e   :  { %v2364_v31 = vrot.slane %v2363_v19, 4  ;;  %v2177_v53 = vadd.f32 %v2176_v3, %v2175_v1 }
 0x34f   :  { %v1760_v17 = vsub.f32 %v5445_v47, %v1704_v2  ;;  %v1764_v54 = vsub.f32 %v5455_v32, %v1704_v2  ;;  %v1768_v35 = vsub.f32 %v5478_v27, %v1704_v2  ;;  %v1772_v24 = vsub.f32 %v5492_v15, %v1704_v2 }
 0x350   :  { %v2365_v49 = vadd.f32 %v2364_v31, %v2363_v19  ;;  %v1776_v48 = vsub.f32 %v5526_v37, %v1704_v2  ;;  %v1780_v21 = vsub.f32 %v6107_v52, %v1704_v2  ;;  %v1784_v61 = vsub.f32 %v5552_v9, %v1704_v2  ;;  %v6113_v37 = vld [vmem:[#allocation25_spill] sm:$0xff]  ;;  %v6114_v9 = vld [vmem:[#allocation26_spill] sm:$0xff]  ;;  %v3911_v31 = vld [vmem:[#allocation8 + $0x80] sm:$0xff]  }
 0x351   :  { %v1788_v34 = vsub.f32 %v5556_v58, %v1704_v2  ;;  %v1858_v59 = vmul.f32 1.442695, %v1760_v17  ;;  %v1866_v11 = vmul.f32 1.442695, %v1764_v54  ;;  %v1874_v7 = vmul.f32 1.442695, %v1768_v35 }
 0x352   :  { %v2366_v43 = vrot.slane %v2365_v49, 2  ;;  %v1882_v47 = vmul.f32 1.442695, %v1772_v24  ;;  %v1725_v63 = vmax.f32 %v1723_v36, %v1724_v5  ;;  %v5751_v32 = vmax.f32 %v2451_v10, 0.0001  ;;  %v6115_v58 = vld [vmem:[#allocation28_spill] sm:$0xff] }
 0x353   :  { %4127 = vpow2.f32 %v1858_v59  ;;  %v1890_v27 = vmul.f32 1.442695, %v1776_v48  ;;  %v1898_v15 = vmul.f32 1.442695, %v1780_v21  ;;  %v1906_v45 = vmul.f32 1.442695, %v1784_v61 }
 0x354   :  { %v5753_v12 = vadd.f32 %v2366_v43, %v2365_v49  ;;  %4129 = vpow2.f32 %v1866_v11  ;;  %v1761_v52 = vsub.f32 %v6113_v37, %v1725_v63  ;;  %v1765_v30 = vsub.f32 %v6114_v9, %v1725_v63  ;;  %v6121_v10 = vld [vmem:[#allocation24_spill] sm:$0xff]  ;;  %v6123_v17 = vld [vmem:[#allocation17_spill] sm:$0xff]  ;;  %v4229_v11 = vld [vmem:[%s6044_s0 + $0x110] sm:$0xff] }
 0x355   :  { %4131 = vpow2.f32 %v1874_v7  ;;  %v1769_v22 = vsub.f32 %v6115_v58, %v1725_v63  ;;  %v1773_v51 = vsub.f32 %v6116_v18, %v1725_v63  ;;  %v1777_v25 = vsub.f32 %v6117_v38, %v1725_v63  ;;  %v6122_v2 = vld [vmem:[#allocation36_spill] sm:$0xff] }
 0x356   :  { %4133 = vpow2.f32 %v1882_v47  ;;  %v1914_v23 = vmul.f32 1.442695, %v1788_v34  ;;  %v1781_v20 = vsub.f32 %v6118_v14, %v1725_v63  ;;  %v1785_v42 = vsub.f32 %v6119_v0, %v1725_v63  ;;  %v5762_v40 = vpop.eup %4125  ;;  %v6124_v61 = vld [vmem:[#allocation16_spill] sm:$0xff] }
 0x357   :  { %4135 = vpow2.f32 %v1890_v27  ;;  %v1789_v57 = vsub.f32 %v6120_v16, %v1725_v63  ;;  %v1860_v28 = vmul.f32 1.442695, %v1761_v52  ;;  %v1868_v55 = vmul.f32 1.442695, %v1765_v30  ;;  %v3915_v43 = vld [vmem:[#allocation8 + $0x88] sm:$0xff]   ;;  %v4230_v27 = vld [vmem:[%s6044_s0 + $0x130] sm:$0xff] }
 0x358   :  { %4137 = vpow2.f32 %v1898_v15  ;;  %v1876_v41 = vmul.f32 1.442695, %v1769_v22  ;;  %v1884_v1 = vmul.f32 1.442695, %v1773_v51  ;;  %v1892_v39 = vmul.f32 1.442695, %v1777_v25 }
 0x359   :  { %4139 = vpow2.f32 %v1906_v45  ;;  %v1900_v36 = vmul.f32 1.442695, %v1781_v20  ;;  %v1908_v26 = vmul.f32 1.442695, %v1785_v42  ;;  %v2446_v19 = vsub.f32 %v6121_v10, %v5735_v33  ;;  %v4231_v52 = vld [vmem:[%s6044_s0 + $0x150] sm:$0xff] }
 0x35a   :  { %4141 = vpow2.f32 %v1914_v23  ;;  %v2450_v3 = vsub.f32 %v6122_v2, %v5739_v46  ;;  %v1916_v5 = vmul.f32 1.442695, %v1789_v57  ;;  %v2487_v54 = vrot.slane %v5768_v29, %v6123_v17  ;;  %v4232_v51 = vld [vmem:[%s6044_s0 + $0x170] sm:$0xff] }
 0x35b   :  { %4143 = vpow2.f32 %v1860_v28  ;;  %v2517_v35 = vrot.slane %v5773_v44, %v6123_v17  ;;  %v5784_v24 = vmax.f32 %v2446_v19, 0.0001  ;;  %v4369_v21 = vmov 0   ;;  %v4233_v20 = vld [vmem:[%s6044_s0 + $0x190] sm:$0xff] }
 0x35c   :  { %4145 = vpow2.f32 %v1868_v55  ;;  %v5786_v49 = vmax.f32 %v2450_v3, 0.0001  ;;  %v2501_v33 = vmul.f32 %v2487_v54, %v5626_v13  ;;  %v2505_v46 = vmul.f32 %v2487_v54, %v5715_v56  ;;  %3015 = vmatprep.subr.bf16.mxu1 %v4369_v21  ;;  %v3918_v16 = vld [vmem:[#allocation8 + $0x90] sm:$0xff]  }
 0x35d   :  { %v4128_v48 = vpop.eup %4127  ;;  %4147 = vpow2.f32 %v1876_v41  ;;  %v5793_v34 = vrot.slane %v5768_v29, %v6124_v61  ;;  %3016 = vmatpush1.bf16.msra.mxu1 %v3911_v31  ;;  %v5800_v13 = vrot.slane %v5773_v44, %v6124_v61  ;;  %v5803_v56 = vmul.f32 %v5762_v40, %v2177_v53  ;;  %v4234_v55 = vld [vmem:[%s6044_s0 + $0x1b0] sm:$0xff] }
 0x35e   :  { %v4130_v59 = vpop.eup %4129  ;;  %v2088_v7 = vmul.f32 %v4229_v11, %v4128_v48  ;;  %4149 = vpow2.f32 %v1884_v1  ;;  %v5808_v45 = vadd.f32 %v2517_v35, %v2501_v33  ;;  %3017 = vmatprep.subr.bf16.mxu1 %v4369_v21  ;;  %v5814_v58 = vadd.f32 %v2517_v35, %v2505_v46  ;;  %v4236_v54 = vld [vmem:[%s6044_s0 + $0x1f0] sm:$0xff] }
 0x35f   :  { %v4132_v47 = vpop.eup %4131  ;;  %v2004_v63 = vadd.f32 %v4130_v59, %v4128_v48  ;;  %v2092_v15 = vmul.f32 %v4230_v27, %v4130_v59  ;;  %4151 = vpow2.f32 %v1892_v39 }
 0x360   :  { %v4134_v37 = vpop.eup %4133  ;;  %v2096_v9 = vmul.f32 %v4231_v52, %v4132_v47  ;;  %v2280_v30 = vmul.f32 %v4229_v11, %v2088_v7  ;;  %4153 = vpow2.f32 %v1900_v36 }
 0x361   :  { %v4136_v22 = vpop.eup %4135  ;;  %v2005_v18 = vadd.f32 %v4132_v47, %v2004_v63  ;;  %v2100_v38 = vmul.f32 %v4232_v51, %v4134_v37  ;;  %v2204_v25 = vadd.f32 %v2092_v15, %v2088_v7  ;;  %v2284_v23 = vmul.f32 %v4230_v27, %v2092_v15  ;;  %3018 = vmatpush1.bf16.msra.mxu1 %v3915_v43  ;;  %v5837_v43 = vld [vmem:[%s6044_s0 + $0x118] sm:$0xff] }
 0x362   :  { %v4138_v14 = vpop.eup %4137  ;;  %v2104_v0 = vmul.f32 %v4233_v20, %v4136_v22  ;;  %v2288_v42 = vmul.f32 %v4231_v52, %v2096_v9  ;;  %4155 = vpow2.f32 %v1908_v26  ;;  %3019 = vmatprep.subr.bf16.mxu1 %v4369_v21  ;;  %v4235_v26 = vld [vmem:[%s6044_s0 + $0x1d0] sm:$0xff] }
 0x363   :  { %v4140_v57 = vpop.eup %4139  ;;  %v2006_v28 = vadd.f32 %v4134_v37, %v2005_v18  ;;  %v2108_v41 = vmul.f32 %v4234_v55, %v4138_v14  ;;  %v2205_v1 = vadd.f32 %v2204_v25, %v2096_v9  ;;  %v2292_v39 = vmul.f32 %v4232_v51, %v2100_v38  ;;  %v3921_v47 = vld [vmem:[#allocation8 + $0x98] sm:$0xff]  }
 0x364   :  { %v4142_v36 = vpop.eup %4141  ;;  %v2112_v10 = vmul.f32 %v4235_v26, %v4140_v57  ;;  %v2296_v19 = vmul.f32 %v4233_v20, %v2104_v0  ;;  %v2396_v2 = vadd.f32 %v2284_v23, %v2280_v30  ;;  %4157 = vpow2.f32 %v1916_v5  ;;  %v5848_v51 = vld [vmem:[%s6044_s0 + $0x138] sm:$0xff] }
 0x365   :  { %v4144_v3 = vpop.eup %4143  ;;  %v2007_v31 = vadd.f32 %v4136_v22, %v2006_v28  ;;  %v2116_v35 = vmul.f32 %v4236_v54, %v4142_v36  ;;  %v2206_v48 = vadd.f32 %v2205_v1, %v2100_v38  ;;  %v2300_v33 = vmul.f32 %v4234_v55, %v2108_v41  ;;  %3020 = vmatpush1.bf16.msra.mxu1 %v3918_v16 }
 0x366   :  { %v4146_v46 = vpop.eup %4145  ;;  %v2304_v59 = vmul.f32 %v4235_v26, %v2112_v10  ;;  %v2397_v11 = vadd.f32 %v2396_v2, %v2288_v42  ;;  %v2017_v7 = vsel %vm577_vm0, %v4144_v3, 0.0  ;;  %v5840_v5 = vmul.f32 %v5837_v43, %v4144_v3  ;;  %3021 = vmatprep.subr.bf16.mxu1 %v4369_v21 }
 0x367   :  { %v4148_v63 = vpop.eup %4147  ;;  %v2008_v27 = vadd.f32 %v4138_v14, %v2007_v31  ;;  %v2207_v15 = vadd.f32 %v2206_v48, %v2104_v0  ;;  %v2308_v37 = vmul.f32 %v4236_v54, %v2116_v35  ;;  %v2018_v52 = vsel %vm577_vm0, %v4146_v46, 0.0  ;;  %v5857_v0 = vld [vmem:[%s6044_s0 + $0x158] sm:$0xff] }
 0x368   :  { %v4150_v9 = vpop.eup %4149  ;;  %v2398_v30 = vadd.f32 %v2397_v11, %v2292_v39  ;;  %v2019_v22 = vadd.f32 %v2018_v52, %v2017_v7  ;;  %v2020_v18 = vsel %vm577_vm0, %v4148_v63, 0.0  ;;  %v5851_v38 = vmul.f32 %v5848_v51, %v4146_v46  ;;  %v3925_v39 = vld [vmem:[#allocation8 + $0xa0] sm:$0xff]  }
 0x369   :  { %v4152_v25 = vpop.eup %4151  ;;  %v2009_v23 = vadd.f32 %v4140_v57, %v2008_v27  ;;  %v2208_v14 = vadd.f32 %v2207_v15, %v2108_v41  ;;  %v2022_v20 = vsel %vm577_vm0, %v4150_v9, 0.0  ;;  %v5860_v42 = vmul.f32 %v5857_v0, %v4148_v63  ;;  %v4240_v57 = vld [vmem:[%s6044_s0 + $0x178] sm:$0xff]  ;;  %3022 = vmatpush1.bf16.msra.mxu1 %v3921_v47 }
 0x36a   :  { %v4154_v16 = vpop.eup %4153  ;;  %v2399_v28 = vadd.f32 %v2398_v30, %v2296_v19  ;;  %v2021_v55 = vadd.f32 %v2020_v18, %v2019_v22  ;;  %v2024_v1 = vsel %vm577_vm0, %v4152_v25, 0.0  ;;  %v2101_v41 = vmul.f32 %v4240_v57, %v4150_v9  ;;  %v4241_v31 = vld [vmem:[%s6044_s0 + $0x198] sm:$0xff]  ;;  %3023 = vmatprep.subr.bf16.mxu1 %v4369_v21  ;;  %v3928_v18 = vld [vmem:[#allocation8 + $0xa8] sm:$0xff]  }
 0x36b   :  { %v2010_v26 = vadd.f32 %v4142_v36, %v2009_v23  ;;  %v2209_v2 = vadd.f32 %v2208_v14, %v2112_v10  ;;  %v2026_v3 = vsel %vm577_vm0, %v4154_v16, 0.0  ;;  %v2105_v54 = vmul.f32 %v4241_v31, %v4152_v25  ;;  %v4242_v11 = vld [vmem:[%s6044_s0 + $0x1b8] sm:$0xff] }
 0x36c   :  { %v4156_v19 = vpop.eup %4155  ;;  %v2400_v48 = vadd.f32 %v2399_v28, %v2300_v33  ;;  %v2023_v46 = vadd.f32 %v2022_v20, %v2021_v55  ;;  %v2109_v7 = vmul.f32 %v4242_v11, %v4154_v16  ;;  %v2217_v36 = vsel %vm577_vm0, %v5840_v5, 0.0  ;;  %v4243_v27 = vld [vmem:[%s6044_s0 + $0x1d8] sm:$0xff] }
 0x36d   :  { %v2011_v10 = vrot.slane %v2010_v26, 4  ;;  %v2210_v47 = vadd.f32 %v2209_v2, %v2116_v35  ;;  %v2028_v63 = vsel %vm577_vm0, %v4156_v19, 0.0  ;;  %v2113_v15 = vmul.f32 %v4243_v27, %v4156_v19  ;;  %3024 = vmatpush1.bf16.msra.mxu1 %v3925_v39  ;;  %v4244_v14 = vld [vmem:[%s6044_s0 + $0x1f8] sm:$0xff] }
 0x36e   :  { %v4158_v52 = vpop.eup %4157  ;;  %v2401_v33 = vadd.f32 %v2400_v48, %v2304_v59  ;;  %v2025_v9 = vadd.f32 %v2024_v1, %v2023_v46  ;;  %v2218_v30 = vsel %vm577_vm0, %v5851_v38, 0.0  ;;  %v2220_v22 = vsel %vm577_vm0, %v5860_v42, 0.0  ;;  %3025 = vmatprep.subr.bf16.mxu1 %v4369_v21 }
 0x36f   :  { %v2012_v25 = vadd.f32 %v2011_v10, %v2010_v26  ;;  %v2211_v35 = vrot.slane %v2210_v47, 4  ;;  %v2030_v23 = vsel %vm577_vm0, %v4158_v52, 0.0  ;;  %v2117_v20 = vmul.f32 %v4244_v14, %v4158_v52  ;;  %v3931_v52 = vld [vmem:[#allocation8 + $0xb0] sm:$0xff]  }
 0x370   :  { %v2402_v59 = vadd.f32 %v2401_v33, %v2308_v37  ;;  %v2027_v16 = vadd.f32 %v2026_v3, %v2025_v9  ;;  %v2219_v28 = vadd.f32 %v2218_v30, %v2217_v36  ;;  %v2222_v55 = vsel %vm577_vm0, %v2101_v41, 0.0 }
 0x371   :  { %v2013_v1 = vrot.slane %v2012_v25, 2  ;;  %v2212_v2 = vadd.f32 %v2211_v35, %v2210_v47  ;;  %v2224_v39 = vsel %vm577_vm0, %v2105_v54, 0.0  ;;  %v2226_v26 = vsel %vm577_vm0, %v2109_v7, 0.0  ;;  %3026 = vmatpush1.bf16.msra.mxu1 %v3928_v18 }
 0x372   :  { %v2403_v19 = vrot.slane %v2402_v59, 4  ;;  %v2029_v48 = vadd.f32 %v2028_v63, %v2027_v16  ;;  %v2221_v46 = vadd.f32 %v2220_v22, %v2219_v28  ;;  %v2228_v10 = vsel %vm577_vm0, %v2113_v15, 0.0  ;;  %3027 = vmatprep.subr.bf16.mxu1 %v4369_v21 }
 0x373   :  { %v2014_v6 = vadd.f32 %v2013_v1, %v2012_v25  ;;  %v2213_v53 = vrot.slane %v2212_v2, 2  ;;  %v2230_v37 = vsel %vm577_vm0, %v2117_v20, 0.0  ;;  %v2281_v3 = vmul.f32 %v5837_v43, %v5840_v5  ;;  %v3932_v43 = vld [vmem:[#allocation8 + $0xb8] sm:$0xff]  }
 0x374   :  { %v2404_v36 = vadd.f32 %v2403_v19, %v2402_v59  ;;  %v2031_v47 = vadd.f32 %v2030_v23, %v2029_v48  ;;  %v2223_v33 = vadd.f32 %v2222_v55, %v2221_v46  ;;  %v2285_v63 = vmul.f32 %v5848_v51, %v5851_v38 }
 0x375   :  { %v2015_v9 = vrot.slane %v2014_v6, 1  ;;  %v2214_v30 = vadd.f32 %v2213_v53, %v2212_v2  ;;  %v2289_v22 = vmul.f32 %v5857_v0, %v5860_v42  ;;  %v2293_v18 = vmul.f32 %v4240_v57, %v2101_v41  ;;  %3028 = vmatpush1.bf16.msra.mxu1 %v3931_v52 }
 0x376   :  { %v2405_v25 = vrot.slane %v2404_v36, 2  ;;  %v2032_v35 = vrot.slane %v2031_v47, 4  ;;  %v2225_v16 = vadd.f32 %v2224_v39, %v2223_v33  ;;  %v2297_v28 = vmul.f32 %v4241_v31, %v2105_v54  ;;  %3029 = vmatprep.subr.bf16.mxu1 %v4369_v21 }
 0x377   :  { %v2016_v5 = vadd.f32 %v2015_v9, %v2014_v6  ;;  %v2215_v1 = vrot.slane %v2214_v30, 1  ;;  %v2301_v59 = vmul.f32 %v4242_v11, %v2109_v7  ;;  %v2305_v23 = vmul.f32 %v4243_v27, %v2113_v15  ;;  %v3933_v6 = vld [vmem:[#allocation8 + $0xc0] sm:$0xff]  }
 0x378   :  { %v2406_v55 = vadd.f32 %v2405_v25, %v2404_v36  ;;  %v2033_v51 = vadd.f32 %v2032_v35, %v2031_v47  ;;  %v2227_v38 = vadd.f32 %v2226_v26, %v2225_v16  ;;  %v2309_v53 = vmul.f32 %v4244_v14, %v2117_v20  ;;  %v3934_v36 = vld [vmem:[#allocation8 + $0xc8] sm:$0xff]  }
 0x379   :  { %4159 = vrcp.f32 %v2016_v5  ;;  %v2216_v2 = vadd.f32 %v2215_v1, %v2214_v30  ;;  %v2409_v0 = vsel %vm577_vm0, %v2281_v3, 0.0  ;;  %v2410_v42 = vsel %vm577_vm0, %v2285_v63, 0.0  ;;  %3030 = vmatpush1.bf16.msra.mxu1 %v3932_v43  ;;  %v5931_v1 = vld [vmem:[%s6052_s8] sm:$0xf] }
 0x37a   :  { %v2407_v57 = vrot.slane %v2406_v55, 1  ;;  %v2034_v41 = vrot.slane %v2033_v51, 2  ;;  %v2229_v31 = vadd.f32 %v2228_v10, %v2227_v38  ;;  %v2411_v54 = vadd.f32 %v2410_v42, %v2409_v0  ;;  %3031 = vmatprep.subr.bf16.mxu1 %v4369_v21 }
 0x37b   :  { %v2412_v11 = vsel %vm577_vm0, %v2289_v22, 0.0  ;;  %v2414_v7 = vsel %vm577_vm0, %v2293_v18, 0.0  ;;  %v2416_v27 = vsel %vm577_vm0, %v2297_v28, 0.0  ;;  %v2418_v15 = vsel %vm577_vm0, %v2301_v59, 0.0  ;;  %v3935_v28 = vld [vmem:[#allocation8 + $0xd0] sm:$0xff]  }
 0x37c   :  { %v2408_v14 = vadd.f32 %v2407_v57, %v2406_v55  ;;  %v2035_v20 = vadd.f32 %v2034_v41, %v2033_v51  ;;  %v2231_v39 = vadd.f32 %v2230_v37, %v2229_v31  ;;  %v2413_v26 = vadd.f32 %v2412_v11, %v2411_v54 }
 0x37d   :  { %v2420_v19 = vsel %vm577_vm0, %v2305_v23, 0.0  ;;  %v2422_v48 = vsel %vm577_vm0, %v2309_v53, 0.0  ;;  %4161 = vrsqrt.f32 %v5741_v8  ;;  %v2543_v46 = vmax.f32 %v5814_v58, 0.0  ;;  %3032 = vmatpush1.bf16.msra.mxu1 %v3933_v6  ;;  %v5944_v53 = vld [vmem:[%s6053_s9] sm:$0xf]  ;;  %v3936_v6 = vld [vmem:[#allocation8 + $0xd8] sm:$0xff]  }
 0x37e   :  { %v2036_v10 = vrot.slane %v2035_v20, 1  ;;  %v2232_v52 = vrot.slane %v2231_v39, 4  ;;  %v2415_v3 = vadd.f32 %v2414_v7, %v2413_v26  ;;  %4163 = vrsqrt.f32 %v5751_v32  ;;  %3033 = vmatprep.subr.bf16.mxu1 %v4369_v21 }
 0x37f   :  { %4165 = vrsqrt.f32 %v5784_v24  ;;  %v6125_v37 = vmax.f32 %v5808_v45, 0.0  ;;  %v2619_v33 = vpack.c.bf16 %v2543_v46, %v2543_v46  ;;  %v2500_v63 = vmul.f32 %v5793_v34, %v6112_v60 }
 0x380   :  { %v2037_v58 = vadd.f32 %v2036_v10, %v2035_v20  ;;  %v2233_v9 = vadd.f32 %v2232_v52, %v2231_v39  ;;  %v2417_v30 = vadd.f32 %v2416_v27, %v2415_v3  ;;  %4167 = vrsqrt.f32 %v5786_v49 }
 0x381   :  { %v2615_v47 = vpack.c.bf16 %v6125_v37, %v6125_v37  ;;  %v3068_v18 = vunpack.c.l.b16 %v2619_v33  ;;  %v2504_v25 = vmul.f32 %v5793_v34, %v5589_v62  ;;  %v2530_v45 = vadd.f32 %v5800_v13, %v2500_v63  ;;  %3034 = vmatpush1.bf16.msra.mxu1 %v3934_v36  ;;  %v3937_v33 = vld [vmem:[#allocation8 + $0xe0] sm:$0xff]  }
 0x382   :  { %4169 = vrcp.f32 %v2037_v58  ;;  %v2234_v35 = vrot.slane %v2233_v9, 2  ;;  %v2419_v16 = vadd.f32 %v2418_v15, %v2417_v30  ;;  %v6126_v60 = vrot.slane %v5753_v12, 1  ;;  %3035 = vmatprep.subr.bf16.mxu1 %v4369_v21 }
 0x383   :  { %v3064_v22 = vunpack.c.l.b16 %v2615_v47  ;;  %v4160_v5 = vpop.eup %4159  ;;  %v3073_v59 = vrot.slane %v3068_v18, 7  ;;  %v2534_v62 = vadd.f32 %v5800_v13, %v2504_v25  ;;  %v2538_v34 = vmax.f32 %v2530_v45, 0.0 }
 0x384   :  { %v2369_v43 = vadd.f32 %v6126_v60, %v5753_v12  ;;  %v2441_v23 = vmul.f32 %v5803_v56, %v5803_v56  ;;  %v5937_v55 = vmul.f32 %v4160_v5, %v2216_v2  ;;  %v5939_v51 = vmul.f32 %v4160_v5, %v2408_v14  ;;  %v3938_v60 = vld [vmem:[#allocation8 + $0xe8] sm:$0xff]  }
 0x385   :  { %v2235_v12 = vadd.f32 %v2234_v35, %v2233_v9  ;;  %v2421_v38 = vadd.f32 %v2420_v19, %v2419_v16  ;;  %v5947_v0 = vsel %vm2771_vm1, %v3073_v59, %v3064_v22  ;;  %v2542_v13 = vmax.f32 %v2534_v62, 0.0  ;;  %3036 = vmatpush1.bf16.msra.mxu1 %v3935_v28 }
 0x386   :  { %v2614_v42 = vpack.c.bf16 %v2538_v34, %v2538_v34  ;;  %v2433_v57 = vmul.f32 %v5762_v40, %v2369_v43  ;;  %v2440_v2 = vmul.f32 %v5729_v4, %v5729_v4  ;;  %v2555_v54 = vrot.slane %v5931_v1, %v6123_v17  ;;  %3037 = vmatprep.subr.bf16.mxu1 %v4369_v21  ;;  %v6127_v43 = vld [vmem:[#allocation15_spill] sm:$0xff] }
 0x387   :  { %v2236_v41 = vrot.slane %v2235_v12, 1  ;;  %v2423_v31 = vadd.f32 %v2422_v48, %v2421_v38  ;;  %v4162_v11 = vpop.eup %4161  ;;  %v2585_v7 = vrot.slane %v5944_v53, %v6123_v17  ;;  %v2551_v27 = vrot.slane %v5931_v1, %v6124_v61 }
 0x388   :  { %v2618_v15 = vpack.c.bf16 %v2542_v13, %v2542_v13  ;;  %v2449_v40 = vsub.f32 %v2433_v57, %v2441_v23  ;;  %v4164_v14 = vpop.eup %4163  ;;  %v2444_v20 = vmul.f32 %v5937_v55, %v5937_v55  ;;  %v2471_v26 = vmul.f32 %v4162_v11, %v5741_v8 }
 0x389   :  { %v2424_v39 = vrot.slane %v2423_v31, 4  ;;  %v2581_v19 = vrot.slane %v5944_v53, %v6124_v61  ;;  %v4166_v48 = vpop.eup %4165  ;;  %v2237_v46 = vadd.f32 %v2236_v41, %v2235_v12  ;;  %v2475_v17 = vmul.f32 %v4164_v14, %v5751_v32  ;;  %3038 = vmatpush1.bf16.msra.mxu1 %v3936_v6  ;;  %v3939_v41 = vld [vmem:[#allocation8 + $0xf0] sm:$0xff]  }
 0x38a   :  { %v3063_v10 = vunpack.c.l.b16 %v2614_v42  ;;  %v3067_v52 = vunpack.c.l.b16 %v2618_v15  ;;  %v4168_v3 = vpop.eup %4167  ;;  %v2569_v37 = vmul.f32 %v2555_v54, %v2471_v26  ;;  %v2470_v47 = vmul.f32 %v4166_v48, %v5784_v24  ;;  %3039 = vmatprep.subr.bf16.mxu1 %v4369_v21 }
 0x38b   :  { %v2425_v36 = vadd.f32 %v2424_v39, %v2423_v31  ;;  %v2448_v63 = vsub.f32 %v5731_v50, %v2440_v2  ;;  %v2573_v58 = vmul.f32 %v2555_v54, %v2475_v17  ;;  %v2474_v8 = vmul.f32 %v4168_v3, %v5786_v49 }
 0x38c   :  { %v3071_v9 = vrot.slane %v3067_v52, 7  ;;  %v5969_v61 = vmax.f32 %v2449_v40, 0.0001  ;;  %v4170_v32 = vpop.eup %4169  ;;  %v2599_v22 = vadd.f32 %v2585_v7, %v2569_v37  ;;  %v2568_v18 = vmul.f32 %v2551_v27, %v2470_v47 }
 0x38d   :  { %v2426_v30 = vrot.slane %v2425_v36, 2  ;;  %v2452_v25 = vsub.f32 %v5939_v51, %v2444_v20  ;;  %v2603_v45 = vadd.f32 %v2585_v7, %v2573_v58  ;;  %v2572_v24 = vmul.f32 %v2551_v27, %v2474_v8  ;;  %3040 = vmatpush1.bf16.msra.mxu1 %v3937_v33 }
 0x38e   :  { %v5973_v35 = vsel %vm2771_vm1, %v3071_v9, %v3063_v10  ;;  %v2245_v50 = vmul.f32 %v4170_v32, %v2237_v46  ;;  %v2607_v28 = vmax.f32 %v2599_v22, 0.0  ;;  %v2598_v49 = vadd.f32 %v2581_v19, %v2568_v18  ;;  %3041 = vmatprep.subr.bf16.mxu1 %v4369_v21 }
 0x38f   :  { %v2427_v16 = vadd.f32 %v2426_v30, %v2425_v36  ;;  %v5976_v5 = vsub.s32 3, %v6127_v43  ;;  %v2611_v59 = vmax.f32 %v2603_v45, 0.0  ;;  %v2602_v62 = vadd.f32 %v2581_v19, %v2572_v24 }
 0x390   :  { %4171 = vrsqrt.f32 %v5969_v61  ;;  %v2456_v34 = vmax.f32 %v2448_v63, 0.0001  ;;  %v2685_v51 = vpack.c.bf16 %v2607_v28, %v2607_v28  ;;  %v2606_v12 = vmax.f32 %v2598_v49, 0.0  ;;  %v3910_v63 = vld [vmem:[#allocation7] sm:$0xff]  }
 0x391   :  { %v2428_v23 = vrot.slane %v2427_v16, 1  ;;  %v2460_v38 = vmax.f32 %v2452_v25, 0.0001  ;;  %v2689_v13 = vpack.c.bf16 %v2611_v59, %v2611_v59  ;;  %v2610_v42 = vmax.f32 %v2602_v62, 0.0  ;;  %3042 = vmatpush1.bf16.msra.mxu1 %v3938_v60  ;;  %v3913_v60 = vld [vmem:[#allocation7 + $0x8] sm:$0xff]  }
 0x392   :  { %4173 = vrsqrt.f32 %v2456_v34  ;;  %v2490_v57 = vsub.s32 2, %v6127_v43  ;;  %v2684_v2 = vpack.c.bf16 %v2606_v12, %v2606_v12  ;;  %v2445_v54 = vmul.f32 %v2245_v50, %v2245_v50  ;;  %3043 = vmatprep.subr.bf16.mxu1 %v4369_v21 }
 0x393   :  { %v2429_v31 = vadd.f32 %v2428_v23, %v2427_v16  ;;  %4175 = vrsqrt.f32 %v2460_v38  ;;  %v2767_v6 = vunpack.c.l.b16 %v2689_v13  ;;  %v2688_v11 = vpack.c.bf16 %v2610_v42, %v2610_v42 }
 0x394   :  { %v2763_v7 = vunpack.c.l.b16 %v2685_v51  ;;  %v2495_v15 = vrot.slane %v5768_v29, %v5976_v5  ;;  %v2525_v40 = vrot.slane %v5773_v44, %v5976_v5  ;;  %v2491_v39 = vrot.slane %v5768_v29, %v2490_v57 }
 0x395   :  { %v2437_v27 = vmul.f32 %v4170_v32, %v2429_v31  ;;  %v2773_v14 = vrot.slane %v2767_v6, 7  ;;  %v2766_v20 = vunpack.c.l.b16 %v2688_v11  ;;  %v2521_v26 = vrot.slane %v5773_v44, %v2490_v57  ;;  %3044 = vmatpush1.bf16.msra.mxu1 %v3939_v41  ;;  %v3912_v32 = vld [vmem:[#allocation7 + $0x48] sm:$0xff]  }
 0x396   :  { %v2762_v19 = vunpack.c.l.b16 %v2684_v2  ;;  %v2503_v46 = vmul.f32 %v2495_v15, %v5803_v56  ;;  %v2507_v17 = vmul.f32 %v2495_v15, %v2245_v50  ;;  %3315 = vmatprep.subr.bf16.mxu1 %v4369_v21  ;;  %v2502_v3 = vmul.f32 %v2491_v39, %v5729_v4 }
 0x397   :  { %v2453_v48 = vsub.f32 %v2437_v27, %v2445_v54  ;;  %v2774_v10 = vsel %vm2771_vm1, %v2773_v14, %v2763_v7  ;;  %v2770_v52 = vrot.slane %v2766_v20, 7  ;;  %v2506_v36 = vmul.f32 %v2491_v39, %v5937_v55  ;;  %v3917_v54 = vld [vmem:[#allocation7 + $0x58] sm:$0xff]  }
 0x398   :  { %v2780_v37 = vpack.c.b16 %v2774_v10, %v2774_v10  ;;  %v2533_v29 = vadd.f32 %v2525_v40, %v2503_v46  ;;  %v2537_v58 = vadd.f32 %v2525_v40, %v2507_v17  ;;  %v2532_v8 = vadd.f32 %v2521_v26, %v2502_v3  ;;  %v3922_v17 = vld [vmem:[#allocation7 + $0x20] sm:$0xff]  }
 0x399   :  { %v2461_v47 = vmax.f32 %v2453_v48, 0.0001  ;;  %v2772_v44 = vsel %vm2771_vm1, %v2770_v52, %v2762_v19  ;;  %v2536_v56 = vadd.f32 %v2521_v26, %v2506_v36  ;;  %v2559_v30 = vrot.slane %v5931_v1, %v2490_v57  ;;  %v3920_v19 = vld [vmem:[#allocation7 + $0x60] sm:$0xff]  }
 0x39a   :  { %v4172_v33 = vpop.eup %4171  ;;  %3007 = vmatprep.mubr.bf16.mxu0 %v2780_v37  ;;  %v2779_v9 = vpack.c.b16 %v2772_v44, %v2772_v44  ;;  %v2541_v22 = vmax.f32 %v2533_v29, 0.0  ;;  %v3080_v55 = vpack.c.b16 %v5947_v0, %v5947_v0  ;;  %v2545_v18 = vmax.f32 %v2537_v58, 0.0  ;;  %v3914_v0 = vld [vmem:[#allocation7 + $0x50] sm:$0xff]   ;;  %v3923_v37 = vld [vmem:[#allocation7 + $0x68] sm:$0xff]  }
 0x39b   :  { %4177 = vrsqrt.f32 %v2461_v47  ;;  %v2540_v25 = vmax.f32 %v2532_v8, 0.0  ;;  %v2544_v45 = vmax.f32 %v2536_v56, 0.0  ;;  %v2473_v50 = vmul.f32 %v4172_v33, %v5969_v61  ;;  %v3926_v58 = vld [vmem:[#allocation7 + $0x70] sm:$0xff]  }
 0x39c   :  { %v4174_v4 = vpop.eup %4173  ;;  %3008 = vmatmul.mubr.bf16.vlgmr.msra.gmra.mrb[32].mxu0 %v2779_v9  ;;  %v2563_v16 = vrot.slane %v5931_v1, %v5976_v5  ;;  %v2589_v49 = vrot.slane %v5944_v53, %v2490_v57  ;;  %v2617_v59 = vpack.c.bf16 %v2541_v22, %v2541_v22  ;;  %v2621_v62 = vpack.c.bf16 %v2545_v18, %v2545_v18  ;;  %v3916_v57 = vld [vmem:[#allocation7 + $0x10] sm:$0xff]   ;;  %v3930_v18 = vld [vmem:[#allocation7 + $0x38] sm:$0xff]  }
 0x39d   :  { %v4176_v24 = vpop.eup %4175  ;;  %v2472_v28 = vmul.f32 %v4174_v4, %v2456_v34  ;;  %3611 = vmatpush3.bf16.msra.mxu0 %v3910_v63  ;;  %3307 = vmatprep.mubr.bf16.mxu0 %v3080_v55  ;;  %v2616_v51 = vpack.c.bf16 %v2540_v25, %v2540_v25  ;;  %v2620_v12 = vpack.c.bf16 %v2544_v45, %v2544_v45  ;;  %v3927_v56 = vld [vmem:[#allocation7 + $0x30] sm:$0xff]   ;;  %v3940_v55 = vld [vmem:[#allocation7 + $0x80] sm:$0xff]  }
 0x39e   :  { %v2476_v43 = vmul.f32 %v4176_v24, %v2460_v38  ;;  %3612 = vmatprep.subr.bf16.mxu0 %v3912_v32  ;;  %v3070_v42 = vunpack.c.l.b16 %v2621_v62  ;;  %v2593_v61 = vrot.slane %v5944_v53, %v5976_v5  ;;  %v2571_v2 = vmul.f32 %v2563_v16, %v2473_v50  ;;  %v3919_v53 = vld [vmem:[#allocation7 + $0x18] sm:$0xff]   ;;  %v3941_v24 = vld [vmem:[#allocation7 + $0x88] sm:$0xff]  }
 0x39f   :  { %v2570_v23 = vmul.f32 %v2559_v30, %v2472_v28  ;;  %v3069_v34 = vunpack.c.l.b16 %v2620_v12  ;;  %v3066_v31 = vunpack.c.l.b16 %v2617_v59  ;;  %v3065_v11 = vunpack.c.l.b16 %v2616_v51  ;;  %v3943_v28 = vld [vmem:[#allocation7 + $0x98] sm:$0xff]   ;;  %v3948_v59 = vld [vmem:[#allocation7 + $0xc0] sm:$0xff]   ;;  %v3949_v62 = vld [vmem:[#allocation7 + $0xc8] sm:$0xff]  }
 0x3a0   :  { %v2574_v13 = vmul.f32 %v2559_v30, %v2476_v43  ;;  %v3077_v38 = vrot.slane %v3070_v42, 7  ;;  %v2601_v20 = vadd.f32 %v2593_v61, %v2571_v2  ;;  %v3929_v30 = vld [vmem:[#allocation7 + $0x78] sm:$0xff]   ;;  %v3079_v50 = vpack.c.b16 %v5973_v35, %v5973_v35  ;;  %v3946_v43 = vld [vmem:[#allocation7 + $0xb0] sm:$0xff]   ;;  %v3952_v51 = vld [vmem:[#allocation7 + $0xe0] sm:$0xff]  }
 0x3a1   :  { %v2600_v1 = vadd.f32 %v2589_v49, %v2570_v23  ;;  %3613 = vmatpush3.bf16.msra.mxu0 %v3913_v60  ;;  %v3075_v7 = vrot.slane %v3069_v34, 7  ;;  %v3945_v60 = vld [vmem:[#allocation7 + $0xa8] sm:$0xff]   ;;  %v3947_v35 = vld [vmem:[#allocation7 + $0xb8] sm:$0xff]  }
 0x3a2   :  { %v2604_v41 = vadd.f32 %v2589_v49, %v2574_v13  ;;  %3614 = vmatprep.subr.bf16.mxu0 %v3914_v0  ;;  %v3078_v15 = vsel %vm2771_vm1, %v3077_v38, %v3066_v31  ;;  %v2609_v52 = vmax.f32 %v2601_v20, 0.0  ;;  %v3944_v49 = vld [vmem:[#allocation7 + $0xa0] sm:$0xff]   ;;  %v3950_v0 = vld [vmem:[#allocation7 + $0xd0] sm:$0xff]   ;;  %v3951_v23 = vld [vmem:[#allocation7 + $0xd8] sm:$0xff]  }
 0x3a3   :  { %v2608_v6 = vmax.f32 %v2600_v1, 0.0  ;;  %v6005_v14 = vsel %vm2771_vm1, %v3075_v7, %v3065_v11  ;;  %v3082_v45 = vpack.c.b16 %v3078_v15, %v3078_v15  ;;  %v3953_v12 = vld [vmem:[#allocation7 + $0xe8] sm:$0xff]   ;;  %v3954_v13 = vld [vmem:[#allocation7 + $0xf0] sm:$0xff]  }
 0x3a4   :  { %v2612_v27 = vmax.f32 %v2604_v41, 0.0  ;;  %v2687_v44 = vpack.c.bf16 %v2609_v52, %v2609_v52  ;;  %v3081_v42 = vpack.c.b16 %v6005_v14, %v6005_v14  ;;  %v3587_v14 = vld [vmem:[%s6056_s12] ss:$0 sm:$0xff] }
 0x3a5   :  { %v4178_v40 = vpop.eup %4177  ;;  %3615 = vmatpush3.bf16.msra.mxu0 %v3916_v57  ;;  %v2686_v39 = vpack.c.bf16 %v2608_v6, %v2608_v6 }
 0x3a6   :  { %v2477_v5 = vmul.f32 %v4178_v40, %v2461_v47  ;;  %v2690_v26 = vpack.c.bf16 %v2612_v27, %v2612_v27  ;;  %3616 = vmatprep.subr.bf16.mxu0 %v3917_v54  ;;  %v3924_v47 = vld [vmem:[#allocation7 + $0x28] sm:$0xff]   ;;  %v2765_v9 = vunpack.c.l.b16 %v2687_v44 }
 0x3a7   :  { %v2764_v3 = vunpack.c.l.b16 %v2686_v39 }
 0x3a8   :  { %v2575_v48 = vmul.f32 %v2563_v16, %v2477_v5  ;;  %v2768_v46 = vunpack.c.l.b16 %v2690_v26  ;;  %v3942_v16 = vld [vmem:[#allocation7 + $0x90] sm:$0xff]  }
 0x3a9   :  { %3617 = vmatpush3.bf16.msra.mxu0 %v3919_v53 }
 0x3aa   :  { %v2605_v10 = vadd.f32 %v2593_v61, %v2575_v48  ;;  %v2775_v36 = vrot.slane %v2768_v46, 7  ;;  %3618 = vmatprep.subr.bf16.mxu0 %v3920_v19 }
 0x3ac   :  { %v2613_v29 = vmax.f32 %v2605_v10, 0.0  ;;  %v2776_v33 = vsel %vm2771_vm1, %v2775_v36, %v2764_v3 }
 0x3ad   :  { %3619 = vmatpush3.bf16.msra.mxu0 %v3922_v17  ;;  %v2781_v25 = vpack.c.b16 %v2776_v33, %v2776_v33 }
 0x3ae   :  { %v2691_v63 = vpack.c.bf16 %v2613_v29, %v2613_v29  ;;  %3620 = vmatprep.subr.bf16.mxu0 %v3923_v37 }
 0x3b0   :  { %v2769_v8 = vunpack.c.l.b16 %v2691_v63 }
 0x3b1   :  { %3621 = vmatpush3.bf16.msra.mxu0 %v3924_v47 }
 0x3b2   :  { %v2777_v32 = vrot.slane %v2769_v8, 7  ;;  %3622 = vmatprep.subr.bf16.mxu0 %v3926_v58 }
 0x3b4   :  { %v2778_v22 = vsel %vm2771_vm1, %v2777_v32, %v2765_v9 }
 0x3b5   :  { %v2782_v4 = vpack.c.b16 %v2778_v22, %v2778_v22  ;;  %3623 = vmatpush3.bf16.msra.mxu0 %v3927_v56 }
 0x3b6   :  { %3624 = vmatprep.subr.bf16.mxu0 %v3929_v30 }
 0x3b7   :  { %3554 = vmatprep.mubr.msk.bf16.mxu1 %vm577_vm0, %v2782_v4 }
 0x3b8   :  { %3048 = vmatmul.mubr.bf16.vlgmr.msra.gmra.mrb[64].mxu1 %v2781_v25 }
 0x3b9   :  { %3316 = vmatpush1.bf16.msra.mxu1 %v3940_v55  ;;  %3586 = vmatprep.mubr.msk.bf16.mxu1 %vm577_vm0, %v3082_v45 }
 0x3ba   :  { %3625 = vmatpush3.bf16.msra.mxu0 %v3930_v18  ;;  %3317 = vmatprep.subr.bf16.mxu1 %v4369_v21 }
 0x3bd   :  { %3308 = vmatmul.mubr.bf16.vlgmr.msra.gmra.mrb[36].mxu0 %v3079_v50  ;;  %3318 = vmatpush1.bf16.msra.mxu1 %v3941_v24 }
 0x3be   :  { %3319 = vmatprep.subr.bf16.mxu1 %v4369_v21 }
 0x3c1   :  { %3320 = vmatpush1.bf16.msra.mxu1 %v3942_v16 }
 0x3c2   :  { %3321 = vmatprep.subr.bf16.mxu1 %v4369_v21 }
 0x3c5   :  { %3322 = vmatpush1.bf16.msra.mxu1 %v3943_v28 }
 0x3c6   :  { %3323 = vmatprep.subr.bf16.mxu1 %v4369_v21 }
 0x3c9   :  { %3324 = vmatpush1.bf16.msra.mxu1 %v3944_v49 }
 0x3ca   :  { %3325 = vmatprep.subr.bf16.mxu1 %v4369_v21 }
 0x3cd   :  { %3326 = vmatpush1.bf16.msra.mxu1 %v3945_v60 }
 0x3ce   :  { %3327 = vmatprep.subr.bf16.mxu1 %v4369_v21 }
 0x3d1   :  { %3328 = vmatpush1.bf16.msra.mxu1 %v3946_v43 }
 0x3d2   :  { %3329 = vmatprep.subr.bf16.mxu1 %v4369_v21 }
 0x3d5   :  { %3330 = vmatpush1.bf16.msra.mxu1 %v3947_v35 }
 0x3d6   :  { %3331 = vmatprep.subr.bf16.mxu1 %v4369_v21 }
 0x3d9   :  { %3332 = vmatpush1.bf16.msra.mxu1 %v3948_v59 }
 0x3da   :  { %3333 = vmatprep.subr.bf16.mxu1 %v4369_v21 }
 0x3dd   :  { %3334 = vmatpush1.bf16.msra.mxu1 %v3949_v62 }
 0x3de   :  { %3335 = vmatprep.subr.bf16.mxu1 %v4369_v21 }
 0x3e1   :  { %3336 = vmatpush1.bf16.msra.mxu1 %v3950_v0 }
 0x3e2   :  { %3337 = vmatprep.subr.bf16.mxu1 %v4369_v21 }
 0x3e5   :  { %3338 = vmatpush1.bf16.msra.mxu1 %v3951_v23 }
 0x3e6   :  { %3339 = vmatprep.subr.bf16.mxu1 %v4369_v21 }
 0x3e9   :  { %3340 = vmatpush1.bf16.msra.mxu1 %v3952_v51 }
 0x3ea   :  { %3341 = vmatprep.subr.bf16.mxu1 %v4369_v21 }
 0x3ed   :  { %3342 = vmatpush1.bf16.msra.mxu1 %v3953_v12 }
 0x3ee   :  { %3343 = vmatprep.subr.bf16.mxu1 %v4369_v21 }
 0x3f1   :  { %3344 = vmatpush1.bf16.msra.mxu1 %v3954_v13 }
 0x3f4   :  { %3348 = vmatmul.mubr.bf16.vlgmr.msra.gmra.mrb[68].mxu1 %v3081_v42 }
 0x46f   :  { %v3604_v61 = vpop.f32.mrb[32].mxu0 }
 0x470   :  { %v3605_v1 = vpop.f32.mrb[33].mxu0 }
 0x471   :  { %v3606_v34 = vadd.f32 %v3605_v1, %v3604_v61  ;;  %v3607_v57 = vpop.f32.mrb[34].mxu0 }
 0x472   :  { %v3608_v2 = vpop.f32.mrb[35].mxu0 }
 0x48b   :  { %v3049_v41 = vpop.f32.mrb[64].mxu1 }
 0x48c   :  { %v3050_v31 = vadd.f32 %v3606_v34, %v3049_v41  ;;  %v3051_v38 = vpop.f32.mrb[65].mxu1 }
 0x48d   :  { %v3052_v54 = vpop.f32.mrb[66].mxu1 }
 0x48e   :  { %v3053_v6 = vpop.f32.mrb[67].mxu1 }
 0x490   :  { %v3626_v11 = vpop.f32.mrb[36].mxu0 }
 0x491   :  { %v3627_v7 = vpop.f32.mrb[37].mxu0 }
 0x492   :  { %v3628_v27 = vadd.f32 %v3627_v7, %v3626_v11  ;;  %v3629_v15 = vpop.f32.mrb[38].mxu0 }
 0x493   :  { %v3630_v21 = vpop.f32.mrb[39].mxu0 }
 0x494   :  { %v3310_v40 = vadd.f32 %v3628_v27, %v3050_v31 }
 0x4c7   :  { %v3349_v53 = vpop.f32.mrb[68].mxu1 }
 0x4c8   :  { %v3350_v5 = vadd.f32 %v3349_v53, %v3310_v40  ;;  %v3351_v20 = vpop.f32.mrb[69].mxu1 }
 0x4c9   :  { %v3352_v39 = vpop.f32.mrb[70].mxu1 }
 0x4ca   :  { %v3362_v26 = vadd.f32 %v3587_v14, %v3350_v5  ;;  %v3353_v19 = vpop.f32.mrb[71].mxu1 }
 0x4cc   :  { %v3363_v48 = vmul.f32 %v3362_v26, %v3362_v26 }
 0x4ce   :  { %v3365_v46 = vsel %vm3364_vm2, %v3363_v48, 0.0 }
 0x4cf   :  { %3366 = vadd.xlane.f32.xlu0 %v3365_v46 }
 0x55c   :  { %v3367_v17 = vpop.xlane.xlu0 %3366 }
 0x55d   :  { %v3368_v10 = vmax.f32 %v3367_v17, 1e-24 }
 0x55f   :  { %4179 = vrsqrt.f32 %v3368_v10 }
 0x569   :  { %v4180_v52 = vpop.eup %4179 }
 0x56a   :  { %v3370_v3 = vmul.f32 %v4180_v52, %v3362_v26 }
 0x56c   :  { %3371 = vst [vmem:[#allocation10] sm:$0x3] %v3370_v3 }
 0x56d   :  { %4344 = shalt.err (!%p4341_p8)
}
 0x56e   :  { %s4345_s2 = scalar_lea.hbm %s6057_s13, 32 }
 0x56f   :  { %p4346_p9 = scmp.ne.s32.totalorder %s6057_s13, %s4345_s2  ;;  %p4349_p10 = scmp.lt.u32.totalorder %s4345_s2, %s6057_s13 }
 0x571   :  { %p4351_p11 = pnand %p4349_p10, %p4346_p9 }
 0x573   :  { %4354 = shalt.err (!%p4351_p11)
}
 0x574   :  { %3381 = dma.vmem_to_hbm [thread:$0]  %s3379_s25, 32, %s6057_s13, [#allocation4]  }
 0x575   :  { %4361 = dma.done.wait [#allocation4], 32  }
 0x576   :  { %4362 = vsyncadd [#allocation4], 4294967264 }
 0x577   :  { %3385 = vsyncpa [#allocation3], 1 }
 0x578   :  { %3386 = vsyncpa [#allocation6], 1 }
 0x579   :  { %3387 = vsyncpa [#allocation9], 1 }
 0x57a   :  { %3388 = vsyncpa [#allocation4], 1 }

</bundles_post_ra>
